<compile_context>
chip_gen: v7x
topology: tpu7x:2x2x1
jax: 0.10.0
libtpu: 0.0.40
codegen_flags: <defaults>
</compile_context>

<pallas_src>
import math
import functools

import jax
import jax.numpy as jnp
from jax.experimental import pallas as pl
from jax.experimental.pallas import tpu as pltpu


# ----------------------------- kernel helpers -------------------------------

def _layernorm(x, gamma, beta, eps=1e-5):
    # PyTorch nn.LayerNorm: biased variance, eps inside sqrt.  f32 math.
    mu = jnp.mean(x, axis=-1, keepdims=True)
    var = jnp.mean((x - mu) ** 2, axis=-1, keepdims=True)
    return (x - mu) * jax.lax.rsqrt(var + eps) * gamma + beta


# ----------------------- fully fused forward Pallas kernel -------------------

def fused_encoder_kernel(x_ref, mask_ref,
                         wqkv_ref, bqkv_ref, wo_ref, bo_ref,
                         w1_ref, b1_ref, w2_ref, b2_ref,
                         g1_ref, be1_ref, g2_ref, be2_ref,
                         gf_ref, bf_ref, o_ref, *, B, S, nhead, nlayers):
    """All encoder layers + final norm + per-batch sequence mean, one call."""
    x = x_ref[...].astype(jnp.float32)                     # (B*S, D)
    T, D = x.shape
    hd = D // nhead
    scale = 1.0 / math.sqrt(hd)
    mask = mask_ref[...].astype(jnp.float32)                # (S, S) additive

    # TODO(synk): static unroll is fine for a handful of layers; switch to
    # lax.fori_loop / a layer grid axis when nlayers grows.
    for l in range(nlayers):
        # ---- fused, lane-dense QKV projection: ONE matmul + ONE bias add ----
        xb = x.astype(jnp.bfloat16)
        wqkv_l = wqkv_ref[l]                                 # (D, 3D) bf16
        qkv = jnp.dot(xb, wqkv_l,
                      preferred_element_type=jnp.float32) + bqkv_ref[l]  # (T, 3D)

        wo_l = wo_ref[l]                                     # (nhead, hd, D) bf16

        # ---- per-sequence multi-head attention (B, nhead static loops) ----
        attn_parts = []
        for b in range(B):
            r0 = b * S
            acc = None
            for n in range(nhead):
                q = qkv[r0:r0 + S, n * hd:(n + 1) * hd] * scale          # (S, hd)
                k = qkv[r0:r0 + S, D + n * hd:D + (n + 1) * hd]
                v = qkv[r0:r0 + S, 2 * D + n * hd:2 * D + (n + 1) * hd]

                s = jnp.einsum('ih,jh->ij', q.astype(jnp.bfloat16),
                               k.astype(jnp.bfloat16),
                               preferred_element_type=jnp.float32)        # (S, S)
                s = s + mask
                s = s - jnp.max(s, axis=-1, keepdims=True)
                p = jnp.exp(s)
                p = p / jnp.sum(p, axis=-1, keepdims=True)                # exact

                ah = jnp.dot(p.astype(jnp.bfloat16), v.astype(jnp.bfloat16),
                             preferred_element_type=jnp.float32)          # (S, hd)
                # concat(heads) @ Wo.T == sum_h head_h @ Wo.T[h*hd:(h+1)*hd, :]
                oh = jnp.dot(ah.astype(jnp.bfloat16), wo_l[n],
                             preferred_element_type=jnp.float32)          # (S, D)
                acc = oh if acc is None else acc + oh
            attn_parts.append(acc)
        attn = jnp.concatenate(attn_parts, axis=0) + bo_ref[l]            # (T, D)

        # residual + norm1 (post-norm, PyTorch default)
        x = _layernorm(x + attn, g1_ref[l], be1_ref[l])

        # ---- feed-forward (relu); dropout p=0.0 -> no-op;  (B*S, D) matmuls ----
        xb = x.astype(jnp.bfloat16)
        h1 = jnp.maximum(
            jnp.dot(xb, w1_ref[l], preferred_element_type=jnp.float32) + b1_ref[l],
            0.0)
        ff = jnp.dot(h1.astype(jnp.bfloat16), w2_ref[l],
                     preferred_element_type=jnp.float32) + b2_ref[l]

        # residual + norm2
        x = _layernorm(x + ff, g2_ref[l], be2_ref[l])

    # ---- final encoder LayerNorm + mean over the sequence axis, per batch ----
    y = _layernorm(x, gf_ref[...], bf_ref[...])                           # (T, D)
    for b in range(B):
        m = jnp.mean(y[b * S:(b + 1) * S], axis=0, keepdims=True)         # (1, D)
        o_ref[pl.ds(b, 1), :] = m.astype(o_ref.dtype)


def fused_encoder(x, mask, params, *, nhead, nlayers):
    """x: (B, S, D) embedded + positionally-encoded activations (f32)."""
    B, S, D = x.shape
    x2 = x.reshape(B * S, D).astype(jnp.float32)             # flatten batch
    lp = params["layers"]

    weight_names = ["wqkv_t", "bqkv", "wo_h", "bo", "w1_t", "b1",
                    "w2_t", "b2", "g1", "be1", "g2", "be2"]
    weights = [lp[n] for n in weight_names]

    def const_spec(a):
        nd = a.ndim
        return pl.BlockSpec(a.shape, lambda i, nd=nd: (0,) * nd)

    in_specs = [const_spec(x2), const_spec(mask)]
    in_specs += [const_spec(w) for w in weights]
    in_specs += [const_spec(params["norm_g"]), const_spec(params["norm_b"])]

    out = pl.pallas_call(
        functools.partial(fused_encoder_kernel, B=B, S=S,
                          nhead=nhead, nlayers=nlayers),
        out_shape=jax.ShapeDtypeStruct((B, D), jnp.float32),   # lane-dense slab
        grid=(1,),                                              # single step
        in_specs=in_specs,
        out_specs=pl.BlockSpec((B, D), lambda i: (0, 0)),
        compiler_params=pltpu.CompilerParams(
            dimension_semantics=("arbitrary",),
            vmem_limit_bytes=32 * 1024 * 1024),
    )(x2, mask, *weights, params["norm_g"], params["norm_b"])
    return out                                                   # (B, D)


# ------------------------------- full forward --------------------------------

def transformer_encoder_forward(src_tokens, src_mask, params, *, nhead, nlayers):
    """src_tokens: int32 (B, S) token ids (the torch .view of (B, S, 1))."""
    B, S = src_tokens.shape
    # TODO(synk): embedding gather + positional add kept as tiny XLA ops; could
    # be folded into the kernel via scalar-prefetch row gather if S grows.
    emb = params["embedding"][src_tokens]                       # (B, S, D)
    x = (emb + params["pe"][:S][None, :, :]).astype(jnp.float32)  # dropout p=0.0
    return fused_encoder(x, src_mask, params, nhead=nhead, nlayers=nlayers)


# ------------------------------- param init ----------------------------------

def init_params(key, *, n_token, d_model, nhead, nhidden, nlayers, max_len):
    assert d_model % nhead == 0
    hd = d_model // nhead

    def uni(k, shape, scale=0.1):
        return jax.random.uniform(k, shape, jnp.float32, -scale, scale)

    keys = jax.random.split(key, 1 + 8 * nlayers)
    params = {"embedding": jax.random.normal(keys[0], (n_token, d_model),
                                             jnp.float32)}

    # positional encoding buffer (same formula as PositionalEncoding)
    position = jnp.arange(max_len, dtype=jnp.float32)[:, None]
    div_term = jnp.exp(jnp.arange(0, d_model, 2, dtype=jnp.float32)
                       * (-math.log(10000.0) / d_model))
    pe = jnp.zeros((max_len, d_model), jnp.float32)
    pe = pe.at[:, 0::2].set(jnp.sin(position * div_term))
    pe = pe.at[:, 1::2].set(jnp.cos(position * div_term))
    params["pe"] = pe

    acc = {n: [] for n in ["wqkv_t", "bqkv", "wo_h", "bo", "w1_t", "b1",
                           "w2_t", "b2", "g1", "be1", "g2", "be2"]}
    for l in range(nlayers):
        k = keys[1 + 8 * l: 1 + 8 * (l + 1)]
        w_in = uni(k[0], (3 * d_model, d_model))       # torch in_proj_weight
        b_in = uni(k[1], (3 * d_model,))               # torch in_proj_bias
        wo = uni(k[2], (d_model, d_model))             # torch out_proj.weight
        bo = uni(k[3], (d_model,))                     # torch out_proj.bias
        w1 = uni(k[4], (nhidden, d_model))             # torch linear1.weight
        b1 = uni(k[5], (nhidden,))                     # torch linear1.bias
        w2 = uni(k[6], (d_model, nhidden))             # torch linear2.weight
        b2 = uni(k[7], (d_model,))                     # torch linear2.bias

        # fused, lane-dense QKV: qkv = x @ in_proj_weight.T  -> (T, 3D)
        acc["wqkv_t"].append(w_in.T.astype(jnp.bfloat16))          # (D, 3D)
        acc["bqkv"].append(b_in.reshape(1, 3 * d_model))            # (1, 3D)
        # concat(heads) @ Wo.T == sum_h head_h @ Wo.T[h*hd:(h+1)*hd, :]
        acc["wo_h"].append(wo.T.reshape(nhead, hd, d_model).astype(jnp.bfloat16))
        acc["bo"].append(bo.reshape(1, d_model))
        acc["w1_t"].append(w1.T.astype(jnp.bfloat16))
        acc["b1"].append(b1.reshape(1, nhidden))
        acc["w2_t"].append(w2.T.astype(jnp.bfloat16))
        acc["b2"].append(b2.reshape(1, d_model))
        acc["g1"].append(jnp.ones((1, d_model), jnp.float32))
        acc["be1"].append(jnp.zeros((1, d_model), jnp.float32))
        acc["g2"].append(jnp.ones((1, d_model), jnp.float32))
        acc["be2"].append(jnp.zeros((1, d_model), jnp.float32))

    params["layers"] = {n: jnp.stack(v, axis=0) for n, v in acc.items()}
    params["norm_g"] = jnp.ones((1, d_model), jnp.float32)   # encoder final norm
    params["norm_b"] = jnp.zeros((1, d_model), jnp.float32)
    return params


# ----------------------------------- main -------------------------------------

if __name__ == "__main__":
    n_token, d_out, max_len = 50, 10, 64
    d_model, nhead, nhidden, nlayers = 128, 4, 128, 2
    B, S = 2, 8

    key = jax.random.PRNGKey(0)
    kparam, ktok = jax.random.split(key)
    params = init_params(kparam, n_token=n_token, d_model=d_model, nhead=nhead,
                         nhidden=nhidden, nlayers=nlayers, max_len=max_len)

    # src corresponds to torch input (B, S, 1) viewed to (B, S) token ids.
    src_tokens = jax.random.randint(ktok, (B, S), 0, n_token, dtype=jnp.int32)
    # additive causal attention mask (S, S): 0 where attended, -1e9 otherwise
    idx = jnp.arange(S)
    src_mask = jnp.where(idx[None, :] <= idx[:, None], 0.0, -1e9).astype(jnp.float32)

    fwd = jax.jit(functools.partial(transformer_encoder_forward,
                                    nhead=nhead, nlayers=nlayers))
    out = fwd(src_tokens, src_mask, params)
    jax.block_until_ready(out)
    assert out.shape == (B, d_model)
    print("KERNEL_OK")
</pallas_src>

<mosaic_0001>
module attributes {stable_mosaic.version = 11 : i64} {
  func.func @fused_encoder_kernel(%arg0: i32, %arg1: memref<16x128xf32, #tpu.memory_space<vmem>>, %arg2: memref<8x8xf32, #tpu.memory_space<vmem>>, %arg3: memref<2x128x384xbf16, #tpu.memory_space<vmem>>, %arg4: memref<2x1x384xf32, #tpu.memory_space<vmem>>, %arg5: memref<2x4x32x128xbf16, #tpu.memory_space<vmem>>, %arg6: memref<2x1x128xf32, #tpu.memory_space<vmem>>, %arg7: memref<2x128x128xbf16, #tpu.memory_space<vmem>>, %arg8: memref<2x1x128xf32, #tpu.memory_space<vmem>>, %arg9: memref<2x128x128xbf16, #tpu.memory_space<vmem>>, %arg10: memref<2x1x128xf32, #tpu.memory_space<vmem>>, %arg11: memref<2x1x128xf32, #tpu.memory_space<vmem>>, %arg12: memref<2x1x128xf32, #tpu.memory_space<vmem>>, %arg13: memref<2x1x128xf32, #tpu.memory_space<vmem>>, %arg14: memref<2x1x128xf32, #tpu.memory_space<vmem>>, %arg15: memref<1x128xf32, #tpu.memory_space<vmem>>, %arg16: memref<1x128xf32, #tpu.memory_space<vmem>>, %arg17: memref<2x128xf32, #tpu.memory_space<vmem>>) attributes {dimension_semantics = [#tpu.dimension_semantics<arbitrary>], iteration_bounds = array<i64: 1>, scalar_prefetch = 0 : i64, scratch_operands = 0 : i64, tpu.core_type = #tpu.core_type<tc>, window_params = [{pipeline_mode = #tpu.pipeline_mode<synchronous>, transform_indices = @transform_0, window_bounds = array<i64: 16, 128>}, {pipeline_mode = #tpu.pipeline_mode<synchronous>, transform_indices = @transform_1, window_bounds = array<i64: 8, 8>}, {pipeline_mode = #tpu.pipeline_mode<synchronous>, transform_indices = @transform_2, window_bounds = array<i64: 2, 128, 384>}, {pipeline_mode = #tpu.pipeline_mode<synchronous>, transform_indices = @transform_3, window_bounds = array<i64: 2, 1, 384>}, {pipeline_mode = #tpu.pipeline_mode<synchronous>, transform_indices = @transform_4, window_bounds = array<i64: 2, 4, 32, 128>}, {pipeline_mode = #tpu.pipeline_mode<synchronous>, transform_indices = @transform_5, window_bounds = array<i64: 2, 1, 128>}, {pipeline_mode = #tpu.pipeline_mode<synchronous>, transform_indices = @transform_6, window_bounds = array<i64: 2, 128, 128>}, {pipeline_mode = #tpu.pipeline_mode<synchronous>, transform_indices = @transform_7, window_bounds = array<i64: 2, 1, 128>}, {pipeline_mode = #tpu.pipeline_mode<synchronous>, transform_indices = @transform_8, window_bounds = array<i64: 2, 128, 128>}, {pipeline_mode = #tpu.pipeline_mode<synchronous>, transform_indices = @transform_9, window_bounds = array<i64: 2, 1, 128>}, {pipeline_mode = #tpu.pipeline_mode<synchronous>, transform_indices = @transform_10, window_bounds = array<i64: 2, 1, 128>}, {pipeline_mode = #tpu.pipeline_mode<synchronous>, transform_indices = @transform_11, window_bounds = array<i64: 2, 1, 128>}, {pipeline_mode = #tpu.pipeline_mode<synchronous>, transform_indices = @transform_12, window_bounds = array<i64: 2, 1, 128>}, {pipeline_mode = #tpu.pipeline_mode<synchronous>, transform_indices = @transform_13, window_bounds = array<i64: 2, 1, 128>}, {pipeline_mode = #tpu.pipeline_mode<synchronous>, transform_indices = @transform_14, window_bounds = array<i64: 1, 128>}, {pipeline_mode = #tpu.pipeline_mode<synchronous>, transform_indices = @transform_15, window_bounds = array<i64: 1, 128>}, {pipeline_mode = #tpu.pipeline_mode<synchronous>, transform_indices = @transform_16, window_bounds = array<i64: 2, 128>}]} {
    %c0 = arith.constant 0 : index
    %c0_0 = arith.constant 0 : index
    %0 = vector.load %arg1[%c0, %c0_0] : memref<16x128xf32, #tpu.memory_space<vmem>>, vector<16x128xf32>
    %c0_1 = arith.constant 0 : index
    %c0_2 = arith.constant 0 : index
    %1 = vector.load %arg2[%c0_1, %c0_2] : memref<8x8xf32, #tpu.memory_space<vmem>>, vector<8x8xf32>
    %2 = arith.truncf %0 : vector<16x128xf32> to vector<16x128xbf16>
    %c0_3 = arith.constant 0 : index
    %c0_4 = arith.constant 0 : index
    %c0_5 = arith.constant 0 : index
    %3 = vector.load %arg3[%c0_3, %c0_4, %c0_5] : memref<2x128x384xbf16, #tpu.memory_space<vmem>>, vector<1x128x384xbf16>
    %4 = vector.shape_cast %3 : vector<1x128x384xbf16> to vector<128x384xbf16>
    %cst = arith.constant dense<0.000000e+00> : vector<16x384xf32>
    %5 = tpu.matmul %2, %4, %cst {dimension_numbers = #tpu.dot_dimension_numbers<[1], [0], [0], [1], [0, 0, 1, 1], [], []>} : vector<16x128xbf16>, vector<128x384xbf16>, vector<16x384xf32> -> vector<16x384xf32>
    %c0_6 = arith.constant 0 : index
    %c0_7 = arith.constant 0 : index
    %c0_8 = arith.constant 0 : index
    %6 = vector.load %arg4[%c0_6, %c0_7, %c0_8] : memref<2x1x384xf32, #tpu.memory_space<vmem>>, vector<1x1x384xf32>
    %7 = vector.shape_cast %6 : vector<1x1x384xf32> to vector<1x384xf32>
    %8 = vector.broadcast %7 : vector<1x384xf32> to vector<16x384xf32>
    %9 = arith.addf %5, %8 : vector<16x384xf32>
    %c0_9 = arith.constant 0 : index
    %c0_10 = arith.constant 0 : index
    %c0_11 = arith.constant 0 : index
    %c0_12 = arith.constant 0 : index
    %10 = vector.load %arg5[%c0_9, %c0_10, %c0_11, %c0_12] : memref<2x4x32x128xbf16, #tpu.memory_space<vmem>>, vector<1x4x32x128xbf16>
    %11 = vector.shape_cast %10 : vector<1x4x32x128xbf16> to vector<4x32x128xbf16>
    %12 = vector.extract_strided_slice %9 {offsets = [0, 0], sizes = [8, 32], strides = [1, 1]} : vector<16x384xf32> to vector<8x32xf32>
    %cst_13 = arith.constant 0.176776692 : f32
    %13 = vector.broadcast %cst_13 : f32 to vector<8x32xf32>
    %14 = arith.mulf %12, %13 : vector<8x32xf32>
    %15 = vector.extract_strided_slice %9 {offsets = [0, 128], sizes = [8, 32], strides = [1, 1]} : vector<16x384xf32> to vector<8x32xf32>
    %16 = vector.extract_strided_slice %9 {offsets = [0, 256], sizes = [8, 32], strides = [1, 1]} : vector<16x384xf32> to vector<8x32xf32>
    %17 = arith.truncf %14 : vector<8x32xf32> to vector<8x32xbf16>
    %18 = arith.truncf %15 : vector<8x32xf32> to vector<8x32xbf16>
    "tpu.trace_start"() <{level = 10 : i32, message = "ih,jh->ij"}> : () -> ()
    %cst_14 = arith.constant dense<0.000000e+00> : vector<8x8xf32>
    %19 = tpu.matmul %17, %18, %cst_14 {dimension_numbers = #tpu.dot_dimension_numbers<[1], [1], [0], [0], [0, 0, 1, 0], [], []>} : vector<8x32xbf16>, vector<8x32xbf16>, vector<8x8xf32> -> vector<8x8xf32>
    "tpu.trace_stop"() : () -> ()
    %20 = arith.addf %19, %1 : vector<8x8xf32>
    %cst_15 = arith.constant dense<0xFF800000> : vector<8xf32>
    %21 = vector.multi_reduction <maximumf>, %20, %cst_15 [1] : vector<8x8xf32> to vector<8xf32>
    %22 = vector.shape_cast %21 : vector<8xf32> to vector<8x1xf32>
    %23 = vector.broadcast %22 : vector<8x1xf32> to vector<8x8xf32>
    %24 = arith.subf %20, %23 : vector<8x8xf32>
    %25 = math.exp %24 : vector<8x8xf32>
    %cst_16 = arith.constant dense<0.000000e+00> : vector<8xf32>
    %26 = vector.multi_reduction <add>, %25, %cst_16 [1] : vector<8x8xf32> to vector<8xf32>
    %27 = vector.shape_cast %26 : vector<8xf32> to vector<8x1xf32>
    %28 = vector.broadcast %27 : vector<8x1xf32> to vector<8x8xf32>
    %29 = arith.divf %25, %28 : vector<8x8xf32>
    %30 = arith.truncf %29 : vector<8x8xf32> to vector<8x8xbf16>
    %31 = arith.truncf %16 : vector<8x32xf32> to vector<8x32xbf16>
    %cst_17 = arith.constant dense<0.000000e+00> : vector<8x32xf32>
    %32 = tpu.matmul %30, %31, %cst_17 {dimension_numbers = #tpu.dot_dimension_numbers<[1], [0], [0], [1], [0, 0, 1, 1], [], []>} : vector<8x8xbf16>, vector<8x32xbf16>, vector<8x32xf32> -> vector<8x32xf32>
    %33 = arith.truncf %32 : vector<8x32xf32> to vector<8x32xbf16>
    %34 = vector.extract_strided_slice %11 {offsets = [0, 0, 0], sizes = [1, 32, 128], strides = [1, 1, 1]} : vector<4x32x128xbf16> to vector<1x32x128xbf16>
    %35 = vector.shape_cast %34 : vector<1x32x128xbf16> to vector<32x128xbf16>
    %cst_18 = arith.constant dense<0.000000e+00> : vector<8x128xf32>
    %36 = tpu.matmul %33, %35, %cst_18 {dimension_numbers = #tpu.dot_dimension_numbers<[1], [0], [0], [1], [0, 0, 1, 1], [], []>} : vector<8x32xbf16>, vector<32x128xbf16>, vector<8x128xf32> -> vector<8x128xf32>
    %37 = vector.extract_strided_slice %9 {offsets = [0, 32], sizes = [8, 32], strides = [1, 1]} : vector<16x384xf32> to vector<8x32xf32>
    %cst_19 = arith.constant 0.176776692 : f32
    %38 = vector.broadcast %cst_19 : f32 to vector<8x32xf32>
    %39 = arith.mulf %37, %38 : vector<8x32xf32>
    %40 = vector.extract_strided_slice %9 {offsets = [0, 160], sizes = [8, 32], strides = [1, 1]} : vector<16x384xf32> to vector<8x32xf32>
    %41 = vector.extract_strided_slice %9 {offsets = [0, 288], sizes = [8, 32], strides = [1, 1]} : vector<16x384xf32> to vector<8x32xf32>
    %42 = arith.truncf %39 : vector<8x32xf32> to vector<8x32xbf16>
    %43 = arith.truncf %40 : vector<8x32xf32> to vector<8x32xbf16>
    "tpu.trace_start"() <{level = 10 : i32, message = "ih,jh->ij"}> : () -> ()
    %cst_20 = arith.constant dense<0.000000e+00> : vector<8x8xf32>
    %44 = tpu.matmul %42, %43, %cst_20 {dimension_numbers = #tpu.dot_dimension_numbers<[1], [1], [0], [0], [0, 0, 1, 0], [], []>} : vector<8x32xbf16>, vector<8x32xbf16>, vector<8x8xf32> -> vector<8x8xf32>
    "tpu.trace_stop"() : () -> ()
    %45 = arith.addf %44, %1 : vector<8x8xf32>
    %cst_21 = arith.constant dense<0xFF800000> : vector<8xf32>
    %46 = vector.multi_reduction <maximumf>, %45, %cst_21 [1] : vector<8x8xf32> to vector<8xf32>
    %47 = vector.shape_cast %46 : vector<8xf32> to vector<8x1xf32>
    %48 = vector.broadcast %47 : vector<8x1xf32> to vector<8x8xf32>
    %49 = arith.subf %45, %48 : vector<8x8xf32>
    %50 = math.exp %49 : vector<8x8xf32>
    %cst_22 = arith.constant dense<0.000000e+00> : vector<8xf32>
    %51 = vector.multi_reduction <add>, %50, %cst_22 [1] : vector<8x8xf32> to vector<8xf32>
    %52 = vector.shape_cast %51 : vector<8xf32> to vector<8x1xf32>
    %53 = vector.broadcast %52 : vector<8x1xf32> to vector<8x8xf32>
    %54 = arith.divf %50, %53 : vector<8x8xf32>
    %55 = arith.truncf %54 : vector<8x8xf32> to vector<8x8xbf16>
    %56 = arith.truncf %41 : vector<8x32xf32> to vector<8x32xbf16>
    %cst_23 = arith.constant dense<0.000000e+00> : vector<8x32xf32>
    %57 = tpu.matmul %55, %56, %cst_23 {dimension_numbers = #tpu.dot_dimension_numbers<[1], [0], [0], [1], [0, 0, 1, 1], [], []>} : vector<8x8xbf16>, vector<8x32xbf16>, vector<8x32xf32> -> vector<8x32xf32>
    %58 = arith.truncf %57 : vector<8x32xf32> to vector<8x32xbf16>
    %59 = vector.extract_strided_slice %11 {offsets = [1, 0, 0], sizes = [1, 32, 128], strides = [1, 1, 1]} : vector<4x32x128xbf16> to vector<1x32x128xbf16>
    %60 = vector.shape_cast %59 : vector<1x32x128xbf16> to vector<32x128xbf16>
    %cst_24 = arith.constant dense<0.000000e+00> : vector<8x128xf32>
    %61 = tpu.matmul %58, %60, %cst_24 {dimension_numbers = #tpu.dot_dimension_numbers<[1], [0], [0], [1], [0, 0, 1, 1], [], []>} : vector<8x32xbf16>, vector<32x128xbf16>, vector<8x128xf32> -> vector<8x128xf32>
    %62 = arith.addf %36, %61 : vector<8x128xf32>
    %63 = vector.extract_strided_slice %9 {offsets = [0, 64], sizes = [8, 32], strides = [1, 1]} : vector<16x384xf32> to vector<8x32xf32>
    %cst_25 = arith.constant 0.176776692 : f32
    %64 = vector.broadcast %cst_25 : f32 to vector<8x32xf32>
    %65 = arith.mulf %63, %64 : vector<8x32xf32>
    %66 = vector.extract_strided_slice %9 {offsets = [0, 192], sizes = [8, 32], strides = [1, 1]} : vector<16x384xf32> to vector<8x32xf32>
    %67 = vector.extract_strided_slice %9 {offsets = [0, 320], sizes = [8, 32], strides = [1, 1]} : vector<16x384xf32> to vector<8x32xf32>
    %68 = arith.truncf %65 : vector<8x32xf32> to vector<8x32xbf16>
    %69 = arith.truncf %66 : vector<8x32xf32> to vector<8x32xbf16>
    "tpu.trace_start"() <{level = 10 : i32, message = "ih,jh->ij"}> : () -> ()
    %cst_26 = arith.constant dense<0.000000e+00> : vector<8x8xf32>
    %70 = tpu.matmul %68, %69, %cst_26 {dimension_numbers = #tpu.dot_dimension_numbers<[1], [1], [0], [0], [0, 0, 1, 0], [], []>} : vector<8x32xbf16>, vector<8x32xbf16>, vector<8x8xf32> -> vector<8x8xf32>
    "tpu.trace_stop"() : () -> ()
    %71 = arith.addf %70, %1 : vector<8x8xf32>
    %cst_27 = arith.constant dense<0xFF800000> : vector<8xf32>
    %72 = vector.multi_reduction <maximumf>, %71, %cst_27 [1] : vector<8x8xf32> to vector<8xf32>
    %73 = vector.shape_cast %72 : vector<8xf32> to vector<8x1xf32>
    %74 = vector.broadcast %73 : vector<8x1xf32> to vector<8x8xf32>
    %75 = arith.subf %71, %74 : vector<8x8xf32>
    %76 = math.exp %75 : vector<8x8xf32>
    %cst_28 = arith.constant dense<0.000000e+00> : vector<8xf32>
    %77 = vector.multi_reduction <add>, %76, %cst_28 [1] : vector<8x8xf32> to vector<8xf32>
    %78 = vector.shape_cast %77 : vector<8xf32> to vector<8x1xf32>
    %79 = vector.broadcast %78 : vector<8x1xf32> to vector<8x8xf32>
    %80 = arith.divf %76, %79 : vector<8x8xf32>
    %81 = arith.truncf %80 : vector<8x8xf32> to vector<8x8xbf16>
    %82 = arith.truncf %67 : vector<8x32xf32> to vector<8x32xbf16>
    %cst_29 = arith.constant dense<0.000000e+00> : vector<8x32xf32>
    %83 = tpu.matmul %81, %82, %cst_29 {dimension_numbers = #tpu.dot_dimension_numbers<[1], [0], [0], [1], [0, 0, 1, 1], [], []>} : vector<8x8xbf16>, vector<8x32xbf16>, vector<8x32xf32> -> vector<8x32xf32>
    %84 = arith.truncf %83 : vector<8x32xf32> to vector<8x32xbf16>
    %85 = vector.extract_strided_slice %11 {offsets = [2, 0, 0], sizes = [1, 32, 128], strides = [1, 1, 1]} : vector<4x32x128xbf16> to vector<1x32x128xbf16>
    %86 = vector.shape_cast %85 : vector<1x32x128xbf16> to vector<32x128xbf16>
    %cst_30 = arith.constant dense<0.000000e+00> : vector<8x128xf32>
    %87 = tpu.matmul %84, %86, %cst_30 {dimension_numbers = #tpu.dot_dimension_numbers<[1], [0], [0], [1], [0, 0, 1, 1], [], []>} : vector<8x32xbf16>, vector<32x128xbf16>, vector<8x128xf32> -> vector<8x128xf32>
    %88 = arith.addf %62, %87 : vector<8x128xf32>
    %89 = vector.extract_strided_slice %9 {offsets = [0, 96], sizes = [8, 32], strides = [1, 1]} : vector<16x384xf32> to vector<8x32xf32>
    %cst_31 = arith.constant 0.176776692 : f32
    %90 = vector.broadcast %cst_31 : f32 to vector<8x32xf32>
    %91 = arith.mulf %89, %90 : vector<8x32xf32>
    %92 = vector.extract_strided_slice %9 {offsets = [0, 224], sizes = [8, 32], strides = [1, 1]} : vector<16x384xf32> to vector<8x32xf32>
    %93 = vector.extract_strided_slice %9 {offsets = [0, 352], sizes = [8, 32], strides = [1, 1]} : vector<16x384xf32> to vector<8x32xf32>
    %94 = arith.truncf %91 : vector<8x32xf32> to vector<8x32xbf16>
    %95 = arith.truncf %92 : vector<8x32xf32> to vector<8x32xbf16>
    "tpu.trace_start"() <{level = 10 : i32, message = "ih,jh->ij"}> : () -> ()
    %cst_32 = arith.constant dense<0.000000e+00> : vector<8x8xf32>
    %96 = tpu.matmul %94, %95, %cst_32 {dimension_numbers = #tpu.dot_dimension_numbers<[1], [1], [0], [0], [0, 0, 1, 0], [], []>} : vector<8x32xbf16>, vector<8x32xbf16>, vector<8x8xf32> -> vector<8x8xf32>
    "tpu.trace_stop"() : () -> ()
    %97 = arith.addf %96, %1 : vector<8x8xf32>
    %cst_33 = arith.constant dense<0xFF800000> : vector<8xf32>
    %98 = vector.multi_reduction <maximumf>, %97, %cst_33 [1] : vector<8x8xf32> to vector<8xf32>
    %99 = vector.shape_cast %98 : vector<8xf32> to vector<8x1xf32>
    %100 = vector.broadcast %99 : vector<8x1xf32> to vector<8x8xf32>
    %101 = arith.subf %97, %100 : vector<8x8xf32>
    %102 = math.exp %101 : vector<8x8xf32>
    %cst_34 = arith.constant dense<0.000000e+00> : vector<8xf32>
    %103 = vector.multi_reduction <add>, %102, %cst_34 [1] : vector<8x8xf32> to vector<8xf32>
    %104 = vector.shape_cast %103 : vector<8xf32> to vector<8x1xf32>
    %105 = vector.broadcast %104 : vector<8x1xf32> to vector<8x8xf32>
    %106 = arith.divf %102, %105 : vector<8x8xf32>
    %107 = arith.truncf %106 : vector<8x8xf32> to vector<8x8xbf16>
    %108 = arith.truncf %93 : vector<8x32xf32> to vector<8x32xbf16>
    %cst_35 = arith.constant dense<0.000000e+00> : vector<8x32xf32>
    %109 = tpu.matmul %107, %108, %cst_35 {dimension_numbers = #tpu.dot_dimension_numbers<[1], [0], [0], [1], [0, 0, 1, 1], [], []>} : vector<8x8xbf16>, vector<8x32xbf16>, vector<8x32xf32> -> vector<8x32xf32>
    %110 = arith.truncf %109 : vector<8x32xf32> to vector<8x32xbf16>
    %111 = vector.extract_strided_slice %11 {offsets = [3, 0, 0], sizes = [1, 32, 128], strides = [1, 1, 1]} : vector<4x32x128xbf16> to vector<1x32x128xbf16>
    %112 = vector.shape_cast %111 : vector<1x32x128xbf16> to vector<32x128xbf16>
    %cst_36 = arith.constant dense<0.000000e+00> : vector<8x128xf32>
    %113 = tpu.matmul %110, %112, %cst_36 {dimension_numbers = #tpu.dot_dimension_numbers<[1], [0], [0], [1], [0, 0, 1, 1], [], []>} : vector<8x32xbf16>, vector<32x128xbf16>, vector<8x128xf32> -> vector<8x128xf32>
    %114 = arith.addf %88, %113 : vector<8x128xf32>
    %115 = vector.extract_strided_slice %9 {offsets = [8, 0], sizes = [8, 32], strides = [1, 1]} : vector<16x384xf32> to vector<8x32xf32>
    %cst_37 = arith.constant 0.176776692 : f32
    %116 = vector.broadcast %cst_37 : f32 to vector<8x32xf32>
    %117 = arith.mulf %115, %116 : vector<8x32xf32>
    %118 = vector.extract_strided_slice %9 {offsets = [8, 128], sizes = [8, 32], strides = [1, 1]} : vector<16x384xf32> to vector<8x32xf32>
    %119 = vector.extract_strided_slice %9 {offsets = [8, 256], sizes = [8, 32], strides = [1, 1]} : vector<16x384xf32> to vector<8x32xf32>
    %120 = arith.truncf %117 : vector<8x32xf32> to vector<8x32xbf16>
    %121 = arith.truncf %118 : vector<8x32xf32> to vector<8x32xbf16>
    "tpu.trace_start"() <{level = 10 : i32, message = "ih,jh->ij"}> : () -> ()
    %cst_38 = arith.constant dense<0.000000e+00> : vector<8x8xf32>
    %122 = tpu.matmul %120, %121, %cst_38 {dimension_numbers = #tpu.dot_dimension_numbers<[1], [1], [0], [0], [0, 0, 1, 0], [], []>} : vector<8x32xbf16>, vector<8x32xbf16>, vector<8x8xf32> -> vector<8x8xf32>
    "tpu.trace_stop"() : () -> ()
    %123 = arith.addf %122, %1 : vector<8x8xf32>
    %cst_39 = arith.constant dense<0xFF800000> : vector<8xf32>
    %124 = vector.multi_reduction <maximumf>, %123, %cst_39 [1] : vector<8x8xf32> to vector<8xf32>
    %125 = vector.shape_cast %124 : vector<8xf32> to vector<8x1xf32>
    %126 = vector.broadcast %125 : vector<8x1xf32> to vector<8x8xf32>
    %127 = arith.subf %123, %126 : vector<8x8xf32>
    %128 = math.exp %127 : vector<8x8xf32>
    %cst_40 = arith.constant dense<0.000000e+00> : vector<8xf32>
    %129 = vector.multi_reduction <add>, %128, %cst_40 [1] : vector<8x8xf32> to vector<8xf32>
    %130 = vector.shape_cast %129 : vector<8xf32> to vector<8x1xf32>
    %131 = vector.broadcast %130 : vector<8x1xf32> to vector<8x8xf32>
    %132 = arith.divf %128, %131 : vector<8x8xf32>
    %133 = arith.truncf %132 : vector<8x8xf32> to vector<8x8xbf16>
    %134 = arith.truncf %119 : vector<8x32xf32> to vector<8x32xbf16>
    %cst_41 = arith.constant dense<0.000000e+00> : vector<8x32xf32>
    %135 = tpu.matmul %133, %134, %cst_41 {dimension_numbers = #tpu.dot_dimension_numbers<[1], [0], [0], [1], [0, 0, 1, 1], [], []>} : vector<8x8xbf16>, vector<8x32xbf16>, vector<8x32xf32> -> vector<8x32xf32>
    %136 = arith.truncf %135 : vector<8x32xf32> to vector<8x32xbf16>
    %137 = vector.extract_strided_slice %11 {offsets = [0, 0, 0], sizes = [1, 32, 128], strides = [1, 1, 1]} : vector<4x32x128xbf16> to vector<1x32x128xbf16>
    %138 = vector.shape_cast %137 : vector<1x32x128xbf16> to vector<32x128xbf16>
    %cst_42 = arith.constant dense<0.000000e+00> : vector<8x128xf32>
    %139 = tpu.matmul %136, %138, %cst_42 {dimension_numbers = #tpu.dot_dimension_numbers<[1], [0], [0], [1], [0, 0, 1, 1], [], []>} : vector<8x32xbf16>, vector<32x128xbf16>, vector<8x128xf32> -> vector<8x128xf32>
    %140 = vector.extract_strided_slice %9 {offsets = [8, 32], sizes = [8, 32], strides = [1, 1]} : vector<16x384xf32> to vector<8x32xf32>
    %cst_43 = arith.constant 0.176776692 : f32
    %141 = vector.broadcast %cst_43 : f32 to vector<8x32xf32>
    %142 = arith.mulf %140, %141 : vector<8x32xf32>
    %143 = vector.extract_strided_slice %9 {offsets = [8, 160], sizes = [8, 32], strides = [1, 1]} : vector<16x384xf32> to vector<8x32xf32>
    %144 = vector.extract_strided_slice %9 {offsets = [8, 288], sizes = [8, 32], strides = [1, 1]} : vector<16x384xf32> to vector<8x32xf32>
    %145 = arith.truncf %142 : vector<8x32xf32> to vector<8x32xbf16>
    %146 = arith.truncf %143 : vector<8x32xf32> to vector<8x32xbf16>
    "tpu.trace_start"() <{level = 10 : i32, message = "ih,jh->ij"}> : () -> ()
    %cst_44 = arith.constant dense<0.000000e+00> : vector<8x8xf32>
    %147 = tpu.matmul %145, %146, %cst_44 {dimension_numbers = #tpu.dot_dimension_numbers<[1], [1], [0], [0], [0, 0, 1, 0], [], []>} : vector<8x32xbf16>, vector<8x32xbf16>, vector<8x8xf32> -> vector<8x8xf32>
    "tpu.trace_stop"() : () -> ()
    %148 = arith.addf %147, %1 : vector<8x8xf32>
    %cst_45 = arith.constant dense<0xFF800000> : vector<8xf32>
    %149 = vector.multi_reduction <maximumf>, %148, %cst_45 [1] : vector<8x8xf32> to vector<8xf32>
    %150 = vector.shape_cast %149 : vector<8xf32> to vector<8x1xf32>
    %151 = vector.broadcast %150 : vector<8x1xf32> to vector<8x8xf32>
    %152 = arith.subf %148, %151 : vector<8x8xf32>
    %153 = math.exp %152 : vector<8x8xf32>
    %cst_46 = arith.constant dense<0.000000e+00> : vector<8xf32>
    %154 = vector.multi_reduction <add>, %153, %cst_46 [1] : vector<8x8xf32> to vector<8xf32>
    %155 = vector.shape_cast %154 : vector<8xf32> to vector<8x1xf32>
    %156 = vector.broadcast %155 : vector<8x1xf32> to vector<8x8xf32>
    %157 = arith.divf %153, %156 : vector<8x8xf32>
    %158 = arith.truncf %157 : vector<8x8xf32> to vector<8x8xbf16>
    %159 = arith.truncf %144 : vector<8x32xf32> to vector<8x32xbf16>
    %cst_47 = arith.constant dense<0.000000e+00> : vector<8x32xf32>
    %160 = tpu.matmul %158, %159, %cst_47 {dimension_numbers = #tpu.dot_dimension_numbers<[1], [0], [0], [1], [0, 0, 1, 1], [], []>} : vector<8x8xbf16>, vector<8x32xbf16>, vector<8x32xf32> -> vector<8x32xf32>
    %161 = arith.truncf %160 : vector<8x32xf32> to vector<8x32xbf16>
    %162 = vector.extract_strided_slice %11 {offsets = [1, 0, 0], sizes = [1, 32, 128], strides = [1, 1, 1]} : vector<4x32x128xbf16> to vector<1x32x128xbf16>
    %163 = vector.shape_cast %162 : vector<1x32x128xbf16> to vector<32x128xbf16>
    %cst_48 = arith.constant dense<0.000000e+00> : vector<8x128xf32>
    %164 = tpu.matmul %161, %163, %cst_48 {dimension_numbers = #tpu.dot_dimension_numbers<[1], [0], [0], [1], [0, 0, 1, 1], [], []>} : vector<8x32xbf16>, vector<32x128xbf16>, vector<8x128xf32> -> vector<8x128xf32>
    %165 = arith.addf %139, %164 : vector<8x128xf32>
    %166 = vector.extract_strided_slice %9 {offsets = [8, 64], sizes = [8, 32], strides = [1, 1]} : vector<16x384xf32> to vector<8x32xf32>
    %cst_49 = arith.constant 0.176776692 : f32
    %167 = vector.broadcast %cst_49 : f32 to vector<8x32xf32>
    %168 = arith.mulf %166, %167 : vector<8x32xf32>
    %169 = vector.extract_strided_slice %9 {offsets = [8, 192], sizes = [8, 32], strides = [1, 1]} : vector<16x384xf32> to vector<8x32xf32>
    %170 = vector.extract_strided_slice %9 {offsets = [8, 320], sizes = [8, 32], strides = [1, 1]} : vector<16x384xf32> to vector<8x32xf32>
    %171 = arith.truncf %168 : vector<8x32xf32> to vector<8x32xbf16>
    %172 = arith.truncf %169 : vector<8x32xf32> to vector<8x32xbf16>
    "tpu.trace_start"() <{level = 10 : i32, message = "ih,jh->ij"}> : () -> ()
    %cst_50 = arith.constant dense<0.000000e+00> : vector<8x8xf32>
    %173 = tpu.matmul %171, %172, %cst_50 {dimension_numbers = #tpu.dot_dimension_numbers<[1], [1], [0], [0], [0, 0, 1, 0], [], []>} : vector<8x32xbf16>, vector<8x32xbf16>, vector<8x8xf32> -> vector<8x8xf32>
    "tpu.trace_stop"() : () -> ()
    %174 = arith.addf %173, %1 : vector<8x8xf32>
    %cst_51 = arith.constant dense<0xFF800000> : vector<8xf32>
    %175 = vector.multi_reduction <maximumf>, %174, %cst_51 [1] : vector<8x8xf32> to vector<8xf32>
    %176 = vector.shape_cast %175 : vector<8xf32> to vector<8x1xf32>
    %177 = vector.broadcast %176 : vector<8x1xf32> to vector<8x8xf32>
    %178 = arith.subf %174, %177 : vector<8x8xf32>
    %179 = math.exp %178 : vector<8x8xf32>
    %cst_52 = arith.constant dense<0.000000e+00> : vector<8xf32>
    %180 = vector.multi_reduction <add>, %179, %cst_52 [1] : vector<8x8xf32> to vector<8xf32>
    %181 = vector.shape_cast %180 : vector<8xf32> to vector<8x1xf32>
    %182 = vector.broadcast %181 : vector<8x1xf32> to vector<8x8xf32>
    %183 = arith.divf %179, %182 : vector<8x8xf32>
    %184 = arith.truncf %183 : vector<8x8xf32> to vector<8x8xbf16>
    %185 = arith.truncf %170 : vector<8x32xf32> to vector<8x32xbf16>
    %cst_53 = arith.constant dense<0.000000e+00> : vector<8x32xf32>
    %186 = tpu.matmul %184, %185, %cst_53 {dimension_numbers = #tpu.dot_dimension_numbers<[1], [0], [0], [1], [0, 0, 1, 1], [], []>} : vector<8x8xbf16>, vector<8x32xbf16>, vector<8x32xf32> -> vector<8x32xf32>
    %187 = arith.truncf %186 : vector<8x32xf32> to vector<8x32xbf16>
    %188 = vector.extract_strided_slice %11 {offsets = [2, 0, 0], sizes = [1, 32, 128], strides = [1, 1, 1]} : vector<4x32x128xbf16> to vector<1x32x128xbf16>
    %189 = vector.shape_cast %188 : vector<1x32x128xbf16> to vector<32x128xbf16>
    %cst_54 = arith.constant dense<0.000000e+00> : vector<8x128xf32>
    %190 = tpu.matmul %187, %189, %cst_54 {dimension_numbers = #tpu.dot_dimension_numbers<[1], [0], [0], [1], [0, 0, 1, 1], [], []>} : vector<8x32xbf16>, vector<32x128xbf16>, vector<8x128xf32> -> vector<8x128xf32>
    %191 = arith.addf %165, %190 : vector<8x128xf32>
    %192 = vector.extract_strided_slice %9 {offsets = [8, 96], sizes = [8, 32], strides = [1, 1]} : vector<16x384xf32> to vector<8x32xf32>
    %cst_55 = arith.constant 0.176776692 : f32
    %193 = vector.broadcast %cst_55 : f32 to vector<8x32xf32>
    %194 = arith.mulf %192, %193 : vector<8x32xf32>
    %195 = vector.extract_strided_slice %9 {offsets = [8, 224], sizes = [8, 32], strides = [1, 1]} : vector<16x384xf32> to vector<8x32xf32>
    %196 = vector.extract_strided_slice %9 {offsets = [8, 352], sizes = [8, 32], strides = [1, 1]} : vector<16x384xf32> to vector<8x32xf32>
    %197 = arith.truncf %194 : vector<8x32xf32> to vector<8x32xbf16>
    %198 = arith.truncf %195 : vector<8x32xf32> to vector<8x32xbf16>
    "tpu.trace_start"() <{level = 10 : i32, message = "ih,jh->ij"}> : () -> ()
    %cst_56 = arith.constant dense<0.000000e+00> : vector<8x8xf32>
    %199 = tpu.matmul %197, %198, %cst_56 {dimension_numbers = #tpu.dot_dimension_numbers<[1], [1], [0], [0], [0, 0, 1, 0], [], []>} : vector<8x32xbf16>, vector<8x32xbf16>, vector<8x8xf32> -> vector<8x8xf32>
    "tpu.trace_stop"() : () -> ()
    %200 = arith.addf %199, %1 : vector<8x8xf32>
    %cst_57 = arith.constant dense<0xFF800000> : vector<8xf32>
    %201 = vector.multi_reduction <maximumf>, %200, %cst_57 [1] : vector<8x8xf32> to vector<8xf32>
    %202 = vector.shape_cast %201 : vector<8xf32> to vector<8x1xf32>
    %203 = vector.broadcast %202 : vector<8x1xf32> to vector<8x8xf32>
    %204 = arith.subf %200, %203 : vector<8x8xf32>
    %205 = math.exp %204 : vector<8x8xf32>
    %cst_58 = arith.constant dense<0.000000e+00> : vector<8xf32>
    %206 = vector.multi_reduction <add>, %205, %cst_58 [1] : vector<8x8xf32> to vector<8xf32>
    %207 = vector.shape_cast %206 : vector<8xf32> to vector<8x1xf32>
    %208 = vector.broadcast %207 : vector<8x1xf32> to vector<8x8xf32>
    %209 = arith.divf %205, %208 : vector<8x8xf32>
    %210 = arith.truncf %209 : vector<8x8xf32> to vector<8x8xbf16>
    %211 = arith.truncf %196 : vector<8x32xf32> to vector<8x32xbf16>
    %cst_59 = arith.constant dense<0.000000e+00> : vector<8x32xf32>
    %212 = tpu.matmul %210, %211, %cst_59 {dimension_numbers = #tpu.dot_dimension_numbers<[1], [0], [0], [1], [0, 0, 1, 1], [], []>} : vector<8x8xbf16>, vector<8x32xbf16>, vector<8x32xf32> -> vector<8x32xf32>
    %213 = arith.truncf %212 : vector<8x32xf32> to vector<8x32xbf16>
    %214 = vector.extract_strided_slice %11 {offsets = [3, 0, 0], sizes = [1, 32, 128], strides = [1, 1, 1]} : vector<4x32x128xbf16> to vector<1x32x128xbf16>
    %215 = vector.shape_cast %214 : vector<1x32x128xbf16> to vector<32x128xbf16>
    %cst_60 = arith.constant dense<0.000000e+00> : vector<8x128xf32>
    %216 = tpu.matmul %213, %215, %cst_60 {dimension_numbers = #tpu.dot_dimension_numbers<[1], [0], [0], [1], [0, 0, 1, 1], [], []>} : vector<8x32xbf16>, vector<32x128xbf16>, vector<8x128xf32> -> vector<8x128xf32>
    %217 = arith.addf %191, %216 : vector<8x128xf32>
    %218 = tpu.concatenate %114, %217 in 0 : vector<8x128xf32>, vector<8x128xf32> -> vector<16x128xf32>
    %c0_61 = arith.constant 0 : index
    %c0_62 = arith.constant 0 : index
    %c0_63 = arith.constant 0 : index
    %219 = vector.load %arg6[%c0_61, %c0_62, %c0_63] : memref<2x1x128xf32, #tpu.memory_space<vmem>>, vector<1x1x128xf32>
    %220 = vector.shape_cast %219 : vector<1x1x128xf32> to vector<1x128xf32>
    %221 = vector.broadcast %220 : vector<1x128xf32> to vector<16x128xf32>
    %222 = arith.addf %218, %221 : vector<16x128xf32>
    %223 = arith.addf %0, %222 : vector<16x128xf32>
    %c0_64 = arith.constant 0 : index
    %c0_65 = arith.constant 0 : index
    %c0_66 = arith.constant 0 : index
    %224 = vector.load %arg11[%c0_64, %c0_65, %c0_66] : memref<2x1x128xf32, #tpu.memory_space<vmem>>, vector<1x1x128xf32>
    %225 = vector.shape_cast %224 : vector<1x1x128xf32> to vector<1x128xf32>
    %c0_67 = arith.constant 0 : index
    %c0_68 = arith.constant 0 : index
    %c0_69 = arith.constant 0 : index
    %226 = vector.load %arg12[%c0_67, %c0_68, %c0_69] : memref<2x1x128xf32, #tpu.memory_space<vmem>>, vector<1x1x128xf32>
    %227 = vector.shape_cast %226 : vector<1x1x128xf32> to vector<1x128xf32>
    %cst_70 = arith.constant dense<0.000000e+00> : vector<16xf32>
    %228 = vector.multi_reduction <add>, %223, %cst_70 [1] : vector<16x128xf32> to vector<16xf32>
    %229 = vector.shape_cast %228 : vector<16xf32> to vector<16x1xf32>
    %cst_71 = arith.constant 1.280000e+02 : f32
    %230 = vector.broadcast %cst_71 : f32 to vector<16x1xf32>
    %231 = arith.divf %229, %230 : vector<16x1xf32>
    %232 = vector.broadcast %231 : vector<16x1xf32> to vector<16x128xf32>
    %233 = arith.subf %223, %232 : vector<16x128xf32>
    %234 = arith.mulf %233, %233 : vector<16x128xf32>
    %cst_72 = arith.constant dense<0.000000e+00> : vector<16xf32>
    %235 = vector.multi_reduction <add>, %234, %cst_72 [1] : vector<16x128xf32> to vector<16xf32>
    %236 = vector.shape_cast %235 : vector<16xf32> to vector<16x1xf32>
    %cst_73 = arith.constant 1.280000e+02 : f32
    %237 = vector.broadcast %cst_73 : f32 to vector<16x1xf32>
    %238 = arith.divf %236, %237 : vector<16x1xf32>
    %239 = vector.broadcast %231 : vector<16x1xf32> to vector<16x128xf32>
    %240 = arith.subf %223, %239 : vector<16x128xf32>
    %cst_74 = arith.constant 9.99999974E-6 : f32
    %241 = vector.broadcast %cst_74 : f32 to vector<16x1xf32>
    %242 = arith.addf %238, %241 : vector<16x1xf32>
    %243 = math.rsqrt %242 : vector<16x1xf32>
    %244 = vector.broadcast %243 : vector<16x1xf32> to vector<16x128xf32>
    %245 = arith.mulf %240, %244 : vector<16x128xf32>
    %246 = vector.broadcast %225 : vector<1x128xf32> to vector<16x128xf32>
    %247 = arith.mulf %245, %246 : vector<16x128xf32>
    %248 = vector.broadcast %227 : vector<1x128xf32> to vector<16x128xf32>
    %249 = arith.addf %247, %248 : vector<16x128xf32>
    %250 = arith.truncf %249 : vector<16x128xf32> to vector<16x128xbf16>
    %c0_75 = arith.constant 0 : index
    %c0_76 = arith.constant 0 : index
    %c0_77 = arith.constant 0 : index
    %251 = vector.load %arg7[%c0_75, %c0_76, %c0_77] : memref<2x128x128xbf16, #tpu.memory_space<vmem>>, vector<1x128x128xbf16>
    %252 = vector.shape_cast %251 : vector<1x128x128xbf16> to vector<128x128xbf16>
    %cst_78 = arith.constant dense<0.000000e+00> : vector<16x128xf32>
    %253 = tpu.matmul %250, %252, %cst_78 {dimension_numbers = #tpu.dot_dimension_numbers<[1], [0], [0], [1], [0, 0, 1, 1], [], []>} : vector<16x128xbf16>, vector<128x128xbf16>, vector<16x128xf32> -> vector<16x128xf32>
    %c0_79 = arith.constant 0 : index
    %c0_80 = arith.constant 0 : index
    %c0_81 = arith.constant 0 : index
    %254 = vector.load %arg8[%c0_79, %c0_80, %c0_81] : memref<2x1x128xf32, #tpu.memory_space<vmem>>, vector<1x1x128xf32>
    %255 = vector.shape_cast %254 : vector<1x1x128xf32> to vector<1x128xf32>
    %256 = vector.broadcast %255 : vector<1x128xf32> to vector<16x128xf32>
    %257 = arith.addf %253, %256 : vector<16x128xf32>
    %cst_82 = arith.constant 0.000000e+00 : f32
    %258 = vector.broadcast %cst_82 : f32 to vector<16x128xf32>
    %259 = arith.maximumf %257, %258 : vector<16x128xf32>
    %260 = arith.truncf %259 : vector<16x128xf32> to vector<16x128xbf16>
    %c0_83 = arith.constant 0 : index
    %c0_84 = arith.constant 0 : index
    %c0_85 = arith.constant 0 : index
    %261 = vector.load %arg9[%c0_83, %c0_84, %c0_85] : memref<2x128x128xbf16, #tpu.memory_space<vmem>>, vector<1x128x128xbf16>
    %262 = vector.shape_cast %261 : vector<1x128x128xbf16> to vector<128x128xbf16>
    %cst_86 = arith.constant dense<0.000000e+00> : vector<16x128xf32>
    %263 = tpu.matmul %260, %262, %cst_86 {dimension_numbers = #tpu.dot_dimension_numbers<[1], [0], [0], [1], [0, 0, 1, 1], [], []>} : vector<16x128xbf16>, vector<128x128xbf16>, vector<16x128xf32> -> vector<16x128xf32>
    %c0_87 = arith.constant 0 : index
    %c0_88 = arith.constant 0 : index
    %c0_89 = arith.constant 0 : index
    %264 = vector.load %arg10[%c0_87, %c0_88, %c0_89] : memref<2x1x128xf32, #tpu.memory_space<vmem>>, vector<1x1x128xf32>
    %265 = vector.shape_cast %264 : vector<1x1x128xf32> to vector<1x128xf32>
    %266 = vector.broadcast %265 : vector<1x128xf32> to vector<16x128xf32>
    %267 = arith.addf %263, %266 : vector<16x128xf32>
    %268 = arith.addf %249, %267 : vector<16x128xf32>
    %c0_90 = arith.constant 0 : index
    %c0_91 = arith.constant 0 : index
    %c0_92 = arith.constant 0 : index
    %269 = vector.load %arg13[%c0_90, %c0_91, %c0_92] : memref<2x1x128xf32, #tpu.memory_space<vmem>>, vector<1x1x128xf32>
    %270 = vector.shape_cast %269 : vector<1x1x128xf32> to vector<1x128xf32>
    %c0_93 = arith.constant 0 : index
    %c0_94 = arith.constant 0 : index
    %c0_95 = arith.constant 0 : index
    %271 = vector.load %arg14[%c0_93, %c0_94, %c0_95] : memref<2x1x128xf32, #tpu.memory_space<vmem>>, vector<1x1x128xf32>
    %272 = vector.shape_cast %271 : vector<1x1x128xf32> to vector<1x128xf32>
    %cst_96 = arith.constant dense<0.000000e+00> : vector<16xf32>
    %273 = vector.multi_reduction <add>, %268, %cst_96 [1] : vector<16x128xf32> to vector<16xf32>
    %274 = vector.shape_cast %273 : vector<16xf32> to vector<16x1xf32>
    %cst_97 = arith.constant 1.280000e+02 : f32
    %275 = vector.broadcast %cst_97 : f32 to vector<16x1xf32>
    %276 = arith.divf %274, %275 : vector<16x1xf32>
    %277 = vector.broadcast %276 : vector<16x1xf32> to vector<16x128xf32>
    %278 = arith.subf %268, %277 : vector<16x128xf32>
    %279 = arith.mulf %278, %278 : vector<16x128xf32>
    %cst_98 = arith.constant dense<0.000000e+00> : vector<16xf32>
    %280 = vector.multi_reduction <add>, %279, %cst_98 [1] : vector<16x128xf32> to vector<16xf32>
    %281 = vector.shape_cast %280 : vector<16xf32> to vector<16x1xf32>
    %cst_99 = arith.constant 1.280000e+02 : f32
    %282 = vector.broadcast %cst_99 : f32 to vector<16x1xf32>
    %283 = arith.divf %281, %282 : vector<16x1xf32>
    %284 = vector.broadcast %276 : vector<16x1xf32> to vector<16x128xf32>
    %285 = arith.subf %268, %284 : vector<16x128xf32>
    %cst_100 = arith.constant 9.99999974E-6 : f32
    %286 = vector.broadcast %cst_100 : f32 to vector<16x1xf32>
    %287 = arith.addf %283, %286 : vector<16x1xf32>
    %288 = math.rsqrt %287 : vector<16x1xf32>
    %289 = vector.broadcast %288 : vector<16x1xf32> to vector<16x128xf32>
    %290 = arith.mulf %285, %289 : vector<16x128xf32>
    %291 = vector.broadcast %270 : vector<1x128xf32> to vector<16x128xf32>
    %292 = arith.mulf %290, %291 : vector<16x128xf32>
    %293 = vector.broadcast %272 : vector<1x128xf32> to vector<16x128xf32>
    %294 = arith.addf %292, %293 : vector<16x128xf32>
    %295 = arith.truncf %294 : vector<16x128xf32> to vector<16x128xbf16>
    %c1 = arith.constant 1 : index
    %c0_101 = arith.constant 0 : index
    %c0_102 = arith.constant 0 : index
    %296 = vector.load %arg3[%c1, %c0_101, %c0_102] : memref<2x128x384xbf16, #tpu.memory_space<vmem>>, vector<1x128x384xbf16>
    %297 = vector.shape_cast %296 : vector<1x128x384xbf16> to vector<128x384xbf16>
    %cst_103 = arith.constant dense<0.000000e+00> : vector<16x384xf32>
    %298 = tpu.matmul %295, %297, %cst_103 {dimension_numbers = #tpu.dot_dimension_numbers<[1], [0], [0], [1], [0, 0, 1, 1], [], []>} : vector<16x128xbf16>, vector<128x384xbf16>, vector<16x384xf32> -> vector<16x384xf32>
    %c1_104 = arith.constant 1 : index
    %c0_105 = arith.constant 0 : index
    %c0_106 = arith.constant 0 : index
    %299 = vector.load %arg4[%c1_104, %c0_105, %c0_106] : memref<2x1x384xf32, #tpu.memory_space<vmem>>, vector<1x1x384xf32>
    %300 = vector.shape_cast %299 : vector<1x1x384xf32> to vector<1x384xf32>
    %301 = vector.broadcast %300 : vector<1x384xf32> to vector<16x384xf32>
    %302 = arith.addf %298, %301 : vector<16x384xf32>
    %c1_107 = arith.constant 1 : index
    %c0_108 = arith.constant 0 : index
    %c0_109 = arith.constant 0 : index
    %c0_110 = arith.constant 0 : index
    %303 = vector.load %arg5[%c1_107, %c0_108, %c0_109, %c0_110] : memref<2x4x32x128xbf16, #tpu.memory_space<vmem>>, vector<1x4x32x128xbf16>
    %304 = vector.shape_cast %303 : vector<1x4x32x128xbf16> to vector<4x32x128xbf16>
    %305 = vector.extract_strided_slice %302 {offsets = [0, 0], sizes = [8, 32], strides = [1, 1]} : vector<16x384xf32> to vector<8x32xf32>
    %cst_111 = arith.constant 0.176776692 : f32
    %306 = vector.broadcast %cst_111 : f32 to vector<8x32xf32>
    %307 = arith.mulf %305, %306 : vector<8x32xf32>
    %308 = vector.extract_strided_slice %302 {offsets = [0, 128], sizes = [8, 32], strides = [1, 1]} : vector<16x384xf32> to vector<8x32xf32>
    %309 = vector.extract_strided_slice %302 {offsets = [0, 256], sizes = [8, 32], strides = [1, 1]} : vector<16x384xf32> to vector<8x32xf32>
    %310 = arith.truncf %307 : vector<8x32xf32> to vector<8x32xbf16>
    %311 = arith.truncf %308 : vector<8x32xf32> to vector<8x32xbf16>
    "tpu.trace_start"() <{level = 10 : i32, message = "ih,jh->ij"}> : () -> ()
    %cst_112 = arith.constant dense<0.000000e+00> : vector<8x8xf32>
    %312 = tpu.matmul %310, %311, %cst_112 {dimension_numbers = #tpu.dot_dimension_numbers<[1], [1], [0], [0], [0, 0, 1, 0], [], []>} : vector<8x32xbf16>, vector<8x32xbf16>, vector<8x8xf32> -> vector<8x8xf32>
    "tpu.trace_stop"() : () -> ()
    %313 = arith.addf %312, %1 : vector<8x8xf32>
    %cst_113 = arith.constant dense<0xFF800000> : vector<8xf32>
    %314 = vector.multi_reduction <maximumf>, %313, %cst_113 [1] : vector<8x8xf32> to vector<8xf32>
    %315 = vector.shape_cast %314 : vector<8xf32> to vector<8x1xf32>
    %316 = vector.broadcast %315 : vector<8x1xf32> to vector<8x8xf32>
    %317 = arith.subf %313, %316 : vector<8x8xf32>
    %318 = math.exp %317 : vector<8x8xf32>
    %cst_114 = arith.constant dense<0.000000e+00> : vector<8xf32>
    %319 = vector.multi_reduction <add>, %318, %cst_114 [1] : vector<8x8xf32> to vector<8xf32>
    %320 = vector.shape_cast %319 : vector<8xf32> to vector<8x1xf32>
    %321 = vector.broadcast %320 : vector<8x1xf32> to vector<8x8xf32>
    %322 = arith.divf %318, %321 : vector<8x8xf32>
    %323 = arith.truncf %322 : vector<8x8xf32> to vector<8x8xbf16>
    %324 = arith.truncf %309 : vector<8x32xf32> to vector<8x32xbf16>
    %cst_115 = arith.constant dense<0.000000e+00> : vector<8x32xf32>
    %325 = tpu.matmul %323, %324, %cst_115 {dimension_numbers = #tpu.dot_dimension_numbers<[1], [0], [0], [1], [0, 0, 1, 1], [], []>} : vector<8x8xbf16>, vector<8x32xbf16>, vector<8x32xf32> -> vector<8x32xf32>
    %326 = arith.truncf %325 : vector<8x32xf32> to vector<8x32xbf16>
    %327 = vector.extract_strided_slice %304 {offsets = [0, 0, 0], sizes = [1, 32, 128], strides = [1, 1, 1]} : vector<4x32x128xbf16> to vector<1x32x128xbf16>
    %328 = vector.shape_cast %327 : vector<1x32x128xbf16> to vector<32x128xbf16>
    %cst_116 = arith.constant dense<0.000000e+00> : vector<8x128xf32>
    %329 = tpu.matmul %326, %328, %cst_116 {dimension_numbers = #tpu.dot_dimension_numbers<[1], [0], [0], [1], [0, 0, 1, 1], [], []>} : vector<8x32xbf16>, vector<32x128xbf16>, vector<8x128xf32> -> vector<8x128xf32>
    %330 = vector.extract_strided_slice %302 {offsets = [0, 32], sizes = [8, 32], strides = [1, 1]} : vector<16x384xf32> to vector<8x32xf32>
    %cst_117 = arith.constant 0.176776692 : f32
    %331 = vector.broadcast %cst_117 : f32 to vector<8x32xf32>
    %332 = arith.mulf %330, %331 : vector<8x32xf32>
    %333 = vector.extract_strided_slice %302 {offsets = [0, 160], sizes = [8, 32], strides = [1, 1]} : vector<16x384xf32> to vector<8x32xf32>
    %334 = vector.extract_strided_slice %302 {offsets = [0, 288], sizes = [8, 32], strides = [1, 1]} : vector<16x384xf32> to vector<8x32xf32>
    %335 = arith.truncf %332 : vector<8x32xf32> to vector<8x32xbf16>
    %336 = arith.truncf %333 : vector<8x32xf32> to vector<8x32xbf16>
    "tpu.trace_start"() <{level = 10 : i32, message = "ih,jh->ij"}> : () -> ()
    %cst_118 = arith.constant dense<0.000000e+00> : vector<8x8xf32>
    %337 = tpu.matmul %335, %336, %cst_118 {dimension_numbers = #tpu.dot_dimension_numbers<[1], [1], [0], [0], [0, 0, 1, 0], [], []>} : vector<8x32xbf16>, vector<8x32xbf16>, vector<8x8xf32> -> vector<8x8xf32>
    "tpu.trace_stop"() : () -> ()
    %338 = arith.addf %337, %1 : vector<8x8xf32>
    %cst_119 = arith.constant dense<0xFF800000> : vector<8xf32>
    %339 = vector.multi_reduction <maximumf>, %338, %cst_119 [1] : vector<8x8xf32> to vector<8xf32>
    %340 = vector.shape_cast %339 : vector<8xf32> to vector<8x1xf32>
    %341 = vector.broadcast %340 : vector<8x1xf32> to vector<8x8xf32>
    %342 = arith.subf %338, %341 : vector<8x8xf32>
    %343 = math.exp %342 : vector<8x8xf32>
    %cst_120 = arith.constant dense<0.000000e+00> : vector<8xf32>
    %344 = vector.multi_reduction <add>, %343, %cst_120 [1] : vector<8x8xf32> to vector<8xf32>
    %345 = vector.shape_cast %344 : vector<8xf32> to vector<8x1xf32>
    %346 = vector.broadcast %345 : vector<8x1xf32> to vector<8x8xf32>
    %347 = arith.divf %343, %346 : vector<8x8xf32>
    %348 = arith.truncf %347 : vector<8x8xf32> to vector<8x8xbf16>
    %349 = arith.truncf %334 : vector<8x32xf32> to vector<8x32xbf16>
    %cst_121 = arith.constant dense<0.000000e+00> : vector<8x32xf32>
    %350 = tpu.matmul %348, %349, %cst_121 {dimension_numbers = #tpu.dot_dimension_numbers<[1], [0], [0], [1], [0, 0, 1, 1], [], []>} : vector<8x8xbf16>, vector<8x32xbf16>, vector<8x32xf32> -> vector<8x32xf32>
    %351 = arith.truncf %350 : vector<8x32xf32> to vector<8x32xbf16>
    %352 = vector.extract_strided_slice %304 {offsets = [1, 0, 0], sizes = [1, 32, 128], strides = [1, 1, 1]} : vector<4x32x128xbf16> to vector<1x32x128xbf16>
    %353 = vector.shape_cast %352 : vector<1x32x128xbf16> to vector<32x128xbf16>
    %cst_122 = arith.constant dense<0.000000e+00> : vector<8x128xf32>
    %354 = tpu.matmul %351, %353, %cst_122 {dimension_numbers = #tpu.dot_dimension_numbers<[1], [0], [0], [1], [0, 0, 1, 1], [], []>} : vector<8x32xbf16>, vector<32x128xbf16>, vector<8x128xf32> -> vector<8x128xf32>
    %355 = arith.addf %329, %354 : vector<8x128xf32>
    %356 = vector.extract_strided_slice %302 {offsets = [0, 64], sizes = [8, 32], strides = [1, 1]} : vector<16x384xf32> to vector<8x32xf32>
    %cst_123 = arith.constant 0.176776692 : f32
    %357 = vector.broadcast %cst_123 : f32 to vector<8x32xf32>
    %358 = arith.mulf %356, %357 : vector<8x32xf32>
    %359 = vector.extract_strided_slice %302 {offsets = [0, 192], sizes = [8, 32], strides = [1, 1]} : vector<16x384xf32> to vector<8x32xf32>
    %360 = vector.extract_strided_slice %302 {offsets = [0, 320], sizes = [8, 32], strides = [1, 1]} : vector<16x384xf32> to vector<8x32xf32>
    %361 = arith.truncf %358 : vector<8x32xf32> to vector<8x32xbf16>
    %362 = arith.truncf %359 : vector<8x32xf32> to vector<8x32xbf16>
    "tpu.trace_start"() <{level = 10 : i32, message = "ih,jh->ij"}> : () -> ()
    %cst_124 = arith.constant dense<0.000000e+00> : vector<8x8xf32>
    %363 = tpu.matmul %361, %362, %cst_124 {dimension_numbers = #tpu.dot_dimension_numbers<[1], [1], [0], [0], [0, 0, 1, 0], [], []>} : vector<8x32xbf16>, vector<8x32xbf16>, vector<8x8xf32> -> vector<8x8xf32>
    "tpu.trace_stop"() : () -> ()
    %364 = arith.addf %363, %1 : vector<8x8xf32>
    %cst_125 = arith.constant dense<0xFF800000> : vector<8xf32>
    %365 = vector.multi_reduction <maximumf>, %364, %cst_125 [1] : vector<8x8xf32> to vector<8xf32>
    %366 = vector.shape_cast %365 : vector<8xf32> to vector<8x1xf32>
    %367 = vector.broadcast %366 : vector<8x1xf32> to vector<8x8xf32>
    %368 = arith.subf %364, %367 : vector<8x8xf32>
    %369 = math.exp %368 : vector<8x8xf32>
    %cst_126 = arith.constant dense<0.000000e+00> : vector<8xf32>
    %370 = vector.multi_reduction <add>, %369, %cst_126 [1] : vector<8x8xf32> to vector<8xf32>
    %371 = vector.shape_cast %370 : vector<8xf32> to vector<8x1xf32>
    %372 = vector.broadcast %371 : vector<8x1xf32> to vector<8x8xf32>
    %373 = arith.divf %369, %372 : vector<8x8xf32>
    %374 = arith.truncf %373 : vector<8x8xf32> to vector<8x8xbf16>
    %375 = arith.truncf %360 : vector<8x32xf32> to vector<8x32xbf16>
    %cst_127 = arith.constant dense<0.000000e+00> : vector<8x32xf32>
    %376 = tpu.matmul %374, %375, %cst_127 {dimension_numbers = #tpu.dot_dimension_numbers<[1], [0], [0], [1], [0, 0, 1, 1], [], []>} : vector<8x8xbf16>, vector<8x32xbf16>, vector<8x32xf32> -> vector<8x32xf32>
    %377 = arith.truncf %376 : vector<8x32xf32> to vector<8x32xbf16>
    %378 = vector.extract_strided_slice %304 {offsets = [2, 0, 0], sizes = [1, 32, 128], strides = [1, 1, 1]} : vector<4x32x128xbf16> to vector<1x32x128xbf16>
    %379 = vector.shape_cast %378 : vector<1x32x128xbf16> to vector<32x128xbf16>
    %cst_128 = arith.constant dense<0.000000e+00> : vector<8x128xf32>
    %380 = tpu.matmul %377, %379, %cst_128 {dimension_numbers = #tpu.dot_dimension_numbers<[1], [0], [0], [1], [0, 0, 1, 1], [], []>} : vector<8x32xbf16>, vector<32x128xbf16>, vector<8x128xf32> -> vector<8x128xf32>
    %381 = arith.addf %355, %380 : vector<8x128xf32>
    %382 = vector.extract_strided_slice %302 {offsets = [0, 96], sizes = [8, 32], strides = [1, 1]} : vector<16x384xf32> to vector<8x32xf32>
    %cst_129 = arith.constant 0.176776692 : f32
    %383 = vector.broadcast %cst_129 : f32 to vector<8x32xf32>
    %384 = arith.mulf %382, %383 : vector<8x32xf32>
    %385 = vector.extract_strided_slice %302 {offsets = [0, 224], sizes = [8, 32], strides = [1, 1]} : vector<16x384xf32> to vector<8x32xf32>
    %386 = vector.extract_strided_slice %302 {offsets = [0, 352], sizes = [8, 32], strides = [1, 1]} : vector<16x384xf32> to vector<8x32xf32>
    %387 = arith.truncf %384 : vector<8x32xf32> to vector<8x32xbf16>
    %388 = arith.truncf %385 : vector<8x32xf32> to vector<8x32xbf16>
    "tpu.trace_start"() <{level = 10 : i32, message = "ih,jh->ij"}> : () -> ()
    %cst_130 = arith.constant dense<0.000000e+00> : vector<8x8xf32>
    %389 = tpu.matmul %387, %388, %cst_130 {dimension_numbers = #tpu.dot_dimension_numbers<[1], [1], [0], [0], [0, 0, 1, 0], [], []>} : vector<8x32xbf16>, vector<8x32xbf16>, vector<8x8xf32> -> vector<8x8xf32>
    "tpu.trace_stop"() : () -> ()
    %390 = arith.addf %389, %1 : vector<8x8xf32>
    %cst_131 = arith.constant dense<0xFF800000> : vector<8xf32>
    %391 = vector.multi_reduction <maximumf>, %390, %cst_131 [1] : vector<8x8xf32> to vector<8xf32>
    %392 = vector.shape_cast %391 : vector<8xf32> to vector<8x1xf32>
    %393 = vector.broadcast %392 : vector<8x1xf32> to vector<8x8xf32>
    %394 = arith.subf %390, %393 : vector<8x8xf32>
    %395 = math.exp %394 : vector<8x8xf32>
    %cst_132 = arith.constant dense<0.000000e+00> : vector<8xf32>
    %396 = vector.multi_reduction <add>, %395, %cst_132 [1] : vector<8x8xf32> to vector<8xf32>
    %397 = vector.shape_cast %396 : vector<8xf32> to vector<8x1xf32>
    %398 = vector.broadcast %397 : vector<8x1xf32> to vector<8x8xf32>
    %399 = arith.divf %395, %398 : vector<8x8xf32>
    %400 = arith.truncf %399 : vector<8x8xf32> to vector<8x8xbf16>
    %401 = arith.truncf %386 : vector<8x32xf32> to vector<8x32xbf16>
    %cst_133 = arith.constant dense<0.000000e+00> : vector<8x32xf32>
    %402 = tpu.matmul %400, %401, %cst_133 {dimension_numbers = #tpu.dot_dimension_numbers<[1], [0], [0], [1], [0, 0, 1, 1], [], []>} : vector<8x8xbf16>, vector<8x32xbf16>, vector<8x32xf32> -> vector<8x32xf32>
    %403 = arith.truncf %402 : vector<8x32xf32> to vector<8x32xbf16>
    %404 = vector.extract_strided_slice %304 {offsets = [3, 0, 0], sizes = [1, 32, 128], strides = [1, 1, 1]} : vector<4x32x128xbf16> to vector<1x32x128xbf16>
    %405 = vector.shape_cast %404 : vector<1x32x128xbf16> to vector<32x128xbf16>
    %cst_134 = arith.constant dense<0.000000e+00> : vector<8x128xf32>
    %406 = tpu.matmul %403, %405, %cst_134 {dimension_numbers = #tpu.dot_dimension_numbers<[1], [0], [0], [1], [0, 0, 1, 1], [], []>} : vector<8x32xbf16>, vector<32x128xbf16>, vector<8x128xf32> -> vector<8x128xf32>
    %407 = arith.addf %381, %406 : vector<8x128xf32>
    %408 = vector.extract_strided_slice %302 {offsets = [8, 0], sizes = [8, 32], strides = [1, 1]} : vector<16x384xf32> to vector<8x32xf32>
    %cst_135 = arith.constant 0.176776692 : f32
    %409 = vector.broadcast %cst_135 : f32 to vector<8x32xf32>
    %410 = arith.mulf %408, %409 : vector<8x32xf32>
    %411 = vector.extract_strided_slice %302 {offsets = [8, 128], sizes = [8, 32], strides = [1, 1]} : vector<16x384xf32> to vector<8x32xf32>
    %412 = vector.extract_strided_slice %302 {offsets = [8, 256], sizes = [8, 32], strides = [1, 1]} : vector<16x384xf32> to vector<8x32xf32>
    %413 = arith.truncf %410 : vector<8x32xf32> to vector<8x32xbf16>
    %414 = arith.truncf %411 : vector<8x32xf32> to vector<8x32xbf16>
    "tpu.trace_start"() <{level = 10 : i32, message = "ih,jh->ij"}> : () -> ()
    %cst_136 = arith.constant dense<0.000000e+00> : vector<8x8xf32>
    %415 = tpu.matmul %413, %414, %cst_136 {dimension_numbers = #tpu.dot_dimension_numbers<[1], [1], [0], [0], [0, 0, 1, 0], [], []>} : vector<8x32xbf16>, vector<8x32xbf16>, vector<8x8xf32> -> vector<8x8xf32>
    "tpu.trace_stop"() : () -> ()
    %416 = arith.addf %415, %1 : vector<8x8xf32>
    %cst_137 = arith.constant dense<0xFF800000> : vector<8xf32>
    %417 = vector.multi_reduction <maximumf>, %416, %cst_137 [1] : vector<8x8xf32> to vector<8xf32>
    %418 = vector.shape_cast %417 : vector<8xf32> to vector<8x1xf32>
    %419 = vector.broadcast %418 : vector<8x1xf32> to vector<8x8xf32>
    %420 = arith.subf %416, %419 : vector<8x8xf32>
    %421 = math.exp %420 : vector<8x8xf32>
    %cst_138 = arith.constant dense<0.000000e+00> : vector<8xf32>
    %422 = vector.multi_reduction <add>, %421, %cst_138 [1] : vector<8x8xf32> to vector<8xf32>
    %423 = vector.shape_cast %422 : vector<8xf32> to vector<8x1xf32>
    %424 = vector.broadcast %423 : vector<8x1xf32> to vector<8x8xf32>
    %425 = arith.divf %421, %424 : vector<8x8xf32>
    %426 = arith.truncf %425 : vector<8x8xf32> to vector<8x8xbf16>
    %427 = arith.truncf %412 : vector<8x32xf32> to vector<8x32xbf16>
    %cst_139 = arith.constant dense<0.000000e+00> : vector<8x32xf32>
    %428 = tpu.matmul %426, %427, %cst_139 {dimension_numbers = #tpu.dot_dimension_numbers<[1], [0], [0], [1], [0, 0, 1, 1], [], []>} : vector<8x8xbf16>, vector<8x32xbf16>, vector<8x32xf32> -> vector<8x32xf32>
    %429 = arith.truncf %428 : vector<8x32xf32> to vector<8x32xbf16>
    %430 = vector.extract_strided_slice %304 {offsets = [0, 0, 0], sizes = [1, 32, 128], strides = [1, 1, 1]} : vector<4x32x128xbf16> to vector<1x32x128xbf16>
    %431 = vector.shape_cast %430 : vector<1x32x128xbf16> to vector<32x128xbf16>
    %cst_140 = arith.constant dense<0.000000e+00> : vector<8x128xf32>
    %432 = tpu.matmul %429, %431, %cst_140 {dimension_numbers = #tpu.dot_dimension_numbers<[1], [0], [0], [1], [0, 0, 1, 1], [], []>} : vector<8x32xbf16>, vector<32x128xbf16>, vector<8x128xf32> -> vector<8x128xf32>
    %433 = vector.extract_strided_slice %302 {offsets = [8, 32], sizes = [8, 32], strides = [1, 1]} : vector<16x384xf32> to vector<8x32xf32>
    %cst_141 = arith.constant 0.176776692 : f32
    %434 = vector.broadcast %cst_141 : f32 to vector<8x32xf32>
    %435 = arith.mulf %433, %434 : vector<8x32xf32>
    %436 = vector.extract_strided_slice %302 {offsets = [8, 160], sizes = [8, 32], strides = [1, 1]} : vector<16x384xf32> to vector<8x32xf32>
    %437 = vector.extract_strided_slice %302 {offsets = [8, 288], sizes = [8, 32], strides = [1, 1]} : vector<16x384xf32> to vector<8x32xf32>
    %438 = arith.truncf %435 : vector<8x32xf32> to vector<8x32xbf16>
    %439 = arith.truncf %436 : vector<8x32xf32> to vector<8x32xbf16>
    "tpu.trace_start"() <{level = 10 : i32, message = "ih,jh->ij"}> : () -> ()
    %cst_142 = arith.constant dense<0.000000e+00> : vector<8x8xf32>
    %440 = tpu.matmul %438, %439, %cst_142 {dimension_numbers = #tpu.dot_dimension_numbers<[1], [1], [0], [0], [0, 0, 1, 0], [], []>} : vector<8x32xbf16>, vector<8x32xbf16>, vector<8x8xf32> -> vector<8x8xf32>
    "tpu.trace_stop"() : () -> ()
    %441 = arith.addf %440, %1 : vector<8x8xf32>
    %cst_143 = arith.constant dense<0xFF800000> : vector<8xf32>
    %442 = vector.multi_reduction <maximumf>, %441, %cst_143 [1] : vector<8x8xf32> to vector<8xf32>
    %443 = vector.shape_cast %442 : vector<8xf32> to vector<8x1xf32>
    %444 = vector.broadcast %443 : vector<8x1xf32> to vector<8x8xf32>
    %445 = arith.subf %441, %444 : vector<8x8xf32>
    %446 = math.exp %445 : vector<8x8xf32>
    %cst_144 = arith.constant dense<0.000000e+00> : vector<8xf32>
    %447 = vector.multi_reduction <add>, %446, %cst_144 [1] : vector<8x8xf32> to vector<8xf32>
    %448 = vector.shape_cast %447 : vector<8xf32> to vector<8x1xf32>
    %449 = vector.broadcast %448 : vector<8x1xf32> to vector<8x8xf32>
    %450 = arith.divf %446, %449 : vector<8x8xf32>
    %451 = arith.truncf %450 : vector<8x8xf32> to vector<8x8xbf16>
    %452 = arith.truncf %437 : vector<8x32xf32> to vector<8x32xbf16>
    %cst_145 = arith.constant dense<0.000000e+00> : vector<8x32xf32>
    %453 = tpu.matmul %451, %452, %cst_145 {dimension_numbers = #tpu.dot_dimension_numbers<[1], [0], [0], [1], [0, 0, 1, 1], [], []>} : vector<8x8xbf16>, vector<8x32xbf16>, vector<8x32xf32> -> vector<8x32xf32>
    %454 = arith.truncf %453 : vector<8x32xf32> to vector<8x32xbf16>
    %455 = vector.extract_strided_slice %304 {offsets = [1, 0, 0], sizes = [1, 32, 128], strides = [1, 1, 1]} : vector<4x32x128xbf16> to vector<1x32x128xbf16>
    %456 = vector.shape_cast %455 : vector<1x32x128xbf16> to vector<32x128xbf16>
    %cst_146 = arith.constant dense<0.000000e+00> : vector<8x128xf32>
    %457 = tpu.matmul %454, %456, %cst_146 {dimension_numbers = #tpu.dot_dimension_numbers<[1], [0], [0], [1], [0, 0, 1, 1], [], []>} : vector<8x32xbf16>, vector<32x128xbf16>, vector<8x128xf32> -> vector<8x128xf32>
    %458 = arith.addf %432, %457 : vector<8x128xf32>
    %459 = vector.extract_strided_slice %302 {offsets = [8, 64], sizes = [8, 32], strides = [1, 1]} : vector<16x384xf32> to vector<8x32xf32>
    %cst_147 = arith.constant 0.176776692 : f32
    %460 = vector.broadcast %cst_147 : f32 to vector<8x32xf32>
    %461 = arith.mulf %459, %460 : vector<8x32xf32>
    %462 = vector.extract_strided_slice %302 {offsets = [8, 192], sizes = [8, 32], strides = [1, 1]} : vector<16x384xf32> to vector<8x32xf32>
    %463 = vector.extract_strided_slice %302 {offsets = [8, 320], sizes = [8, 32], strides = [1, 1]} : vector<16x384xf32> to vector<8x32xf32>
    %464 = arith.truncf %461 : vector<8x32xf32> to vector<8x32xbf16>
    %465 = arith.truncf %462 : vector<8x32xf32> to vector<8x32xbf16>
    "tpu.trace_start"() <{level = 10 : i32, message = "ih,jh->ij"}> : () -> ()
    %cst_148 = arith.constant dense<0.000000e+00> : vector<8x8xf32>
    %466 = tpu.matmul %464, %465, %cst_148 {dimension_numbers = #tpu.dot_dimension_numbers<[1], [1], [0], [0], [0, 0, 1, 0], [], []>} : vector<8x32xbf16>, vector<8x32xbf16>, vector<8x8xf32> -> vector<8x8xf32>
    "tpu.trace_stop"() : () -> ()
    %467 = arith.addf %466, %1 : vector<8x8xf32>
    %cst_149 = arith.constant dense<0xFF800000> : vector<8xf32>
    %468 = vector.multi_reduction <maximumf>, %467, %cst_149 [1] : vector<8x8xf32> to vector<8xf32>
    %469 = vector.shape_cast %468 : vector<8xf32> to vector<8x1xf32>
    %470 = vector.broadcast %469 : vector<8x1xf32> to vector<8x8xf32>
    %471 = arith.subf %467, %470 : vector<8x8xf32>
    %472 = math.exp %471 : vector<8x8xf32>
    %cst_150 = arith.constant dense<0.000000e+00> : vector<8xf32>
    %473 = vector.multi_reduction <add>, %472, %cst_150 [1] : vector<8x8xf32> to vector<8xf32>
    %474 = vector.shape_cast %473 : vector<8xf32> to vector<8x1xf32>
    %475 = vector.broadcast %474 : vector<8x1xf32> to vector<8x8xf32>
    %476 = arith.divf %472, %475 : vector<8x8xf32>
    %477 = arith.truncf %476 : vector<8x8xf32> to vector<8x8xbf16>
    %478 = arith.truncf %463 : vector<8x32xf32> to vector<8x32xbf16>
    %cst_151 = arith.constant dense<0.000000e+00> : vector<8x32xf32>
    %479 = tpu.matmul %477, %478, %cst_151 {dimension_numbers = #tpu.dot_dimension_numbers<[1], [0], [0], [1], [0, 0, 1, 1], [], []>} : vector<8x8xbf16>, vector<8x32xbf16>, vector<8x32xf32> -> vector<8x32xf32>
    %480 = arith.truncf %479 : vector<8x32xf32> to vector<8x32xbf16>
    %481 = vector.extract_strided_slice %304 {offsets = [2, 0, 0], sizes = [1, 32, 128], strides = [1, 1, 1]} : vector<4x32x128xbf16> to vector<1x32x128xbf16>
    %482 = vector.shape_cast %481 : vector<1x32x128xbf16> to vector<32x128xbf16>
    %cst_152 = arith.constant dense<0.000000e+00> : vector<8x128xf32>
    %483 = tpu.matmul %480, %482, %cst_152 {dimension_numbers = #tpu.dot_dimension_numbers<[1], [0], [0], [1], [0, 0, 1, 1], [], []>} : vector<8x32xbf16>, vector<32x128xbf16>, vector<8x128xf32> -> vector<8x128xf32>
    %484 = arith.addf %458, %483 : vector<8x128xf32>
    %485 = vector.extract_strided_slice %302 {offsets = [8, 96], sizes = [8, 32], strides = [1, 1]} : vector<16x384xf32> to vector<8x32xf32>
    %cst_153 = arith.constant 0.176776692 : f32
    %486 = vector.broadcast %cst_153 : f32 to vector<8x32xf32>
    %487 = arith.mulf %485, %486 : vector<8x32xf32>
    %488 = vector.extract_strided_slice %302 {offsets = [8, 224], sizes = [8, 32], strides = [1, 1]} : vector<16x384xf32> to vector<8x32xf32>
    %489 = vector.extract_strided_slice %302 {offsets = [8, 352], sizes = [8, 32], strides = [1, 1]} : vector<16x384xf32> to vector<8x32xf32>
    %490 = arith.truncf %487 : vector<8x32xf32> to vector<8x32xbf16>
    %491 = arith.truncf %488 : vector<8x32xf32> to vector<8x32xbf16>
    "tpu.trace_start"() <{level = 10 : i32, message = "ih,jh->ij"}> : () -> ()
    %cst_154 = arith.constant dense<0.000000e+00> : vector<8x8xf32>
    %492 = tpu.matmul %490, %491, %cst_154 {dimension_numbers = #tpu.dot_dimension_numbers<[1], [1], [0], [0], [0, 0, 1, 0], [], []>} : vector<8x32xbf16>, vector<8x32xbf16>, vector<8x8xf32> -> vector<8x8xf32>
    "tpu.trace_stop"() : () -> ()
    %493 = arith.addf %492, %1 : vector<8x8xf32>
    %cst_155 = arith.constant dense<0xFF800000> : vector<8xf32>
    %494 = vector.multi_reduction <maximumf>, %493, %cst_155 [1] : vector<8x8xf32> to vector<8xf32>
    %495 = vector.shape_cast %494 : vector<8xf32> to vector<8x1xf32>
    %496 = vector.broadcast %495 : vector<8x1xf32> to vector<8x8xf32>
    %497 = arith.subf %493, %496 : vector<8x8xf32>
    %498 = math.exp %497 : vector<8x8xf32>
    %cst_156 = arith.constant dense<0.000000e+00> : vector<8xf32>
    %499 = vector.multi_reduction <add>, %498, %cst_156 [1] : vector<8x8xf32> to vector<8xf32>
    %500 = vector.shape_cast %499 : vector<8xf32> to vector<8x1xf32>
    %501 = vector.broadcast %500 : vector<8x1xf32> to vector<8x8xf32>
    %502 = arith.divf %498, %501 : vector<8x8xf32>
    %503 = arith.truncf %502 : vector<8x8xf32> to vector<8x8xbf16>
    %504 = arith.truncf %489 : vector<8x32xf32> to vector<8x32xbf16>
    %cst_157 = arith.constant dense<0.000000e+00> : vector<8x32xf32>
    %505 = tpu.matmul %503, %504, %cst_157 {dimension_numbers = #tpu.dot_dimension_numbers<[1], [0], [0], [1], [0, 0, 1, 1], [], []>} : vector<8x8xbf16>, vector<8x32xbf16>, vector<8x32xf32> -> vector<8x32xf32>
    %506 = arith.truncf %505 : vector<8x32xf32> to vector<8x32xbf16>
    %507 = vector.extract_strided_slice %304 {offsets = [3, 0, 0], sizes = [1, 32, 128], strides = [1, 1, 1]} : vector<4x32x128xbf16> to vector<1x32x128xbf16>
    %508 = vector.shape_cast %507 : vector<1x32x128xbf16> to vector<32x128xbf16>
    %cst_158 = arith.constant dense<0.000000e+00> : vector<8x128xf32>
    %509 = tpu.matmul %506, %508, %cst_158 {dimension_numbers = #tpu.dot_dimension_numbers<[1], [0], [0], [1], [0, 0, 1, 1], [], []>} : vector<8x32xbf16>, vector<32x128xbf16>, vector<8x128xf32> -> vector<8x128xf32>
    %510 = arith.addf %484, %509 : vector<8x128xf32>
    %511 = tpu.concatenate %407, %510 in 0 : vector<8x128xf32>, vector<8x128xf32> -> vector<16x128xf32>
    %c1_159 = arith.constant 1 : index
    %c0_160 = arith.constant 0 : index
    %c0_161 = arith.constant 0 : index
    %512 = vector.load %arg6[%c1_159, %c0_160, %c0_161] : memref<2x1x128xf32, #tpu.memory_space<vmem>>, vector<1x1x128xf32>
    %513 = vector.shape_cast %512 : vector<1x1x128xf32> to vector<1x128xf32>
    %514 = vector.broadcast %513 : vector<1x128xf32> to vector<16x128xf32>
    %515 = arith.addf %511, %514 : vector<16x128xf32>
    %516 = arith.addf %294, %515 : vector<16x128xf32>
    %c1_162 = arith.constant 1 : index
    %c0_163 = arith.constant 0 : index
    %c0_164 = arith.constant 0 : index
    %517 = vector.load %arg11[%c1_162, %c0_163, %c0_164] : memref<2x1x128xf32, #tpu.memory_space<vmem>>, vector<1x1x128xf32>
    %518 = vector.shape_cast %517 : vector<1x1x128xf32> to vector<1x128xf32>
    %c1_165 = arith.constant 1 : index
    %c0_166 = arith.constant 0 : index
    %c0_167 = arith.constant 0 : index
    %519 = vector.load %arg12[%c1_165, %c0_166, %c0_167] : memref<2x1x128xf32, #tpu.memory_space<vmem>>, vector<1x1x128xf32>
    %520 = vector.shape_cast %519 : vector<1x1x128xf32> to vector<1x128xf32>
    %cst_168 = arith.constant dense<0.000000e+00> : vector<16xf32>
    %521 = vector.multi_reduction <add>, %516, %cst_168 [1] : vector<16x128xf32> to vector<16xf32>
    %522 = vector.shape_cast %521 : vector<16xf32> to vector<16x1xf32>
    %cst_169 = arith.constant 1.280000e+02 : f32
    %523 = vector.broadcast %cst_169 : f32 to vector<16x1xf32>
    %524 = arith.divf %522, %523 : vector<16x1xf32>
    %525 = vector.broadcast %524 : vector<16x1xf32> to vector<16x128xf32>
    %526 = arith.subf %516, %525 : vector<16x128xf32>
    %527 = arith.mulf %526, %526 : vector<16x128xf32>
    %cst_170 = arith.constant dense<0.000000e+00> : vector<16xf32>
    %528 = vector.multi_reduction <add>, %527, %cst_170 [1] : vector<16x128xf32> to vector<16xf32>
    %529 = vector.shape_cast %528 : vector<16xf32> to vector<16x1xf32>
    %cst_171 = arith.constant 1.280000e+02 : f32
    %530 = vector.broadcast %cst_171 : f32 to vector<16x1xf32>
    %531 = arith.divf %529, %530 : vector<16x1xf32>
    %532 = vector.broadcast %524 : vector<16x1xf32> to vector<16x128xf32>
    %533 = arith.subf %516, %532 : vector<16x128xf32>
    %cst_172 = arith.constant 9.99999974E-6 : f32
    %534 = vector.broadcast %cst_172 : f32 to vector<16x1xf32>
    %535 = arith.addf %531, %534 : vector<16x1xf32>
    %536 = math.rsqrt %535 : vector<16x1xf32>
    %537 = vector.broadcast %536 : vector<16x1xf32> to vector<16x128xf32>
    %538 = arith.mulf %533, %537 : vector<16x128xf32>
    %539 = vector.broadcast %518 : vector<1x128xf32> to vector<16x128xf32>
    %540 = arith.mulf %538, %539 : vector<16x128xf32>
    %541 = vector.broadcast %520 : vector<1x128xf32> to vector<16x128xf32>
    %542 = arith.addf %540, %541 : vector<16x128xf32>
    %543 = arith.truncf %542 : vector<16x128xf32> to vector<16x128xbf16>
    %c1_173 = arith.constant 1 : index
    %c0_174 = arith.constant 0 : index
    %c0_175 = arith.constant 0 : index
    %544 = vector.load %arg7[%c1_173, %c0_174, %c0_175] : memref<2x128x128xbf16, #tpu.memory_space<vmem>>, vector<1x128x128xbf16>
    %545 = vector.shape_cast %544 : vector<1x128x128xbf16> to vector<128x128xbf16>
    %cst_176 = arith.constant dense<0.000000e+00> : vector<16x128xf32>
    %546 = tpu.matmul %543, %545, %cst_176 {dimension_numbers = #tpu.dot_dimension_numbers<[1], [0], [0], [1], [0, 0, 1, 1], [], []>} : vector<16x128xbf16>, vector<128x128xbf16>, vector<16x128xf32> -> vector<16x128xf32>
    %c1_177 = arith.constant 1 : index
    %c0_178 = arith.constant 0 : index
    %c0_179 = arith.constant 0 : index
    %547 = vector.load %arg8[%c1_177, %c0_178, %c0_179] : memref<2x1x128xf32, #tpu.memory_space<vmem>>, vector<1x1x128xf32>
    %548 = vector.shape_cast %547 : vector<1x1x128xf32> to vector<1x128xf32>
    %549 = vector.broadcast %548 : vector<1x128xf32> to vector<16x128xf32>
    %550 = arith.addf %546, %549 : vector<16x128xf32>
    %cst_180 = arith.constant 0.000000e+00 : f32
    %551 = vector.broadcast %cst_180 : f32 to vector<16x128xf32>
    %552 = arith.maximumf %550, %551 : vector<16x128xf32>
    %553 = arith.truncf %552 : vector<16x128xf32> to vector<16x128xbf16>
    %c1_181 = arith.constant 1 : index
    %c0_182 = arith.constant 0 : index
    %c0_183 = arith.constant 0 : index
    %554 = vector.load %arg9[%c1_181, %c0_182, %c0_183] : memref<2x128x128xbf16, #tpu.memory_space<vmem>>, vector<1x128x128xbf16>
    %555 = vector.shape_cast %554 : vector<1x128x128xbf16> to vector<128x128xbf16>
    %cst_184 = arith.constant dense<0.000000e+00> : vector<16x128xf32>
    %556 = tpu.matmul %553, %555, %cst_184 {dimension_numbers = #tpu.dot_dimension_numbers<[1], [0], [0], [1], [0, 0, 1, 1], [], []>} : vector<16x128xbf16>, vector<128x128xbf16>, vector<16x128xf32> -> vector<16x128xf32>
    %c1_185 = arith.constant 1 : index
    %c0_186 = arith.constant 0 : index
    %c0_187 = arith.constant 0 : index
    %557 = vector.load %arg10[%c1_185, %c0_186, %c0_187] : memref<2x1x128xf32, #tpu.memory_space<vmem>>, vector<1x1x128xf32>
    %558 = vector.shape_cast %557 : vector<1x1x128xf32> to vector<1x128xf32>
    %559 = vector.broadcast %558 : vector<1x128xf32> to vector<16x128xf32>
    %560 = arith.addf %556, %559 : vector<16x128xf32>
    %561 = arith.addf %542, %560 : vector<16x128xf32>
    %c1_188 = arith.constant 1 : index
    %c0_189 = arith.constant 0 : index
    %c0_190 = arith.constant 0 : index
    %562 = vector.load %arg13[%c1_188, %c0_189, %c0_190] : memref<2x1x128xf32, #tpu.memory_space<vmem>>, vector<1x1x128xf32>
    %563 = vector.shape_cast %562 : vector<1x1x128xf32> to vector<1x128xf32>
    %c1_191 = arith.constant 1 : index
    %c0_192 = arith.constant 0 : index
    %c0_193 = arith.constant 0 : index
    %564 = vector.load %arg14[%c1_191, %c0_192, %c0_193] : memref<2x1x128xf32, #tpu.memory_space<vmem>>, vector<1x1x128xf32>
    %565 = vector.shape_cast %564 : vector<1x1x128xf32> to vector<1x128xf32>
    %cst_194 = arith.constant dense<0.000000e+00> : vector<16xf32>
    %566 = vector.multi_reduction <add>, %561, %cst_194 [1] : vector<16x128xf32> to vector<16xf32>
    %567 = vector.shape_cast %566 : vector<16xf32> to vector<16x1xf32>
    %cst_195 = arith.constant 1.280000e+02 : f32
    %568 = vector.broadcast %cst_195 : f32 to vector<16x1xf32>
    %569 = arith.divf %567, %568 : vector<16x1xf32>
    %570 = vector.broadcast %569 : vector<16x1xf32> to vector<16x128xf32>
    %571 = arith.subf %561, %570 : vector<16x128xf32>
    %572 = arith.mulf %571, %571 : vector<16x128xf32>
    %cst_196 = arith.constant dense<0.000000e+00> : vector<16xf32>
    %573 = vector.multi_reduction <add>, %572, %cst_196 [1] : vector<16x128xf32> to vector<16xf32>
    %574 = vector.shape_cast %573 : vector<16xf32> to vector<16x1xf32>
    %cst_197 = arith.constant 1.280000e+02 : f32
    %575 = vector.broadcast %cst_197 : f32 to vector<16x1xf32>
    %576 = arith.divf %574, %575 : vector<16x1xf32>
    %577 = vector.broadcast %569 : vector<16x1xf32> to vector<16x128xf32>
    %578 = arith.subf %561, %577 : vector<16x128xf32>
    %cst_198 = arith.constant 9.99999974E-6 : f32
    %579 = vector.broadcast %cst_198 : f32 to vector<16x1xf32>
    %580 = arith.addf %576, %579 : vector<16x1xf32>
    %581 = math.rsqrt %580 : vector<16x1xf32>
    %582 = vector.broadcast %581 : vector<16x1xf32> to vector<16x128xf32>
    %583 = arith.mulf %578, %582 : vector<16x128xf32>
    %584 = vector.broadcast %563 : vector<1x128xf32> to vector<16x128xf32>
    %585 = arith.mulf %583, %584 : vector<16x128xf32>
    %586 = vector.broadcast %565 : vector<1x128xf32> to vector<16x128xf32>
    %587 = arith.addf %585, %586 : vector<16x128xf32>
    %c0_199 = arith.constant 0 : index
    %c0_200 = arith.constant 0 : index
    %588 = vector.load %arg15[%c0_199, %c0_200] : memref<1x128xf32, #tpu.memory_space<vmem>>, vector<1x128xf32>
    %c0_201 = arith.constant 0 : index
    %c0_202 = arith.constant 0 : index
    %589 = vector.load %arg16[%c0_201, %c0_202] : memref<1x128xf32, #tpu.memory_space<vmem>>, vector<1x128xf32>
    %cst_203 = arith.constant dense<0.000000e+00> : vector<16xf32>
    %590 = vector.multi_reduction <add>, %587, %cst_203 [1] : vector<16x128xf32> to vector<16xf32>
    %591 = vector.shape_cast %590 : vector<16xf32> to vector<16x1xf32>
    %cst_204 = arith.constant 1.280000e+02 : f32
    %592 = vector.broadcast %cst_204 : f32 to vector<16x1xf32>
    %593 = arith.divf %591, %592 : vector<16x1xf32>
    %594 = vector.broadcast %593 : vector<16x1xf32> to vector<16x128xf32>
    %595 = arith.subf %587, %594 : vector<16x128xf32>
    %596 = arith.mulf %595, %595 : vector<16x128xf32>
    %cst_205 = arith.constant dense<0.000000e+00> : vector<16xf32>
    %597 = vector.multi_reduction <add>, %596, %cst_205 [1] : vector<16x128xf32> to vector<16xf32>
    %598 = vector.shape_cast %597 : vector<16xf32> to vector<16x1xf32>
    %cst_206 = arith.constant 1.280000e+02 : f32
    %599 = vector.broadcast %cst_206 : f32 to vector<16x1xf32>
    %600 = arith.divf %598, %599 : vector<16x1xf32>
    %601 = vector.broadcast %593 : vector<16x1xf32> to vector<16x128xf32>
    %602 = arith.subf %587, %601 : vector<16x128xf32>
    %cst_207 = arith.constant 9.99999974E-6 : f32
    %603 = vector.broadcast %cst_207 : f32 to vector<16x1xf32>
    %604 = arith.addf %600, %603 : vector<16x1xf32>
    %605 = math.rsqrt %604 : vector<16x1xf32>
    %606 = vector.broadcast %605 : vector<16x1xf32> to vector<16x128xf32>
    %607 = arith.mulf %602, %606 : vector<16x128xf32>
    %608 = vector.broadcast %588 : vector<1x128xf32> to vector<16x128xf32>
    %609 = arith.mulf %607, %608 : vector<16x128xf32>
    %610 = vector.broadcast %589 : vector<1x128xf32> to vector<16x128xf32>
    %611 = arith.addf %609, %610 : vector<16x128xf32>
    %612 = vector.extract_strided_slice %611 {offsets = [0, 0], sizes = [8, 128], strides = [1, 1]} : vector<16x128xf32> to vector<8x128xf32>
    %cst_208 = arith.constant dense<0.000000e+00> : vector<128xf32>
    %613 = vector.multi_reduction <add>, %612, %cst_208 [0] : vector<8x128xf32> to vector<128xf32>
    %614 = vector.shape_cast %613 : vector<128xf32> to vector<1x128xf32>
    %cst_209 = arith.constant 8.000000e+00 : f32
    %615 = vector.broadcast %cst_209 : f32 to vector<1x128xf32>
    %616 = arith.divf %614, %615 : vector<1x128xf32>
    %c0_210 = arith.constant 0 : index
    %c0_211 = arith.constant 0 : index
    %617 = vector.load %arg17[%c0_210, %c0_211] : memref<2x128xf32, #tpu.memory_space<vmem>>, vector<1x128xf32>
    tpu.vector_store %arg17[%c0_210, %c0_211], %616 {strides = array<i32>} : memref<2x128xf32, #tpu.memory_space<vmem>>, vector<1x128xf32>,
    %618 = vector.extract_strided_slice %611 {offsets = [8, 0], sizes = [8, 128], strides = [1, 1]} : vector<16x128xf32> to vector<8x128xf32>
    %cst_212 = arith.constant dense<0.000000e+00> : vector<128xf32>
    %619 = vector.multi_reduction <add>, %618, %cst_212 [0] : vector<8x128xf32> to vector<128xf32>
    %620 = vector.shape_cast %619 : vector<128xf32> to vector<1x128xf32>
    %cst_213 = arith.constant 8.000000e+00 : f32
    %621 = vector.broadcast %cst_213 : f32 to vector<1x128xf32>
    %622 = arith.divf %620, %621 : vector<1x128xf32>
    %c1_214 = arith.constant 1 : index
    %c0_215 = arith.constant 0 : index
    %623 = vector.load %arg17[%c1_214, %c0_215] : memref<2x128xf32, #tpu.memory_space<vmem>>, vector<1x128xf32>
    tpu.vector_store %arg17[%c1_214, %c0_215], %622 {strides = array<i32>} : memref<2x128xf32, #tpu.memory_space<vmem>>, vector<1x128xf32>,
    return
  }
  func.func @transform_0(%arg0: i32) -> (i32, i32) {
    %c0_i32 = arith.constant 0 : i32
    %c0_i32_0 = arith.constant 0 : i32
    %c0_i32_1 = arith.constant 0 : i32
    return %c0_i32, %c0_i32_0 : i32, i32
  }
  func.func @transform_1(%arg0: i32) -> (i32, i32) {
    %c0_i32 = arith.constant 0 : i32
    %c0_i32_0 = arith.constant 0 : i32
    %c0_i32_1 = arith.constant 0 : i32
    return %c0_i32, %c0_i32_0 : i32, i32
  }
  func.func @transform_2(%arg0: i32) -> (i32, i32, i32) {
    %c0_i32 = arith.constant 0 : i32
    %c0_i32_0 = arith.constant 0 : i32
    %c0_i32_1 = arith.constant 0 : i32
    %c0_i32_2 = arith.constant 0 : i32
    return %c0_i32, %c0_i32_0, %c0_i32_1 : i32, i32, i32
  }
  func.func @transform_3(%arg0: i32) -> (i32, i32, i32) {
    %c0_i32 = arith.constant 0 : i32
    %c0_i32_0 = arith.constant 0 : i32
    %c0_i32_1 = arith.constant 0 : i32
    %c0_i32_2 = arith.constant 0 : i32
    return %c0_i32, %c0_i32_0, %c0_i32_1 : i32, i32, i32
  }
  func.func @transform_4(%arg0: i32) -> (i32, i32, i32, i32) {
    %c0_i32 = arith.constant 0 : i32
    %c0_i32_0 = arith.constant 0 : i32
    %c0_i32_1 = arith.constant 0 : i32
    %c0_i32_2 = arith.constant 0 : i32
    %c0_i32_3 = arith.constant 0 : i32
    return %c0_i32, %c0_i32_0, %c0_i32_1, %c0_i32_2 : i32, i32, i32, i32
  }
  func.func @transform_5(%arg0: i32) -> (i32, i32, i32) {
    %c0_i32 = arith.constant 0 : i32
    %c0_i32_0 = arith.constant 0 : i32
    %c0_i32_1 = arith.constant 0 : i32
    %c0_i32_2 = arith.constant 0 : i32
    return %c0_i32, %c0_i32_0, %c0_i32_1 : i32, i32, i32
  }
  func.func @transform_6(%arg0: i32) -> (i32, i32, i32) {
    %c0_i32 = arith.constant 0 : i32
    %c0_i32_0 = arith.constant 0 : i32
    %c0_i32_1 = arith.constant 0 : i32
    %c0_i32_2 = arith.constant 0 : i32
    return %c0_i32, %c0_i32_0, %c0_i32_1 : i32, i32, i32
  }
  func.func @transform_7(%arg0: i32) -> (i32, i32, i32) {
    %c0_i32 = arith.constant 0 : i32
    %c0_i32_0 = arith.constant 0 : i32
    %c0_i32_1 = arith.constant 0 : i32
    %c0_i32_2 = arith.constant 0 : i32
    return %c0_i32, %c0_i32_0, %c0_i32_1 : i32, i32, i32
  }
  func.func @transform_8(%arg0: i32) -> (i32, i32, i32) {
    %c0_i32 = arith.constant 0 : i32
    %c0_i32_0 = arith.constant 0 : i32
    %c0_i32_1 = arith.constant 0 : i32
    %c0_i32_2 = arith.constant 0 : i32
    return %c0_i32, %c0_i32_0, %c0_i32_1 : i32, i32, i32
  }
  func.func @transform_9(%arg0: i32) -> (i32, i32, i32) {
    %c0_i32 = arith.constant 0 : i32
    %c0_i32_0 = arith.constant 0 : i32
    %c0_i32_1 = arith.constant 0 : i32
    %c0_i32_2 = arith.constant 0 : i32
    return %c0_i32, %c0_i32_0, %c0_i32_1 : i32, i32, i32
  }
  func.func @transform_10(%arg0: i32) -> (i32, i32, i32) {
    %c0_i32 = arith.constant 0 : i32
    %c0_i32_0 = arith.constant 0 : i32
    %c0_i32_1 = arith.constant 0 : i32
    %c0_i32_2 = arith.constant 0 : i32
    return %c0_i32, %c0_i32_0, %c0_i32_1 : i32, i32, i32
  }
  func.func @transform_11(%arg0: i32) -> (i32, i32, i32) {
    %c0_i32 = arith.constant 0 : i32
    %c0_i32_0 = arith.constant 0 : i32
    %c0_i32_1 = arith.constant 0 : i32
    %c0_i32_2 = arith.constant 0 : i32
    return %c0_i32, %c0_i32_0, %c0_i32_1 : i32, i32, i32
  }
  func.func @transform_12(%arg0: i32) -> (i32, i32, i32) {
    %c0_i32 = arith.constant 0 : i32
    %c0_i32_0 = arith.constant 0 : i32
    %c0_i32_1 = arith.constant 0 : i32
    %c0_i32_2 = arith.constant 0 : i32
    return %c0_i32, %c0_i32_0, %c0_i32_1 : i32, i32, i32
  }
  func.func @transform_13(%arg0: i32) -> (i32, i32, i32) {
    %c0_i32 = arith.constant 0 : i32
    %c0_i32_0 = arith.constant 0 : i32
    %c0_i32_1 = arith.constant 0 : i32
    %c0_i32_2 = arith.constant 0 : i32
    return %c0_i32, %c0_i32_0, %c0_i32_1 : i32, i32, i32
  }
  func.func @transform_14(%arg0: i32) -> (i32, i32) {
    %c0_i32 = arith.constant 0 : i32
    %c0_i32_0 = arith.constant 0 : i32
    %c0_i32_1 = arith.constant 0 : i32
    return %c0_i32, %c0_i32_0 : i32, i32
  }
  func.func @transform_15(%arg0: i32) -> (i32, i32) {
    %c0_i32 = arith.constant 0 : i32
    %c0_i32_0 = arith.constant 0 : i32
    %c0_i32_1 = arith.constant 0 : i32
    return %c0_i32, %c0_i32_0 : i32, i32
  }
  func.func @transform_16(%arg0: i32) -> (i32, i32) {
    %c0_i32 = arith.constant 0 : i32
    %c0_i32_0 = arith.constant 0 : i32
    %c0_i32_1 = arith.constant 0 : i32
    return %c0_i32, %c0_i32_0 : i32, i32
  }
}

</mosaic_0001>

<bundles_post_ra>
// kernel: transformer_encoder_forward.1
= control target key start
LH: loop header
LB: loop body
LE: loop exit
PB: predicated region body
PF: predicated region fallthrough
CT: control target
= control target key end

     0   :  { %s6375_s0 = inlined_call_operand.vmem [shape: f32[16,128], index: 0, kind: input, shape index: {}]   ;;  %s6376_s1 = inlined_call_operand.hbm [shape: f32[8,8], index: 1, kind: input, shape index: {}]   ;;  %s6377_s2 = inlined_call_operand.hbm [shape: bf16[2,128,384], index: 2, kind: input, shape index: {}]   ;;  %s6378_s3 = inlined_call_operand.hbm [shape: f32[2,1,384], index: 3, kind: input, shape index: {}]   ;;  %s6379_s4 = inlined_call_operand.vmem [shape: bf16[2,4,32,128], index: 4, kind: input, shape index: {}]   ;;  %s6380_s5 = inlined_call_operand.hbm [shape: f32[2,1,128], index: 5, kind: input, shape index: {}]   ;;  %s6381_s6 = inlined_call_operand.vmem [shape: bf16[2,128,128], index: 6, kind: input, shape index: {}]   ;;  %s6382_s7 = inlined_call_operand.hbm [shape: f32[2,1,128], index: 7, kind: input, shape index: {}]   ;;  %s6383_s8 = inlined_call_operand.hbm [shape: bf16[2,128,128], index: 8, kind: input, shape index: {}]   ;;  %s6384_s9 = inlined_call_operand.hbm [shape: f32[2,1,128], index: 9, kind: input, shape index: {}]   ;;  %s6385_s10 = inlined_call_operand.hbm [shape: f32[2,1,128], index: 10, kind: input, shape index: {}]   ;;  %s6386_s11 = inlined_call_operand.hbm [shape: f32[2,1,128], index: 11, kind: input, shape index: {}]   ;;  %s6387_s12 = inlined_call_operand.hbm [shape: f32[2,1,128], index: 12, kind: input, shape index: {}]   ;;  %s6388_s13 = inlined_call_operand.hbm [shape: f32[2,1,128], index: 13, kind: input, shape index: {}]   ;;  %s6389_s14 = inlined_call_operand.vmem [shape: f32[1,128], index: 14, kind: input, shape index: {}]   ;;  %s6390_s15 = inlined_call_operand.vmem [shape: f32[1,128], index: 15, kind: input, shape index: {}]   ;;  %s6391_s16 = inlined_call_operand.hbm [shape: f32[2,128], index: 16, kind: output, shape index: {}]  }
   0x1   :  { %6395 = sst [smem:[#allocation28_spill]] %s6375_s0 }
   0x2   :  { %21 = vsyncpa [#allocation3], 0 }
   0x3   :  { %22 = vsyncpa [#allocation6], 0 }
   0x4   :  { %23 = vsyncpa [#allocation9], 0 }
   0x5   :  { %24 = vsyncpa [#allocation12], 0 }
   0x6   :  { %25 = vsyncpa [#allocation15], 0 }
   0x7   :  { %26 = vsyncpa [#allocation18], 0 }
   0x8   :  { %27 = vsyncpa [#allocation4], 0  ;;  %s5368_s21 = smov [#allocation5]   ;;  %s5090_s25 = scalar_lea.hbm %s6377_s2, 6144 }
   0x9   :  { %s45_s22 = sshll.u32 %s5368_s21, 4  ;;  %p5091_p0 = scmp.ne.s32.totalorder %s6377_s2, %s5090_s25  ;;  %s46_s22 = int_to_ptr.vmem [resolvable:$true] %s45_s22 }
   0xa   :  { %p5094_p1 = scmp.lt.u32.totalorder %s5090_s25, %s6377_s2 }
   0xc   :  { %p5096_p2 = pnand %p5094_p1, %p5091_p0 }
   0xe   :  { %5099 = shalt.err (!%p5096_p2)
}
   0xf   :  { %s5100_s30 = scalar_lea.vmem %s46_s22, 6144  ;;  %p5105_p4 = scmp.lt.s32.totalorder %s46_s22, %s46_s22 }
  0x10   :  { %p5101_p3 = scmp.ne.s32.totalorder %s46_s22, %s5100_s30  ;;  %p5106_p5 = scmp.lt.s32.totalorder %s5100_s30, %s5100_s30 }
  0x12   :  { %p5107_p6 = por %p5106_p5, %p5105_p4 }
  0x14   :  { %p5108_p7 = pnand %p5107_p6, %p5101_p3 }
  0x16   :  { %5111 = shalt.err (!%p5108_p7)
}
  0x17   :  { %s5369_s0 = smov 192   ;;  %s5370_s17 = smov 12  }
  0x18   :  { %51 = dma.hbm_to_vmem [thread:$0]  %s6377_s2, 6144, %s46_s22, [#allocation6], %s5369_s0, %s5369_s0, %s5370_s17  }
  0x19   :  { %s5371_s20 = smov [#allocation8]   ;;  %s5112_s25 = scalar_lea.hbm %s6380_s5, 32 }
  0x1a   :  { %s71_s21 = sshll.u32 %s5371_s20, 4  ;;  %p5113_p8 = scmp.ne.s32.totalorder %s6380_s5, %s5112_s25  ;;  %s72_s21 = int_to_ptr.vmem [resolvable:$true] %s71_s21 }
  0x1b   :  { %p5116_p9 = scmp.lt.u32.totalorder %s5112_s25, %s6380_s5 }
  0x1d   :  { %p5118_p10 = pnand %p5116_p9, %p5113_p8 }
  0x1f   :  { %5121 = shalt.err (!%p5118_p10)
}
  0x20   :  { %s5122_s30 = scalar_lea.vmem %s72_s21, 32  ;;  %p5127_p12 = scmp.lt.s32.totalorder %s72_s21, %s72_s21 }
  0x21   :  { %p5123_p11 = scmp.ne.s32.totalorder %s72_s21, %s5122_s30  ;;  %p5128_p13 = scmp.lt.s32.totalorder %s5122_s30, %s5122_s30 }
  0x23   :  { %p5129_p0 = por %p5128_p13, %p5127_p12 }
  0x25   :  { %p5130_p1 = pnand %p5129_p0, %p5123_p11 }
  0x27   :  { %5133 = shalt.err (!%p5130_p1)
}
  0x28   :  { %s6393_s2 = smov 16   ;;  %s5373_s22 = smov 1  }
  0x29   :  { %77 = dma.hbm_to_vmem [thread:$0]  %s6380_s5, 32, %s72_s21, [#allocation9], %s6393_s2, %s6393_s2, %s5373_s22  }
  0x2a   :  { %s5374_s18 = smov [#allocation11]   ;;  %s5134_s24 = scalar_lea.hbm %s6383_s8, 2048 }
  0x2b   :  { %s97_s19 = sshll.u32 %s5374_s18, 4  ;;  %p5135_p2 = scmp.ne.s32.totalorder %s6383_s8, %s5134_s24  ;;  %s98_s19 = int_to_ptr.vmem [resolvable:$true] %s97_s19 }
  0x2c   :  { %p5138_p3 = scmp.lt.u32.totalorder %s5134_s24, %s6383_s8 }
  0x2e   :  { %p5140_p4 = pnand %p5138_p3, %p5135_p2 }
  0x30   :  { %5143 = shalt.err (!%p5140_p4)
}
  0x31   :  { %s5144_s29 = scalar_lea.vmem %s98_s19, 2048  ;;  %p5149_p6 = scmp.lt.s32.totalorder %s98_s19, %s98_s19 }
  0x32   :  { %p5145_p5 = scmp.ne.s32.totalorder %s98_s19, %s5144_s29  ;;  %p5150_p7 = scmp.lt.s32.totalorder %s5144_s29, %s5144_s29 }
  0x34   :  { %p5151_p8 = por %p5150_p7, %p5149_p6 }
  0x36   :  { %p5152_p9 = pnand %p5151_p8, %p5145_p5 }
  0x38   :  { %5155 = shalt.err (!%p5152_p9)
}
  0x39   :  { %s5375_s5 = smov 64   ;;  %s5376_s21 = smov 4  }
  0x3a   :  { %103 = dma.hbm_to_vmem [thread:$0]  %s6383_s8, 2048, %s98_s19, [#allocation12], %s5375_s5, %s5375_s5, %s5376_s21  }
  0x3b   :  { %s5377_s17 = smov [#allocation14]   ;;  %s5378_s20 = smov [#allocation17]  }
  0x3c   :  { %s121_s18 = sshll.u32 %s5377_s17, 4  ;;  %s145_s23 = sshll.u32 %s5378_s20, 4  ;;  %s122_s18 = int_to_ptr.vmem [resolvable:$true] %s121_s18  ;;  %s146_s23 = int_to_ptr.vmem [resolvable:$true] %s145_s23 }
  0x3d   :  { %s5156_s26 = scalar_lea.hbm %s6385_s10, 32 }
  0x3e   :  { %p5157_p10 = scmp.ne.s32.totalorder %s6385_s10, %s5156_s26  ;;  %p5160_p11 = scmp.lt.u32.totalorder %s5156_s26, %s6385_s10 }
  0x40   :  { %p5162_p12 = pnand %p5160_p11, %p5157_p10 }
  0x42   :  { %5165 = shalt.err (!%p5162_p12)
}
  0x43   :  { %s5166_s8 = scalar_lea.vmem %s122_s18, 32  ;;  %p5171_p0 = scmp.lt.s32.totalorder %s122_s18, %s122_s18 }
  0x44   :  { %p5167_p13 = scmp.ne.s32.totalorder %s122_s18, %s5166_s8  ;;  %p5172_p1 = scmp.lt.s32.totalorder %s5166_s8, %s5166_s8 }
  0x46   :  { %p5173_p2 = por %p5172_p1, %p5171_p0 }
  0x48   :  { %p5174_p3 = pnand %p5173_p2, %p5167_p13 }
  0x4a   :  { %5177 = shalt.err (!%p5174_p3)
}
  0x4b   :  { %s6396_s19 = smov 16   ;;  %s5178_s17 = scalar_lea.hbm %s6387_s12, 32 }
  0x4c   :  { %127 = dma.hbm_to_vmem [thread:$0]  %s6385_s10, 32, %s122_s18, [#allocation15], %s6396_s19, %s6396_s19, %s5373_s22  }
  0x4d   :  { %p5179_p4 = scmp.ne.s32.totalorder %s6387_s12, %s5178_s17  ;;  %p5182_p5 = scmp.lt.u32.totalorder %s5178_s17, %s6387_s12 }
  0x4f   :  { %p5184_p6 = pnand %p5182_p5, %p5179_p4 }
  0x51   :  { %5187 = shalt.err (!%p5184_p6)
}
  0x52   :  { %s5188_s27 = scalar_lea.vmem %s146_s23, 32  ;;  %p5193_p8 = scmp.lt.s32.totalorder %s146_s23, %s146_s23 }
  0x53   :  { %p5189_p7 = scmp.ne.s32.totalorder %s146_s23, %s5188_s27  ;;  %p5194_p9 = scmp.lt.s32.totalorder %s5188_s27, %s5188_s27 }
  0x55   :  { %p5195_p10 = por %p5194_p9, %p5193_p8 }
  0x57   :  { %p5196_p11 = pnand %p5195_p10, %p5189_p7 }
  0x59   :  { %5199 = shalt.err (!%p5196_p11)
}
  0x5a   :  { %151 = dma.hbm_to_vmem [thread:$0]  %s6387_s12, 32, %s146_s23, [#allocation18], %s6396_s19, %s6396_s19, %s5373_s22  }
  0x5b   :  { %s5379_s28 = smov [#allocation2]   ;;  %s5380_s8 = smov [#allocation7]  }
  0x5c   :  { %s36_s29 = sshll.u32 %s5379_s28, 4  ;;  %s57_s21 = sshll.u32 %s5380_s8, 4  ;;  %s37_s29 = int_to_ptr.vmem [resolvable:$true] %s36_s29  ;;  %s58_s21 = int_to_ptr.vmem [resolvable:$true] %s57_s21 }
  0x5d   :  { %s5200_s2 = scalar_lea.hbm %s6376_s1, 128 }
  0x5e   :  { %p5201_p12 = scmp.ne.s32.totalorder %s6376_s1, %s5200_s2  ;;  %p5204_p13 = scmp.lt.u32.totalorder %s5200_s2, %s6376_s1 }
  0x60   :  { %p5206_p0 = pnand %p5204_p13, %p5201_p12 }
  0x62   :  { %5209 = shalt.err (!%p5206_p0)
}
  0x63   :  { %s5210_s12 = scalar_lea.vmem %s37_s29, 128  ;;  %p5215_p2 = scmp.lt.s32.totalorder %s37_s29, %s37_s29 }
  0x64   :  { %p5211_p1 = scmp.ne.s32.totalorder %s37_s29, %s5210_s12  ;;  %p5216_p3 = scmp.lt.s32.totalorder %s5210_s12, %s5210_s12 }
  0x66   :  { %p5217_p4 = por %p5216_p3, %p5215_p2 }
  0x68   :  { %p5218_p5 = pnand %p5217_p4, %p5211_p1 }
  0x6a   :  { %5221 = shalt.err (!%p5218_p5)
}
  0x6b   :  { %39 = dma.hbm_to_vmem [thread:$0]  %s6376_s1, 128, %s37_s29, [#allocation3]  }
  0x6c   :  { %s5222_s18 = scalar_lea.hbm %s6378_s3, 96 }
  0x6d   :  { %p5223_p6 = scmp.ne.s32.totalorder %s6378_s3, %s5222_s18  ;;  %p5226_p7 = scmp.lt.u32.totalorder %s5222_s18, %s6378_s3 }
  0x6f   :  { %p5228_p8 = pnand %p5226_p7, %p5223_p6 }
  0x71   :  { %5231 = shalt.err (!%p5228_p8)
}
  0x72   :  { %s5232_s2 = scalar_lea.vmem %s58_s21, 96  ;;  %p5237_p10 = scmp.lt.s32.totalorder %s58_s21, %s58_s21 }
  0x73   :  { %p5233_p9 = scmp.ne.s32.totalorder %s58_s21, %s5232_s2  ;;  %p5238_p11 = scmp.lt.s32.totalorder %s5232_s2, %s5232_s2 }
  0x75   :  { %p5239_p12 = por %p5238_p11, %p5237_p10 }
  0x77   :  { %p5240_p13 = pnand %p5239_p12, %p5233_p9 }
  0x79   :  { %5243 = shalt.err (!%p5240_p13)
}
  0x7a   :  { %s5381_s1 = smov 48   ;;  %s5382_s29 = smov 3  }
  0x7b   :  { %63 = dma.hbm_to_vmem [thread:$0]  %s6378_s3, 96, %s58_s21, [#allocation6], %s5381_s1, %s5381_s1, %s5382_s29  }
  0x7c   :  { %s5383_s24 = smov [#allocation10]   ;;  %s5384_s12 = smov [#allocation13]  }
  0x7d   :  { %s85_s25 = sshll.u32 %s5383_s24, 4  ;;  %s109_s23 = sshll.u32 %s5384_s12, 4  ;;  %s86_s25 = int_to_ptr.vmem [resolvable:$true] %s85_s25  ;;  %s110_s23 = int_to_ptr.vmem [resolvable:$true] %s109_s23 }
  0x7e   :  { %s5244_s10 = scalar_lea.hbm %s6382_s7, 32 }
  0x7f   :  { %p5245_p0 = scmp.ne.s32.totalorder %s6382_s7, %s5244_s10  ;;  %p5248_p1 = scmp.lt.u32.totalorder %s5244_s10, %s6382_s7 }
  0x81   :  { %p5250_p2 = pnand %p5248_p1, %p5245_p0 }
  0x83   :  { %5253 = shalt.err (!%p5250_p2)
}
  0x84   :  { %s5254_s3 = scalar_lea.vmem %s86_s25, 32  ;;  %p5259_p4 = scmp.lt.s32.totalorder %s86_s25, %s86_s25 }
  0x85   :  { %p5255_p3 = scmp.ne.s32.totalorder %s86_s25, %s5254_s3  ;;  %p5260_p5 = scmp.lt.s32.totalorder %s5254_s3, %s5254_s3 }
  0x87   :  { %p5261_p6 = por %p5260_p5, %p5259_p4 }
  0x89   :  { %p5262_p7 = pnand %p5261_p6, %p5255_p3 }
  0x8b   :  { %5265 = shalt.err (!%p5262_p7)
}
  0x8c   :  { %91 = dma.hbm_to_vmem [thread:$0]  %s6382_s7, 32, %s86_s25, [#allocation9], %s6396_s19, %s6396_s19, %s5373_s22  }
  0x8d   :  { %s5266_s29 = scalar_lea.hbm %s6384_s9, 32 }
  0x8e   :  { %p5267_p8 = scmp.ne.s32.totalorder %s6384_s9, %s5266_s29  ;;  %p5270_p9 = scmp.lt.u32.totalorder %s5266_s29, %s6384_s9 }
  0x90   :  { %p5272_p10 = pnand %p5270_p9, %p5267_p8 }
  0x92   :  { %5275 = shalt.err (!%p5272_p10)
}
  0x93   :  { %s5276_s26 = scalar_lea.vmem %s110_s23, 32  ;;  %p5281_p12 = scmp.lt.s32.totalorder %s110_s23, %s110_s23 }
  0x94   :  { %p5277_p11 = scmp.ne.s32.totalorder %s110_s23, %s5276_s26  ;;  %p5282_p13 = scmp.lt.s32.totalorder %s5276_s26, %s5276_s26 }
  0x96   :  { %p5283_p0 = por %p5282_p13, %p5281_p12 }
  0x98   :  { %p5284_p1 = pnand %p5283_p0, %p5277_p11 }
  0x9a   :  { %5287 = shalt.err (!%p5284_p1)
}
  0x9b   :  { %115 = dma.hbm_to_vmem [thread:$0]  %s6384_s9, 32, %s110_s23, [#allocation12], %s6396_s19, %s6396_s19, %s5373_s22  }
  0x9c   :  { %s5385_s27 = smov [#allocation16]   ;;  %s5386_s18 = smov [#allocation19]  }
  0x9d   :  { %s133_s10 = sshll.u32 %s5385_s27, 4  ;;  %s157_s28 = sshll.u32 %s5386_s18, 4  ;;  %s134_s10 = int_to_ptr.vmem [resolvable:$true] %s133_s10  ;;  %s158_s28 = int_to_ptr.vmem [resolvable:$true] %s157_s28 }
  0x9e   :  { %s5288_s3 = scalar_lea.hbm %s6386_s11, 32 }
  0x9f   :  { %p5289_p2 = scmp.ne.s32.totalorder %s6386_s11, %s5288_s3  ;;  %p5292_p3 = scmp.lt.u32.totalorder %s5288_s3, %s6386_s11 }
  0xa1   :  { %p5294_p4 = pnand %p5292_p3, %p5289_p2 }
  0xa3   :  { %5297 = shalt.err (!%p5294_p4)
}
  0xa4   :  { %s5298_s9 = scalar_lea.vmem %s134_s10, 32  ;;  %p5303_p6 = scmp.lt.s32.totalorder %s134_s10, %s134_s10 }
  0xa5   :  { %p5299_p5 = scmp.ne.s32.totalorder %s134_s10, %s5298_s9  ;;  %p5304_p7 = scmp.lt.s32.totalorder %s5298_s9, %s5298_s9 }
  0xa7   :  { %p5305_p8 = por %p5304_p7, %p5303_p6 }
  0xa9   :  { %p5306_p9 = pnand %p5305_p8, %p5299_p5 }
  0xab   :  { %5309 = shalt.err (!%p5306_p9)
}
  0xac   :  { %139 = dma.hbm_to_vmem [thread:$0]  %s6386_s11, 32, %s134_s10, [#allocation15], %s6396_s19, %s6396_s19, %s5373_s22  }
  0xad   :  { %s5310_s24 = scalar_lea.hbm %s6388_s13, 32 }
  0xae   :  { %p5311_p10 = scmp.ne.s32.totalorder %s6388_s13, %s5310_s24  ;;  %p5314_p11 = scmp.lt.u32.totalorder %s5310_s24, %s6388_s13 }
  0xb0   :  { %p5316_p12 = pnand %p5314_p11, %p5311_p10 }
  0xb2   :  { %5319 = shalt.err (!%p5316_p12)
}
  0xb3   :  { %s5320_s27 = scalar_lea.vmem %s158_s28, 32  ;;  %p5325_p0 = scmp.lt.s32.totalorder %s158_s28, %s158_s28 }
  0xb4   :  { %p5321_p13 = scmp.ne.s32.totalorder %s158_s28, %s5320_s27  ;;  %p5326_p1 = scmp.lt.s32.totalorder %s5320_s27, %s5320_s27 }
  0xb6   :  { %p5327_p2 = por %p5326_p1, %p5325_p0 }
  0xb8   :  { %p5328_p3 = pnand %p5327_p2, %p5321_p13 }
  0xba   :  { %5331 = shalt.err (!%p5328_p3)
}
  0xbb   :  { %163 = dma.hbm_to_vmem [thread:$0]  %s6388_s13, 32, %s158_s28, [#allocation18], %s6396_s19, %s6396_s19, %s5373_s22  }
  0xbc   :  { %5354 = dma.done.wait [#allocation3], 128  }
  0xbd   :  { %5355 = vsyncadd [#allocation3], 4294967168 }
  0xbe   :  { %5356 = dma.done.wait [#allocation6], 6240  }
  0xbf   :  { %5357 = vsyncadd [#allocation6], 4294961056 }
  0xc0   :  { %5358 = dma.done.wait [#allocation9], 64  }
  0xc1   :  { %5359 = vsyncadd [#allocation9], 4294967232 }
  0xc2   :  { %5360 = dma.done.wait [#allocation12], 2080  }
  0xc3   :  { %5361 = vsyncadd [#allocation12], 4294965216 }
  0xc4   :  { %5362 = dma.done.wait [#allocation15], 64  }
  0xc5   :  { %5363 = vsyncadd [#allocation15], 4294967232 }
  0xc6   :  { %5364 = dma.done.wait [#allocation18], 64  }
  0xc7   :  { %5365 = vsyncadd [#allocation18], 4294967232  ;;  %v5387_v0 = vmov 0   ;;  %v4891_v1 = vld [vmem:[#allocation5 + $0x4] ss:$12 sps:$4 sm:$0xff]   ;;  %s6397_s19 = sld [smem:[#allocation28_spill]]  ;;  %v240_v21 = vlaneseq }
  0xc8   :  { %415 = vmatprep.mubr.bf16.mxu0 %v5387_v0  ;;  %v4893_v2 = vld [vmem:[#allocation5] ss:$12 sps:$4 sm:$0xff]   ;;  %383 = vmatprep.subr.bf16.mxu0 %v4891_v1  ;;  %v4894_v3 = vld [vmem:[#allocation5 + $0x1c] ss:$12 sps:$4 sm:$0xff]   ;;  %v4896_v4 = vld [vmem:[#allocation5 + $0x18] ss:$12 sps:$4 sm:$0xff]  }
  0xc9   :  { %384 = vmatpush1.bf16.msra.mxu0 %v4893_v2  ;;  %v4897_v5 = vld [vmem:[#allocation5 + $0x34] ss:$12 sps:$4 sm:$0xff]   ;;  %v4899_v6 = vld [vmem:[#allocation5 + $0x30] ss:$12 sps:$4 sm:$0xff]   ;;  %v4900_v7 = vld [vmem:[#allocation5 + $0x4c] ss:$12 sps:$4 sm:$0xff]  }
  0xca   :  { %385 = vmatprep.subr.bf16.mxu0 %v4894_v3  ;;  %v4902_v8 = vld [vmem:[#allocation5 + $0x48] ss:$12 sps:$4 sm:$0xff]   ;;  %v4903_v9 = vld [vmem:[#allocation5 + $0x64] ss:$12 sps:$4 sm:$0xff]   ;;  %v4905_v10 = vld [vmem:[#allocation5 + $0x60] ss:$12 sps:$4 sm:$0xff]  }
  0xcb   :  { %v4906_v11 = vld [vmem:[#allocation5 + $0x7c] ss:$12 sps:$4 sm:$0xff]   ;;  %v4908_v12 = vld [vmem:[#allocation5 + $0x78] ss:$12 sps:$4 sm:$0xff]   ;;  %v4909_v13 = vld [vmem:[#allocation5 + $0x94] ss:$12 sps:$4 sm:$0xff]  }
  0xcc   :  { %v4911_v14 = vld [vmem:[#allocation5 + $0x90] ss:$12 sps:$4 sm:$0xff]   ;;  %v4912_v15 = vld [vmem:[#allocation5 + $0xac] ss:$12 sps:$4 sm:$0xff]   ;;  %v4914_v16 = vld [vmem:[#allocation5 + $0xa8] ss:$12 sps:$4 sm:$0xff]  }
  0xcd   :  { %386 = vmatpush1.bf16.msra.mxu0 %v4896_v4  ;;  %v202_v17 = vld [vmem:[%s6397_s19] sm:$0xff]  ;;  %v203_v18 = vld [vmem:[%s6397_s19 + $0x8] sm:$0xff]  ;;  %v5388_v20 = vmov 0.0   ;;  %vm5389_vm0 = vmmov 0   ;;  %v5649_v22 = vshrl.u32 %v240_v21, 7  ;;  %vm486_vm1 = vcmask 261120  }
  0xce   :  { %387 = vmatprep.subr.bf16.mxu0 %v4897_v5  ;;  %v5640_v19 = vpack.c.bf16 %v203_v18, %v202_v17  ;;  %4426 = vmatprep.subr.bf16.mxu1 %v5388_v20  ;;  %v5652_v24 = vld [vmem:[#allocation7] sm:$0x7]  ;;  %s5390_s8 = smov 96   ;;  %v4915_v40 = vld [vmem:[#allocation5 + $0x8] ss:$12 sps:$4 sm:$0xff]   ;;  %v5696_v51 = vld [vmem:[#allocation2] sm:$0xff] }
  0xcf   :  { %4442 = vmatprep.mubr.msk.bf16.mxu1 %vm5389_vm0, %v5388_v20  ;;  %v242_v23 = vsub.s32 0, %v5649_v22  ;;  %v246_v25 = vsub.s32 1, %v5649_v22  ;;  %4427 = vmatpush3.bf16.msra.mxu1 %v4915_v40  ;;  %v4916_v41 = vld [vmem:[#allocation5 + $0x20] ss:$12 sps:$4 sm:$0xff]   ;;  %v4917_v42 = vld [vmem:[#allocation5 + $0x38] ss:$12 sps:$4 sm:$0xff]  }
  0xd0   :  { %4428 = vmatprep.subr.bf16.mxu1 %v5388_v20  ;;  %v4918_v43 = vld [vmem:[#allocation5 + $0x50] ss:$12 sps:$4 sm:$0xff]   ;;  %v4919_v44 = vld [vmem:[#allocation5 + $0x68] ss:$12 sps:$4 sm:$0xff]   ;;  %v4920_v45 = vld [vmem:[#allocation5 + $0x80] ss:$12 sps:$4 sm:$0xff]  }
  0xd1   :  { %388 = vmatpush1.bf16.msra.mxu0 %v4899_v6  ;;  %v243_v26 = vrot.slane %v5652_v24, %v242_v23  ;;  %v247_v27 = vrot.slane %v5652_v24, %v246_v25  ;;  %v4921_v48 = vld [vmem:[#allocation5 + $0x98] ss:$12 sps:$4 sm:$0xff]   ;;  %v4922_v49 = vld [vmem:[#allocation5 + $0xb0] ss:$12 sps:$4 sm:$0xff]   ;;  %vm533_vm2 = vcmask 64512   ;;  %vm550_vm3 = vcmask 1043456  }
  0xd2   :  { %389 = vmatprep.subr.bf16.mxu0 %v4900_v7  ;;  %v5745_v40 = vld [vmem:[%s6379_s4] sm:$0xff]   ;;  %s5391_s29 = smov 32  }
  0xd3   :  { %4429 = vmatpush3.bf16.msra.mxu1 %v4916_v41 }
  0xd4   :  { %4430 = vmatprep.subr.bf16.mxu1 %v5388_v20 }
  0xd5   :  { %390 = vmatpush1.bf16.msra.mxu0 %v4902_v8  ;;  %v250_v8 = vsub.s32 2, %v5649_v22 }
  0xd6   :  { %391 = vmatprep.subr.bf16.mxu0 %v4903_v9 }
  0xd7   :  { %4431 = vmatpush3.bf16.msra.mxu1 %v4917_v42  ;;  %v251_v9 = vrot.slane %v5652_v24, %v250_v8  ;;  %v5752_v42 = vld [vmem:[%s6379_s4 + $0x8] sm:$0xff]  }
  0xd8   :  { %4432 = vmatprep.subr.bf16.mxu1 %v5388_v20 }
  0xd9   :  { %392 = vmatpush1.bf16.msra.mxu0 %v4905_v10 }
  0xda   :  { %393 = vmatprep.subr.bf16.mxu0 %v4906_v11 }
  0xdb   :  { %4433 = vmatpush3.bf16.msra.mxu1 %v4918_v43 }
  0xdc   :  { %4434 = vmatprep.subr.bf16.mxu1 %v5388_v20 }
  0xdd   :  { %394 = vmatpush1.bf16.msra.mxu0 %v4908_v12 }
  0xde   :  { %395 = vmatprep.subr.bf16.mxu0 %v4909_v13 }
  0xdf   :  { %4435 = vmatpush3.bf16.msra.mxu1 %v4919_v44 }
  0xe0   :  { %4436 = vmatprep.subr.bf16.mxu1 %v5388_v20 }
  0xe1   :  { %396 = vmatpush1.bf16.msra.mxu0 %v4911_v14 }
  0xe2   :  { %397 = vmatprep.subr.bf16.mxu0 %v4912_v15 }
  0xe3   :  { %4437 = vmatpush3.bf16.msra.mxu1 %v4920_v45 }
  0xe4   :  { %4438 = vmatprep.subr.bf16.mxu1 %v5388_v20 }
  0xe5   :  { %398 = vmatpush1.bf16.msra.mxu0 %v4914_v16 }
  0xe6   :  { %4446 = vmatprep.subr.bf16.mxu0 %v5388_v20 }
  0xe7   :  { %4439 = vmatpush3.bf16.msra.mxu1 %v4921_v48 }
  0xe8   :  { %416 = vmatmul.mubr.bf16.vlgmr.msra.gmra.mrb[0].mxu0 %v5640_v19  ;;  %4440 = vmatprep.subr.bf16.mxu1 %v5388_v20 }
  0xe9   :  { %4448 = vmatprep.mubr.msk.bf16.mxu0 %vm5389_vm0, %v5388_v20 }
  0xeb   :  { %4441 = vmatpush3.bf16.msra.mxu1 %v4922_v49 }
  0xec   :  { %4452 = vmatprep.subr.bf16.mxu1 %v5388_v20 }
  0xee   :  { %4443 = vmatmul.mubr.bf16.vlgmr.msra.gmra.mrb[0].mxu1 %v5640_v19 }
  0xef   :  { %4454 = vmatprep.mubr.msk.bf16.mxu1 %vm5389_vm0, %v5388_v20 }
 0x1bb   :  { %v417_v28 = vpop.f32.mrb[0].mxu0 }
 0x1bc   :  { %v418_v29 = vadd.f32 %v417_v28, %v243_v26  ;;  %v419_v30 = vpop.f32.mrb[1].mxu0 }
 0x1bd   :  { %v420_v31 = vadd.f32 %v419_v30, %v247_v27  ;;  %v421_v32 = vpop.f32.mrb[2].mxu0  ;;  %v5735_v30 = vld [vmem:[%s6379_s4 + $0x18] sm:$0xff]  }
 0x1be   :  { %v5661_v33 = vadd.f32 %v421_v32, %v243_v26  ;;  %v423_v34 = vpop.f32.mrb[3].mxu0  ;;  %v483_v35 = vmul.f32 0.17677669, %v418_v29  ;;  %v5729_v29 = vld [vmem:[%s6379_s4 + $0x10] sm:$0xff]  }
 0x1bf   :  { %v5663_v36 = vpack.c.bf16 %v420_v31, %v420_v31  ;;  %v5665_v37 = vadd.f32 %v423_v34, %v247_v27 }
 0x1c0   :  { %v5671_v39 = vpack.c.bf16 %v483_v35, %v483_v35 }
 0x1c1   :  { %599 = vrot.lane.b32.xlu0 %v5663_v36, %s5390_s8  ;;  %v491_v38 = vsel %vm486_vm1, %v5663_v36, 0  ;;  %v460_v4 = vpop.f32.mrb[0].mxu1 }
 0x1c2   :  { %4447 = vmatpush3.bf16.xpose.msra.mxu0 %v491_v38  ;;  %v4444_v5 = vpop.f32.mrb[1].mxu1  ;;  %v461_v10 = vadd.f32 %v460_v4, %v251_v9 }
 0x1c3   :  { %4458 = vmatprep.subr.bf16.mxu0 %v5388_v20  ;;  %v463_v11 = vpop.f32.mrb[2].mxu1 }
 0x1c4   :  { %v5707_v12 = vpack.c.bf16 %v461_v10, %v461_v10  ;;  %v4445_v13 = vpop.f32.mrb[3].mxu1  ;;  %v5709_v14 = vadd.f32 %v463_v11, %v251_v9 }
 0x1c5   :  { %596 = vrot.lane.b32.xlu0 %v5671_v39, %s5390_s8 }
 0x1c6   :  { %v552_v15 = vsel %vm550_vm3, %v5707_v12, 0 }
 0x1c7   :  { %4453 = vmatpush3.bf16.msra.mxu1 %v552_v15 }
 0x1c8   :  { %4464 = vmatprep.subr.bf16.mxu1 %v5388_v20 }
 0x1c9   :  { %4449 = vmatmul.mubr.msk.bf16.vlgmr.msra.gmra.mrb[4].mxu0 %vm486_vm1, %v5671_v39 }
 0x1ca   :  { %4460 = vmatprep.mubr.msk.bf16.mxu0 %vm5389_vm0, %v5388_v20 }
 0x233   :  { %v600_v46 = vpop.permute.xlu0 %599 }
 0x234   :  { %v605_v47 = vsel %vm486_vm1, %v600_v46, 0 }
 0x235   :  { %4459 = vmatpush3.bf16.xpose.msra.mxu0 %v605_v47 }
 0x236   :  { %4470 = vmatprep.subr.bf16.mxu0 %v5388_v20 }
 0x237   :  { %v597_v50 = vpop.permute.xlu0 %596 }
 0x23c   :  { %4461 = vmatmul.mubr.msk.bf16.vlgmr.msra.gmra.mrb[8].mxu0 %vm486_vm1, %v597_v50 }
 0x23d   :  { %4474 = vmatprep.mubr.msk.bf16.mxu0 %vm5389_vm0, %v5388_v20  ;;  %4471 = vmatpush3.bf16.msra.mxu0 %v5729_v29 }
 0x23e   :  { %4472 = vmatprep.subr.bf16.mxu0 %v5388_v20 }
 0x241   :  { %4473 = vmatpush3.bf16.msra.mxu0 %v5735_v30 }
 0x242   :  { %4486 = vmatprep.subr.bf16.mxu0 %v5388_v20 }
 0x29c   :  { %v527_v52 = vpop.f32.mrb[4].mxu0 }
 0x29d   :  { %v528_v53 = vadd.f32 %v527_v52, %v5696_v51  ;;  %v4450_v54 = vpop.f32.mrb[5].mxu0 }
 0x29e   :  { %v530_v55 = vpop.f32.mrb[6].mxu0 }
 0x29f   :  { %v4451_v56 = vpop.f32.mrb[7].mxu0  ;;  %v534_v57 = vsel %vm533_vm2, %v528_v53, -inf }
 0x2a0   :  { %535 = vmax.xlane.f32.xlu1 %v534_v57 }
 0x30f   :  { %v641_v58 = vpop.f32.mrb[8].mxu0 }
 0x310   :  { %v642_v59 = vadd.f32 %v641_v58, %v5696_v51  ;;  %v4462_v60 = vpop.f32.mrb[9].mxu0 }
 0x311   :  { %v644_v61 = vpop.f32.mrb[10].mxu0 }
 0x312   :  { %v4463_v62 = vpop.f32.mrb[11].mxu0  ;;  %v647_v63 = vsel %vm533_vm2, %v642_v59, -inf }
 0x313   :  { %648 = vmax.xlane.f32.xlu1 %v647_v63 }
 0x32d   :  { %v536_v1 = vpop.xlane.xlu1 %535 }
 0x32e   :  { %v537_v2 = vsub.f32 %v528_v53, %v536_v1 }
 0x330   :  { %v538_v3 = vmul.f32 1.442695, %v537_v2 }
 0x332   :  { %5003 = vpow2.f32 %v538_v3 }
 0x33c   :  { %v5004_v6 = vpop.eup %5003 }
 0x33d   :  { %v540_v7 = vsel %vm533_vm2, %v5004_v6, 0.0 }
 0x33e   :  { %541 = vadd.xlane.f32.xlu0 %v540_v7 }
 0x354   :  { %881 = vrot.lane.b32.xlu0 %v5707_v12, %s5375_s5 }
 0x3a0   :  { %v649_v16 = vpop.xlane.xlu1 %648 }
 0x3a1   :  { %v650_v17 = vsub.f32 %v642_v59, %v649_v16 }
 0x3a3   :  { %v651_v18 = vmul.f32 1.442695, %v650_v17 }
 0x3a5   :  { %5005 = vpow2.f32 %v651_v18 }
 0x3af   :  { %v5006_v19 = vpop.eup %5005 }
 0x3b0   :  { %v653_v21 = vsel %vm533_vm2, %v5006_v19, 0.0 }
 0x3b1   :  { %654 = vadd.xlane.f32.xlu1 %v653_v21 }
 0x3c2   :  { %660 = vrot.lane.b32.xlu1 %v5707_v12, %s5390_s8 }
 0x3c6   :  { %821 = vrot.lane.b32.xlu1 %v5663_v36, %s5375_s5 }
 0x3ca   :  { %819 = vrot.lane.b32.xlu1 %v5671_v39, %s5375_s5 }
 0x3cb   :  { %v542_v24 = vpop.xlane.xlu0 %541 }
 0x3cc   :  { %5007 = vrcp.f32 %v542_v24 }
 0x3cf   :  { %v882_v43 = vpop.permute.xlu0 %881 }
 0x3d0   :  { %v887_v48 = vsel %vm550_vm3, %v882_v43, 0 }
 0x3d6   :  { %v5008_v26 = vpop.eup %5007 }
 0x3d7   :  { %v544_v27 = vmul.f32 %v5008_v26, %v5004_v6 }
 0x3d9   :  { %v545_v28 = vpack.c.bf16 %v544_v27, %v544_v27 }
 0x3db   :  { %4455 = vmatmul.mubr.msk.bf16.vlgmr.msra.gmra.mrb[4].mxu1 %vm533_vm2, %v545_v28 }
 0x3dc   :  { %4466 = vmatprep.mubr.msk.bf16.mxu1 %vm5389_vm0, %v5388_v20 }
 0x43e   :  { %v655_v31 = vpop.xlane.xlu1 %654 }
 0x43f   :  { %5009 = vrcp.f32 %v655_v31  ;;  %v5799_v31 = vld [vmem:[%s6379_s4 + $0x28] sm:$0xff]  }
 0x442   :  { %v661_v32 = vpop.permute.xlu1 %660 }
 0x443   :  { %v666_v34 = vsel %vm550_vm3, %v661_v32, 0 }
 0x444   :  { %4465 = vmatpush3.bf16.msra.mxu1 %v666_v34 }
 0x445   :  { %4478 = vmatprep.subr.bf16.mxu1 %v5388_v20 }
 0x446   :  { %v822_v50 = vpop.permute.xlu1 %821 }
 0x447   :  { %v827_v56 = vsel %vm486_vm1, %v822_v50, 0 }
 0x449   :  { %v5010_v35 = vpop.eup %5009 }
 0x44a   :  { %v657_v38 = vmul.f32 %v5010_v35, %v5006_v19  ;;  %v820_v58 = vpop.permute.xlu1 %819  ;;  %v5784_v19 = vld [vmem:[%s6379_s4 + $0x20] sm:$0xff]  }
 0x44c   :  { %v658_v41 = vpack.c.bf16 %v657_v38, %v657_v38 }
 0x44e   :  { %4467 = vmatmul.mubr.msk.bf16.vlgmr.msra.gmra.mrb[8].mxu1 %vm533_vm2, %v658_v41 }
 0x44f   :  { %4479 = vmatpush3.bf16.msra.mxu1 %v5745_v40  ;;  %4482 = vmatprep.mubr.msk.bf16.mxu1 %vm5389_vm0, %v5388_v20 }
 0x450   :  { %4480 = vmatprep.subr.bf16.mxu1 %v5388_v20 }
 0x453   :  { %4481 = vmatpush3.bf16.msra.mxu1 %v5752_v42 }
 0x454   :  { %4492 = vmatprep.subr.bf16.mxu1 %v5388_v20 }
 0x4ae   :  { %v588_v44 = vpop.f32.mrb[4].mxu1 }
 0x4af   :  { %v594_v45 = vpack.c.bf16 %v588_v44, %v588_v44  ;;  %v4456_v46 = vpop.f32.mrb[5].mxu1 }
 0x4b0   :  { %v591_v47 = vpop.f32.mrb[6].mxu1 }
 0x4b1   :  { %v4457_v49 = vpop.f32.mrb[7].mxu1  ;;  %4483 = vmatmul.mubr.msk.bf16.vlgmr.msra.gmra.mrb[12].mxu1 %vm486_vm1, %v594_v45 }
 0x4b2   :  { %4493 = vmatpush3.bf16.msra.mxu1 %v887_v48  ;;  %4494 = vmatprep.mubr.msk.bf16.mxu1 %vm5389_vm0, %v5388_v20 }
 0x4b3   :  { %4506 = vmatprep.subr.bf16.mxu1 %v5388_v20 }
 0x521   :  { %v702_v52 = vpop.f32.mrb[8].mxu1 }
 0x522   :  { %v708_v53 = vpack.c.bf16 %v702_v52, %v702_v52  ;;  %v4468_v54 = vpop.f32.mrb[9].mxu1 }
 0x523   :  { %v705_v55 = vpop.f32.mrb[10].mxu1 }
 0x524   :  { %v4469_v57 = vpop.f32.mrb[11].mxu1  ;;  %4475 = vmatmul.mubr.msk.bf16.vlgmr.msra.gmra.mrb[12].mxu0 %vm486_vm1, %v708_v53  ;;  %v1153_v55 = vmul.f32 0.17677669, %v5661_v33  ;;  %v5828_v33 = vld [vmem:[%s6379_s4 + $0x30] sm:$0xff]  }
 0x525   :  { %4487 = vmatpush3.bf16.xpose.msra.mxu0 %v827_v56  ;;  %4488 = vmatprep.mubr.msk.bf16.mxu0 %vm5389_vm0, %v5388_v20  ;;  %v5814_v56 = vpack.c.bf16 %v5665_v37, %v5665_v37 }
 0x526   :  { %4498 = vmatprep.subr.bf16.mxu0 %v5388_v20  ;;  %v5818_v57 = vpack.c.bf16 %v1153_v55, %v1153_v55 }
 0x52c   :  { %4489 = vmatmul.mubr.msk.bf16.vlgmr.msra.gmra.mrb[16].mxu0 %vm486_vm1, %v820_v58 }
 0x52d   :  { %4502 = vmatprep.mubr.msk.bf16.mxu0 %vm5389_vm0, %v5388_v20  ;;  %4499 = vmatpush3.bf16.msra.mxu0 %v5784_v19 }
 0x52e   :  { %4500 = vmatprep.subr.bf16.mxu0 %v5388_v20 }
 0x531   :  { %4501 = vmatpush3.bf16.msra.mxu0 %v5799_v31 }
 0x532   :  { %4512 = vmatprep.subr.bf16.mxu0 %v5388_v20 }
 0x584   :  { %v813_v59 = vpop.f32.mrb[12].mxu1 }
 0x585   :  { %v4484_v60 = vpop.f32.mrb[13].mxu1 }
 0x586   :  { %v816_v61 = vpop.f32.mrb[14].mxu1 }
 0x587   :  { %v4485_v62 = vpop.f32.mrb[15].mxu1  ;;  %v5834_v61 = vld [vmem:[%s6379_s4 + $0x38] sm:$0xff]  }
 0x5f7   :  { %v758_v63 = vpop.f32.mrb[12].mxu0 }
 0x5f8   :  { %v5772_v1 = vadd.f32 %v813_v59, %v758_v63  ;;  %v4476_v2 = vpop.f32.mrb[13].mxu0 }
 0x5f9   :  { %v761_v3 = vpop.f32.mrb[14].mxu0 }
 0x5fa   :  { %v4477_v4 = vpop.f32.mrb[15].mxu0 }
 0x5ff   :  { %v863_v5 = vpop.f32.mrb[16].mxu0 }
 0x600   :  { %v864_v6 = vadd.f32 %v863_v5, %v5696_v51  ;;  %v4490_v7 = vpop.f32.mrb[17].mxu0  ;;  %v1160_v5 = vsel %vm486_vm1, %v5814_v56, 0 }
 0x601   :  { %v866_v9 = vpop.f32.mrb[18].mxu0 }
 0x602   :  { %v4491_v10 = vpop.f32.mrb[19].mxu0  ;;  %v869_v11 = vsel %vm533_vm2, %v864_v6, -inf }
 0x603   :  { %870 = vmax.xlane.f32.xlu1 %v869_v11  ;;  %v5862_v10 = vpack.c.bf16 %v5709_v14, %v5709_v14 }
 0x690   :  { %v871_v13 = vpop.xlane.xlu1 %870 }
 0x691   :  { %v872_v15 = vsub.f32 %v864_v6, %v871_v13 }
 0x693   :  { %v873_v16 = vmul.f32 1.442695, %v872_v15 }
 0x695   :  { %5011 = vpow2.f32 %v873_v16 }
 0x69f   :  { %v5012_v17 = vpop.eup %5011 }
 0x6a0   :  { %v875_v18 = vsel %vm533_vm2, %v5012_v17, 0.0 }
 0x6a1   :  { %876 = vadd.xlane.f32.xlu0 %v875_v18 }
 0x6b7   :  { %988 = vrot.lane.b32.xlu0 %v5663_v36, %s5391_s29 }
 0x6bb   :  { %986 = vrot.lane.b32.xlu0 %v5671_v39, %s5391_s29 }
 0x72e   :  { %v877_v21 = vpop.xlane.xlu0 %876 }
 0x72f   :  { %5013 = vrcp.f32 %v877_v21 }
 0x732   :  { %v989_v27 = vpop.permute.xlu0 %988 }
 0x733   :  { %v994_v36 = vsel %vm486_vm1, %v989_v27, 0 }
 0x736   :  { %v987_v39 = vpop.permute.xlu0 %986 }
 0x739   :  { %v5014_v24 = vpop.eup %5013 }
 0x73a   :  { %v879_v26 = vmul.f32 %v5014_v24, %v5012_v17 }
 0x73c   :  { %v880_v28 = vpack.c.bf16 %v879_v26, %v879_v26 }
 0x73e   :  { %4495 = vmatmul.mubr.msk.bf16.vlgmr.msra.gmra.mrb[16].mxu1 %vm533_vm2, %v880_v28 }
 0x73f   :  { %4507 = vmatpush3.bf16.xpose.msra.mxu1 %v994_v36  ;;  %4508 = vmatprep.mubr.msk.bf16.mxu1 %vm5389_vm0, %v5388_v20 }
 0x740   :  { %4518 = vmatprep.subr.bf16.mxu1 %v5388_v20 }
 0x746   :  { %4509 = vmatmul.mubr.msk.bf16.vlgmr.msra.gmra.mrb[20].mxu1 %vm486_vm1, %v987_v39 }
 0x747   :  { %4522 = vmatprep.mubr.msk.bf16.mxu1 %vm5389_vm0, %v5388_v20  ;;  %4519 = vmatpush3.bf16.msra.mxu1 %v5828_v33 }
 0x748   :  { %4520 = vmatprep.subr.bf16.mxu1 %v5388_v20 }
 0x74b   :  { %4521 = vmatpush3.bf16.msra.mxu1 %v5834_v61 }
 0x74c   :  { %4532 = vmatprep.subr.bf16.mxu1 %v5388_v20 }
 0x811   :  { %v923_v32 = vpop.f32.mrb[16].mxu1 }
 0x812   :  { %v929_v34 = vpack.c.bf16 %v923_v32, %v923_v32  ;;  %v4496_v35 = vpop.f32.mrb[17].mxu1 }
 0x813   :  { %v926_v38 = vpop.f32.mrb[18].mxu1 }
 0x814   :  { %v4497_v41 = vpop.f32.mrb[19].mxu1  ;;  %4503 = vmatmul.mubr.msk.bf16.vlgmr.msra.gmra.mrb[20].mxu0 %vm486_vm1, %v929_v34 }
 0x815   :  { %4514 = vmatprep.mubr.msk.bf16.mxu0 %vm5389_vm0, %v5388_v20 }
 0x819   :  { %v1030_v43 = vpop.f32.mrb[20].mxu1 }
 0x81a   :  { %v1031_v44 = vadd.f32 %v1030_v43, %v5696_v51  ;;  %v4510_v45 = vpop.f32.mrb[21].mxu1 }
 0x81b   :  { %v1033_v46 = vpop.f32.mrb[22].mxu1 }
 0x81c   :  { %v4511_v47 = vpop.f32.mrb[23].mxu1  ;;  %v1036_v48 = vsel %vm533_vm2, %v1031_v44, -inf }
 0x81d   :  { %1037 = vmax.xlane.f32.xlu0 %v1036_v48 }
 0x8aa   :  { %v1038_v49 = vpop.xlane.xlu0 %1037 }
 0x8ab   :  { %v1039_v50 = vsub.f32 %v1031_v44, %v1038_v49 }
 0x8ad   :  { %v1040_v52 = vmul.f32 1.442695, %v1039_v50 }
 0x8af   :  { %5015 = vpow2.f32 %v1040_v52 }
 0x8b9   :  { %v5016_v53 = vpop.eup %5015 }
 0x8ba   :  { %v1042_v54 = vsel %vm533_vm2, %v5016_v53, 0.0 }
 0x8bb   :  { %1043 = vadd.xlane.f32.xlu1 %v1042_v54 }
 0x8cc   :  { %1048 = vrot.lane.b32.xlu1 %v5707_v12, %s5391_s29 }
 0x8d0   :  { %1266 = vrot.lane.b32.xlu1 %v5814_v56, %s5390_s8 }
 0x8d4   :  { %1263 = vrot.lane.b32.xlu1 %v5818_v57, %s5390_s8 }
 0x8e7   :  { %v979_v58 = vpop.f32.mrb[20].mxu0 }
 0x8e8   :  { %v5823_v59 = vadd.f32 %v979_v58, %v5772_v1  ;;  %v4504_v60 = vpop.f32.mrb[21].mxu0 }
 0x8e9   :  { %v982_v37 = vpop.f32.mrb[22].mxu0 }
 0x8ea   :  { %v4505_v12 = vpop.f32.mrb[23].mxu0 }
 0x948   :  { %v1044_v62 = vpop.xlane.xlu1 %1043 }
 0x949   :  { %5017 = vrcp.f32 %v1044_v62 }
 0x94c   :  { %v1049_v63 = vpop.permute.xlu1 %1048 }
 0x94d   :  { %v1054_v1 = vsel %vm550_vm3, %v1049_v63, 0 }
 0x94e   :  { %4513 = vmatpush3.bf16.msra.mxu0 %v1054_v1 }
 0x94f   :  { %4526 = vmatprep.subr.bf16.mxu0 %v5388_v20 }
 0x950   :  { %v1267_v6 = vpop.permute.xlu1 %1266 }
 0x951   :  { %v1272_v7 = vsel %vm486_vm1, %v1267_v6, 0 }
 0x953   :  { %v5018_v2 = vpop.eup %5017 }
 0x954   :  { %v1046_v3 = vmul.f32 %v5018_v2, %v5016_v53  ;;  %v1264_v9 = vpop.permute.xlu1 %1263 }
 0x956   :  { %v1047_v4 = vpack.c.bf16 %v1046_v3, %v1046_v3 }
 0x958   :  { %4515 = vmatmul.mubr.msk.bf16.vlgmr.msra.gmra.mrb[24].mxu0 %vm533_vm2, %v1047_v4 }
 0x959   :  { %4527 = vmatpush3.bf16.xpose.msra.mxu0 %v1160_v5  ;;  %4528 = vmatprep.mubr.msk.bf16.mxu0 %vm5389_vm0, %v5388_v20 }
 0x95a   :  { %4538 = vmatprep.subr.bf16.mxu0 %v5388_v20 }
 0x960   :  { %4529 = vmatmul.mubr.msk.bf16.vlgmr.msra.gmra.mrb[28].mxu0 %vm486_vm1, %v5818_v57 }
 0x961   :  { %4539 = vmatpush3.bf16.xpose.msra.mxu0 %v1272_v7  ;;  %4540 = vmatprep.mubr.msk.bf16.mxu0 %vm5389_vm0, %v5388_v20 }
 0x962   :  { %4550 = vmatprep.subr.bf16.mxu0 %v5388_v20 }
 0x968   :  { %4541 = vmatmul.mubr.msk.bf16.vlgmr.msra.gmra.mrb[32].mxu0 %vm486_vm1, %v1264_v9 }
 0x969   :  { %4551 = vmatpush3.bf16.msra.mxu0 %v5729_v29  ;;  %4554 = vmatprep.mubr.msk.bf16.mxu0 %vm5389_vm0, %v5388_v20  ;;  %v1219_v29 = vsel %vm550_vm3, %v5862_v10, 0 }
 0x96a   :  { %4552 = vmatprep.subr.bf16.mxu0 %v5388_v20 }
 0x96d   :  { %4553 = vmatpush3.bf16.msra.mxu0 %v5735_v30 }
 0x96e   :  { %4566 = vmatprep.subr.bf16.mxu0 %v5388_v20 }
 0xa2b   :  { %v1090_v11 = vpop.f32.mrb[24].mxu0 }
 0xa2c   :  { %v1096_v13 = vpack.c.bf16 %v1090_v11, %v1090_v11  ;;  %v4516_v15 = vpop.f32.mrb[25].mxu0 }
 0xa2d   :  { %v1093_v16 = vpop.f32.mrb[26].mxu0 }
 0xa2e   :  { %v4517_v17 = vpop.f32.mrb[27].mxu0  ;;  %4523 = vmatmul.mubr.msk.bf16.vlgmr.msra.gmra.mrb[24].mxu1 %vm486_vm1, %v1096_v13 }
 0xa2f   :  { %4533 = vmatpush3.bf16.msra.mxu1 %v1219_v29  ;;  %4534 = vmatprep.mubr.msk.bf16.mxu1 %vm5389_vm0, %v5388_v20 }
 0xa30   :  { %4544 = vmatprep.subr.bf16.mxu1 %v5388_v20 }
 0xa33   :  { %v1196_v30 = vpop.f32.mrb[28].mxu0 }
 0xa34   :  { %v1197_v14 = vadd.f32 %v1196_v30, %v5696_v51  ;;  %v4530_v18 = vpop.f32.mrb[29].mxu0 }
 0xa35   :  { %v1199_v21 = vpop.f32.mrb[30].mxu0 }
 0xa36   :  { %v4531_v24 = vpop.f32.mrb[31].mxu0  ;;  %v1202_v26 = vsel %vm533_vm2, %v1197_v14, -inf }
 0xa37   :  { %1203 = vmax.xlane.f32.xlu1 %v1202_v26 }
 0xa3b   :  { %v1308_v27 = vpop.f32.mrb[32].mxu0 }
 0xa3c   :  { %v1309_v28 = vadd.f32 %v1308_v27, %v5696_v51  ;;  %v4542_v36 = vpop.f32.mrb[33].mxu0 }
 0xa3d   :  { %v1311_v39 = vpop.f32.mrb[34].mxu0 }
 0xa3e   :  { %v4543_v32 = vpop.f32.mrb[35].mxu0  ;;  %v1314_v34 = vsel %vm533_vm2, %v1309_v28, -inf }
 0xa3f   :  { %1315 = vmax.xlane.f32.xlu0 %v1314_v34 }
 0xa48   :  { %1462 = vrot.lane.b32.xlu1 %v5818_v57, %s5375_s5 }
 0xac4   :  { %v1204_v35 = vpop.xlane.xlu1 %1203 }
 0xac5   :  { %v1205_v38 = vsub.f32 %v1197_v14, %v1204_v35 }
 0xac7   :  { %v1206_v41 = vmul.f32 1.442695, %v1205_v38 }
 0xac8   :  { %v1463_v29 = vpop.permute.xlu1 %1462 }
 0xac9   :  { %5019 = vpow2.f32 %v1206_v41 }
 0xacc   :  { %v1316_v43 = vpop.xlane.xlu0 %1315 }
 0xacd   :  { %v1317_v44 = vsub.f32 %v1309_v28, %v1316_v43 }
 0xacf   :  { %v1318_v45 = vmul.f32 1.442695, %v1317_v44 }
 0xad1   :  { %5021 = vpow2.f32 %v1318_v45 }
 0xad3   :  { %v5020_v46 = vpop.eup %5019 }
 0xad4   :  { %v1208_v47 = vsel %vm533_vm2, %v5020_v46, 0.0 }
 0xad5   :  { %1209 = vadd.xlane.f32.xlu0 %v1208_v47 }
 0xadb   :  { %v5022_v48 = vpop.eup %5021 }
 0xadc   :  { %v1320_v49 = vsel %vm533_vm2, %v5022_v48, 0.0 }
 0xadd   :  { %1321 = vadd.xlane.f32.xlu0 %v1320_v49 }
 0xaf3   :  { %1327 = vrot.lane.b32.xlu0 %v5862_v10, %s5390_s8 }
 0xaf7   :  { %1464 = vrot.lane.b32.xlu0 %v5814_v56, %s5375_s5 }
 0xb01   :  { %v1146_v50 = vpop.f32.mrb[24].mxu1 }
 0xb02   :  { %v5883_v52 = vadd.f32 %v1146_v50, %v5823_v59  ;;  %v4524_v53 = vpop.f32.mrb[25].mxu1 }
 0xb03   :  { %v1149_v54 = vpop.f32.mrb[26].mxu1 }
 0xb04   :  { %v4525_v55 = vpop.f32.mrb[27].mxu1 }
 0xb62   :  { %v1210_v58 = vpop.xlane.xlu0 %1209 }
 0xb63   :  { %5023 = vrcp.f32 %v1210_v58 }
 0xb6a   :  { %v1322_v60 = vpop.xlane.xlu0 %1321 }
 0xb6b   :  { %5025 = vrcp.f32 %v1322_v60 }
 0xb6d   :  { %v5024_v37 = vpop.eup %5023 }
 0xb6e   :  { %v1212_v12 = vmul.f32 %v5024_v37, %v5020_v46  ;;  %v1328_v62 = vpop.permute.xlu0 %1327 }
 0xb6f   :  { %v1333_v1 = vsel %vm550_vm3, %v1328_v62, 0 }
 0xb70   :  { %v1213_v63 = vpack.c.bf16 %v1212_v12, %v1212_v12 }
 0xb72   :  { %4535 = vmatmul.mubr.msk.bf16.vlgmr.msra.gmra.mrb[28].mxu1 %vm533_vm2, %v1213_v63 }
 0xb73   :  { %4545 = vmatpush3.bf16.msra.mxu1 %v1333_v1  ;;  %4546 = vmatprep.mubr.msk.bf16.mxu1 %vm5389_vm0, %v5388_v20 }
 0xb74   :  { %4558 = vmatprep.subr.bf16.mxu1 %v5388_v20 }
 0xb75   :  { %v5026_v59 = vpop.eup %5025 }
 0xb76   :  { %v1324_v2 = vmul.f32 %v5026_v59, %v5022_v48 }
 0xb78   :  { %v1325_v3 = vpack.c.bf16 %v1324_v2, %v1324_v2 }
 0xb7a   :  { %4547 = vmatmul.mubr.msk.bf16.vlgmr.msra.gmra.mrb[32].mxu1 %vm533_vm2, %v1325_v3 }
 0xb7b   :  { %4559 = vmatpush3.bf16.msra.mxu1 %v5745_v40  ;;  %4562 = vmatprep.mubr.msk.bf16.mxu1 %vm5389_vm0, %v5388_v20  ;;  %v1465_v40 = vpop.permute.xlu0 %1464 }
 0xb7c   :  { %4560 = vmatprep.subr.bf16.mxu1 %v5388_v20  ;;  %v1470_v17 = vsel %vm486_vm1, %v1465_v40, 0 }
 0xb7f   :  { %4561 = vmatpush3.bf16.msra.mxu1 %v5752_v42 }
 0xb80   :  { %4572 = vmatprep.subr.bf16.mxu1 %v5388_v20 }
 0xc45   :  { %v1255_v4 = vpop.f32.mrb[28].mxu1 }
 0xc46   :  { %v1261_v5 = vpack.c.bf16 %v1255_v4, %v1255_v4  ;;  %v4536_v6 = vpop.f32.mrb[29].mxu1 }
 0xc47   :  { %v1258_v7 = vpop.f32.mrb[30].mxu1 }
 0xc48   :  { %v4537_v9 = vpop.f32.mrb[31].mxu1  ;;  %4563 = vmatmul.mubr.msk.bf16.vlgmr.msra.gmra.mrb[36].mxu1 %vm486_vm1, %v1261_v5 }
 0xc49   :  { %4574 = vmatprep.mubr.msk.bf16.mxu1 %vm5389_vm0, %v5388_v20 }
 0xc4d   :  { %v1369_v11 = vpop.f32.mrb[32].mxu1 }
 0xc4e   :  { %v1375_v13 = vpack.c.bf16 %v1369_v11, %v1369_v11  ;;  %v4548_v15 = vpop.f32.mrb[33].mxu1 }
 0xc4f   :  { %v1372_v16 = vpop.f32.mrb[34].mxu1 }
 0xc50   :  { %v4549_v42 = vpop.f32.mrb[35].mxu1  ;;  %4555 = vmatmul.mubr.msk.bf16.vlgmr.msra.gmra.mrb[36].mxu0 %vm486_vm1, %v1375_v13 }
 0xc51   :  { %4567 = vmatpush3.bf16.xpose.msra.mxu0 %v1470_v17  ;;  %4568 = vmatprep.mubr.msk.bf16.mxu0 %vm5389_vm0, %v5388_v20 }
 0xc52   :  { %4578 = vmatprep.subr.bf16.mxu0 %v5388_v20 }
 0xc58   :  { %4569 = vmatmul.mubr.msk.bf16.vlgmr.msra.gmra.mrb[40].mxu0 %vm486_vm1, %v1463_v29 }
 0xc59   :  { %4579 = vmatpush3.bf16.msra.mxu0 %v5784_v19  ;;  %4582 = vmatprep.mubr.msk.bf16.mxu0 %vm5389_vm0, %v5388_v20 }
 0xc5a   :  { %4580 = vmatprep.subr.bf16.mxu0 %v5388_v20 }
 0xc5d   :  { %4581 = vmatpush3.bf16.msra.mxu0 %v5799_v31 }
 0xc5e   :  { %4592 = vmatprep.subr.bf16.mxu0 %v5388_v20 }
 0xd1b   :  { %v1456_v30 = vpop.f32.mrb[36].mxu1 }
 0xd1c   :  { %v4564_v14 = vpop.f32.mrb[37].mxu1 }
 0xd1d   :  { %v1459_v18 = vpop.f32.mrb[38].mxu1 }
 0xd1e   :  { %v4565_v21 = vpop.f32.mrb[39].mxu1 }
 0xd23   :  { %v1413_v24 = vpop.f32.mrb[36].mxu0 }
 0xd24   :  { %v5912_v26 = vadd.f32 %v1456_v30, %v1413_v24  ;;  %v4556_v27 = vpop.f32.mrb[37].mxu0 }
 0xd25   :  { %v1416_v28 = vpop.f32.mrb[38].mxu0 }
 0xd26   :  { %v4557_v36 = vpop.f32.mrb[39].mxu0 }
 0xd2b   :  { %v1506_v19 = vpop.f32.mrb[40].mxu0 }
 0xd2c   :  { %v1507_v39 = vadd.f32 %v1506_v19, %v5696_v51  ;;  %v4570_v32 = vpop.f32.mrb[41].mxu0 }
 0xd2d   :  { %v1509_v34 = vpop.f32.mrb[42].mxu0 }
 0xd2e   :  { %v4571_v35 = vpop.f32.mrb[43].mxu0  ;;  %v1512_v31 = vsel %vm533_vm2, %v1507_v39, -inf }
 0xd2f   :  { %1513 = vmax.xlane.f32.xlu0 %v1512_v31 }
 0xd45   :  { %1524 = vrot.lane.b32.xlu0 %v5862_v10, %s5375_s5 }
 0xd49   :  { %1617 = vrot.lane.b32.xlu0 %v5818_v57, %s5391_s29 }
 0xdbc   :  { %v1514_v38 = vpop.xlane.xlu0 %1513 }
 0xdbd   :  { %v1515_v41 = vsub.f32 %v1507_v39, %v1514_v38 }
 0xdbf   :  { %v1516_v43 = vmul.f32 1.442695, %v1515_v41 }
 0xdc0   :  { %v1525_v44 = vpop.permute.xlu0 %1524 }
 0xdc1   :  { %5027 = vpow2.f32 %v1516_v43  ;;  %v1530_v45 = vsel %vm550_vm3, %v1525_v44, 0  ;;  %v5088_v43 = vld [vmem:[%s6397_s19 + $0x8] sm:$0xff] }
 0xdc2   :  { %4573 = vmatpush3.bf16.msra.mxu1 %v1530_v45  ;;  %v4931_v45 = vld [vmem:[%s6381_s6] sm:$0xff]  }
 0xdc3   :  { %4586 = vmatprep.subr.bf16.mxu1 %v5388_v20 }
 0xdc4   :  { %v1618_v55 = vpop.permute.xlu0 %1617 }
 0xdcb   :  { %v5028_v46 = vpop.eup %5027 }
 0xdcc   :  { %v1518_v47 = vsel %vm533_vm2, %v5028_v46, 0.0 }
 0xdcd   :  { %1519 = vadd.xlane.f32.xlu1 %v1518_v47 }
 0xdde   :  { %1619 = vrot.lane.b32.xlu1 %v5814_v56, %s5391_s29 }
 0xe5a   :  { %v1520_v48 = vpop.xlane.xlu1 %1519 }
 0xe5b   :  { %5029 = vrcp.f32 %v1520_v48 }
 0xe5e   :  { %v1620_v50 = vpop.permute.xlu1 %1619 }
 0xe5f   :  { %v1625_v54 = vsel %vm486_vm1, %v1620_v50, 0  ;;  %v4933_v50 = vld [vmem:[%s6381_s6 + $0x10] sm:$0xff]  }
 0xe65   :  { %v5030_v57 = vpop.eup %5029 }
 0xe66   :  { %v1522_v49 = vmul.f32 %v5030_v57, %v5028_v46  ;;  %v4932_v46 = vld [vmem:[%s6381_s6 + $0x8] sm:$0xff]  }
 0xe68   :  { %v1523_v53 = vpack.c.bf16 %v1522_v49, %v1522_v49 }
 0xe6a   :  { %4575 = vmatmul.mubr.msk.bf16.vlgmr.msra.gmra.mrb[40].mxu1 %vm533_vm2, %v1523_v53  ;;  %v4934_v53 = vld [vmem:[%s6381_s6 + $0x18] sm:$0xff]  }
 0xe6b   :  { %4587 = vmatpush3.bf16.xpose.msra.mxu1 %v1625_v54  ;;  %4588 = vmatprep.mubr.msk.bf16.mxu1 %vm5389_vm0, %v5388_v20  ;;  %v4935_v54 = vld [vmem:[%s6381_s6 + $0x20] sm:$0xff]  }
 0xe6c   :  { %4598 = vmatprep.subr.bf16.mxu1 %v5388_v20 }
 0xe72   :  { %4589 = vmatmul.mubr.msk.bf16.vlgmr.msra.gmra.mrb[44].mxu1 %vm486_vm1, %v1618_v55  ;;  %v4936_v55 = vld [vmem:[%s6381_s6 + $0x28] sm:$0xff]  }
 0xe73   :  { %4599 = vmatpush3.bf16.msra.mxu1 %v5828_v33  ;;  %4602 = vmatprep.mubr.msk.bf16.mxu1 %vm5389_vm0, %v5388_v20 }
 0xe74   :  { %4600 = vmatprep.subr.bf16.mxu1 %v5388_v20 }
 0xe77   :  { %4601 = vmatpush3.bf16.msra.mxu1 %v5834_v61 }
 0xe78   :  { %4626 = vmatprep.subr.bf16.mxu1 %v5388_v20 }
 0xf3d   :  { %v1566_v56 = vpop.f32.mrb[40].mxu1 }
 0xf3e   :  { %v1572_v58 = vpack.c.bf16 %v1566_v56, %v1566_v56  ;;  %v4576_v60 = vpop.f32.mrb[41].mxu1  ;;  %v4937_v56 = vld [vmem:[%s6381_s6 + $0x30] sm:$0xff]  }
 0xf3f   :  { %v1569_v37 = vpop.f32.mrb[42].mxu1  ;;  %v4939_v60 = vld [vmem:[#allocation11] sm:$0xff]  }
 0xf40   :  { %v4577_v12 = vpop.f32.mrb[43].mxu1  ;;  %4583 = vmatmul.mubr.msk.bf16.vlgmr.msra.gmra.mrb[44].mxu0 %vm486_vm1, %v1572_v58  ;;  %v4938_v58 = vld [vmem:[%s6381_s6 + $0x38] sm:$0xff]  }
 0xf41   :  { %4594 = vmatprep.mubr.msk.bf16.mxu0 %vm5389_vm0, %v5388_v20  ;;  %v4940_v37 = vld [vmem:[#allocation11 + $0x8] sm:$0xff]   ;;  %v4941_v12 = vld [vmem:[#allocation11 + $0x10] sm:$0xff]  }
 0xf45   :  { %v1661_v33 = vpop.f32.mrb[44].mxu1 }
 0xf46   :  { %v1662_v62 = vadd.f32 %v1661_v33, %v5696_v51  ;;  %v4590_v63 = vpop.f32.mrb[45].mxu1  ;;  %v4124_v51 = vld [vmem:[#allocation8] ss:$0 sm:$0xff] }
 0xf47   :  { %v1664_v1 = vpop.f32.mrb[46].mxu1  ;;  %v1779_v9 = vadd.f32 %v4124_v51, %v5883_v52  ;;  %v4942_v33 = vld [vmem:[#allocation11 + $0x18] sm:$0xff]   ;;  %v4944_v63 = vld [vmem:[#allocation11 + $0x28] sm:$0xff]  }
 0xf48   :  { %v4591_v59 = vpop.f32.mrb[47].mxu1  ;;  %v1667_v61 = vsel %vm533_vm2, %v1662_v62, -inf }
 0xf49   :  { %1668 = vmax.xlane.f32.xlu0 %v1667_v61 }
 0xf5f   :  { %1679 = vrot.lane.b32.xlu0 %v5862_v10, %s5391_s29  ;;  %v5087_v10 = vld [vmem:[%s6397_s19] sm:$0xff] }
 0xf60   :  { %v1781_v11 = vadd.f32 %v5087_v10, %v1779_v9  ;;  %v4126_v10 = vld [vmem:[#allocation16] ss:$0 sm:$0xff] }
 0xfd6   :  { %v1669_v2 = vpop.xlane.xlu0 %1668 }
 0xfd7   :  { %v1670_v3 = vsub.f32 %v1662_v62, %v1669_v2  ;;  %v4943_v62 = vld [vmem:[#allocation11 + $0x20] sm:$0xff]  }
 0xfd9   :  { %v1671_v4 = vmul.f32 1.442695, %v1670_v3 }
 0xfda   :  { %v1680_v5 = vpop.permute.xlu0 %1679 }
 0xfdb   :  { %5031 = vpow2.f32 %v1671_v4  ;;  %v1685_v6 = vsel %vm550_vm3, %v1680_v5, 0 }
 0xfdc   :  { %4593 = vmatpush3.bf16.msra.mxu0 %v1685_v6 }
 0xfdd   :  { %4606 = vmatprep.subr.bf16.mxu0 %v5388_v20 }
 0xfe5   :  { %v5032_v7 = vpop.eup %5031 }
 0xfe6   :  { %v1673_v40 = vsel %vm533_vm2, %v5032_v7, 0.0 }
 0xfe7   :  { %1674 = vadd.xlane.f32.xlu1 %v1673_v40 }
 0xfeb   :  { %1785 = vadd.xlane.f32.xlu1 %v1781_v11 }
0x1013   :  { %v1610_v13 = vpop.f32.mrb[44].mxu0 }
0x1014   :  { %v1616_v15 = vadd.f32 %v1610_v13, %v5912_v26  ;;  %v4584_v16 = vpop.f32.mrb[45].mxu0 }
0x1015   :  { %v1613_v17 = vpop.f32.mrb[46].mxu0 }
0x1016   :  { %v4585_v42 = vpop.f32.mrb[47].mxu0  ;;  %v4945_v17 = vld [vmem:[#allocation11 + $0x30] sm:$0xff]  }
0x1017   :  { %v4946_v42 = vld [vmem:[#allocation11 + $0x38] sm:$0xff]  }
0x1074   :  { %v1675_v29 = vpop.xlane.xlu1 %1674 }
0x1075   :  { %5033 = vrcp.f32 %v1675_v29  ;;  %v4127_v29 = vld [vmem:[#allocation10] ss:$0 sm:$0xff] }
0x1078   :  { %v1786_v30 = vpop.xlane.xlu1 %1785 }
0x1079   :  { %v1790_v14 = vmul.f32 0.0078125, %v1786_v30 }
0x107b   :  { %v5952_v52 = vsub.f32 %v1781_v11, %v1790_v14 }
0x107d   :  { %v1794_v18 = vmul.f32 %v5952_v52, %v5952_v52 }
0x107f   :  { %v5034_v21 = vpop.eup %5033  ;;  %1796 = vadd.xlane.f32.xlu0 %v1794_v18 }
0x1080   :  { %v1677_v24 = vmul.f32 %v5034_v21, %v5032_v7 }
0x1082   :  { %v1678_v27 = vpack.c.bf16 %v1677_v24, %v1677_v24 }
0x1084   :  { %4595 = vmatmul.mubr.msk.bf16.vlgmr.msra.gmra.mrb[48].mxu0 %vm533_vm2, %v1678_v27 }
0x1085   :  { %4622 = vmatprep.mubr.msk.bf16.mxu0 %vm5389_vm0, %v5388_v20  ;;  %4607 = vmatpush3.bf16.msra.mxu0 %v4931_v45  ;;  %v4953_v45 = vld [vmem:[#allocation5 + $0xdc] ss:$12 sps:$4 sm:$0xff]  }
0x1086   :  { %4608 = vmatprep.subr.bf16.mxu0 %v5388_v20 }
0x1089   :  { %4609 = vmatpush3.bf16.msra.mxu0 %v4932_v46  ;;  %v4951_v46 = vld [vmem:[#allocation5 + $0xd8] ss:$12 sps:$4 sm:$0xff]  }
0x108a   :  { %4610 = vmatprep.subr.bf16.mxu0 %v5388_v20 }
0x108d   :  { %4611 = vmatpush3.bf16.msra.mxu0 %v4933_v50 }
0x108e   :  { %4612 = vmatprep.subr.bf16.mxu0 %v5388_v20 }
0x1091   :  { %4613 = vmatpush3.bf16.msra.mxu0 %v4934_v53 }
0x1092   :  { %4614 = vmatprep.subr.bf16.mxu0 %v5388_v20 }
0x1095   :  { %4615 = vmatpush3.bf16.msra.mxu0 %v4935_v54 }
0x1096   :  { %4616 = vmatprep.subr.bf16.mxu0 %v5388_v20 }
0x1099   :  { %4617 = vmatpush3.bf16.msra.mxu0 %v4936_v55 }
0x109a   :  { %4618 = vmatprep.subr.bf16.mxu0 %v5388_v20 }
0x109d   :  { %4619 = vmatpush3.bf16.msra.mxu0 %v4937_v56  ;;  %v4954_v56 = vld [vmem:[#allocation5 + $0xe0] ss:$12 sps:$4 sm:$0xff]  }
0x109e   :  { %4620 = vmatprep.subr.bf16.mxu0 %v5388_v20 }
0x10a1   :  { %4621 = vmatpush3.bf16.msra.mxu0 %v4938_v58  ;;  %v4957_v58 = vld [vmem:[#allocation5 + $0xf4] ss:$12 sps:$4 sm:$0xff]  }
0x110c   :  { %v1797_v1 = vpop.xlane.xlu0 %1796 }
0x110d   :  { %v1800_v59 = vmul.f32 0.0078125, %v1797_v1  ;;  %v4963_v1 = vld [vmem:[#allocation5 + $0x120] ss:$12 sps:$4 sm:$0xff]  }
0x110f   :  { %v1802_v61 = vadd.f32 1e-05, %v1800_v59  ;;  %v4966_v59 = vld [vmem:[#allocation5 + $0x128] ss:$12 sps:$4 sm:$0xff]  }
0x1111   :  { %5035 = vrsqrt.f32 %v1802_v61  ;;  %v4969_v61 = vld [vmem:[#allocation5 + $0x13c] ss:$12 sps:$4 sm:$0xff]  }
0x111b   :  { %v5036_v5 = vpop.eup %5035 }
0x111c   :  { %v1806_v6 = vmul.f32 %v5036_v5, %v5952_v52  ;;  %v4971_v5 = vld [vmem:[#allocation5 + $0x150] ss:$12 sps:$4 sm:$0xff]  }
0x1157   :  { %v1721_v26 = vpop.f32.mrb[48].mxu0 }
0x1158   :  { %v1727_v28 = vpack.c.bf16 %v1721_v26, %v1721_v26  ;;  %v4596_v36 = vpop.f32.mrb[49].mxu0 }
0x1159   :  { %v1724_v19 = vpop.f32.mrb[50].mxu0 }
0x115a   :  { %v4597_v39 = vpop.f32.mrb[51].mxu0  ;;  %4603 = vmatmul.mubr.msk.bf16.vlgmr.msra.gmra.mrb[48].mxu1 %vm486_vm1, %v1727_v28 }
0x115b   :  { %4642 = vmatprep.mubr.msk.bf16.mxu1 %vm5389_vm0, %v5388_v20  ;;  %4627 = vmatpush3.bf16.msra.mxu1 %v4939_v60  ;;  %v4955_v60 = vld [vmem:[#allocation5 + $0xf0] ss:$12 sps:$4 sm:$0xff]  }
0x115c   :  { %4628 = vmatprep.subr.bf16.mxu1 %v5388_v20 }
0x115f   :  { %4629 = vmatpush3.bf16.msra.mxu1 %v4940_v37  ;;  %v4958_v37 = vld [vmem:[#allocation5 + $0xf8] ss:$12 sps:$4 sm:$0xff]  }
0x1160   :  { %4630 = vmatprep.subr.bf16.mxu1 %v5388_v20 }
0x1163   :  { %4631 = vmatpush3.bf16.msra.mxu1 %v4941_v12  ;;  %v4961_v12 = vld [vmem:[#allocation5 + $0x10c] ss:$12 sps:$4 sm:$0xff]  }
0x1164   :  { %4632 = vmatprep.subr.bf16.mxu1 %v5388_v20 }
0x1167   :  { %4633 = vmatpush3.bf16.msra.mxu1 %v4942_v33  ;;  %v4959_v33 = vld [vmem:[#allocation5 + $0x108] ss:$12 sps:$4 sm:$0xff]  }
0x1168   :  { %4634 = vmatprep.subr.bf16.mxu1 %v5388_v20 }
0x116b   :  { %4635 = vmatpush3.bf16.msra.mxu1 %v4943_v62  ;;  %v4962_v62 = vld [vmem:[#allocation5 + $0x110] ss:$12 sps:$4 sm:$0xff]  }
0x116c   :  { %4636 = vmatprep.subr.bf16.mxu1 %v5388_v20 }
0x116f   :  { %4637 = vmatpush3.bf16.msra.mxu1 %v4944_v63  ;;  %v4965_v63 = vld [vmem:[#allocation5 + $0x124] ss:$12 sps:$4 sm:$0xff]  }
0x1170   :  { %4638 = vmatprep.subr.bf16.mxu1 %v5388_v20 }
0x1173   :  { %4639 = vmatpush3.bf16.msra.mxu1 %v4945_v17 }
0x1174   :  { %4640 = vmatprep.subr.bf16.mxu1 %v5388_v20 }
0x1177   :  { %4641 = vmatpush3.bf16.msra.mxu1 %v4946_v42 }
0x1178   :  { %4646 = vmatprep.subr.bf16.mxu1 %v5388_v20 }
0x122d   :  { %v1765_v32 = vpop.f32.mrb[48].mxu1 }
0x122e   :  { %v1771_v34 = vadd.f32 %v1765_v32, %v1616_v15  ;;  %v4604_v35 = vpop.f32.mrb[49].mxu1 }
0x122f   :  { %v1768_v31 = vpop.f32.mrb[50].mxu1 }
0x1230   :  { %v1780_v38 = vadd.f32 %v4124_v51, %v1771_v34  ;;  %v4605_v41 = vpop.f32.mrb[51].mxu1  ;;  %v4125_v51 = vld [vmem:[#allocation14] ss:$0 sm:$0xff] }
0x1231   :  { %v1814_v40 = vmul.f32 %v4125_v51, %v1806_v6  ;;  %v4947_v41 = vld [vmem:[#allocation5 + $0xc0] ss:$12 sps:$4 sm:$0xff]   ;;  %v4974_v6 = vld [vmem:[#allocation5 + $0x158] ss:$12 sps:$4 sm:$0xff]  }
0x1232   :  { %v1782_v44 = vadd.f32 %v5088_v43, %v1780_v38  ;;  %v4949_v43 = vld [vmem:[#allocation5 + $0xc4] ss:$12 sps:$4 sm:$0xff]  }
0x1233   :  { %v1822_v13 = vadd.f32 %v4126_v10, %v1814_v40  ;;  %2274 = vmatprep.subr.bf16.mxu0 %v4949_v43 }
0x1234   :  { %1787 = vadd.xlane.f32.xlu1 %v1782_v44 }
0x12c1   :  { %v1788_v47 = vpop.xlane.xlu1 %1787 }
0x12c2   :  { %v1791_v48 = vmul.f32 0.0078125, %v1788_v47 }
0x12c4   :  { %v1793_v57 = vsub.f32 %v1782_v44, %v1791_v48  ;;  %v4950_v44 = vld [vmem:[#allocation5 + $0xc8] ss:$12 sps:$4 sm:$0xff]  }
0x12c6   :  { %v1795_v49 = vmul.f32 %v1793_v57, %v1793_v57 }
0x12c8   :  { %1798 = vadd.xlane.f32.xlu1 %v1795_v49 }
0x1355   :  { %v1799_v2 = vpop.xlane.xlu1 %1798 }
0x1356   :  { %v1801_v3 = vmul.f32 0.0078125, %v1799_v2  ;;  %v4967_v2 = vld [vmem:[#allocation5 + $0x138] ss:$12 sps:$4 sm:$0xff]  }
0x1358   :  { %v1803_v4 = vadd.f32 1e-05, %v1801_v3  ;;  %v4970_v3 = vld [vmem:[#allocation5 + $0x140] ss:$12 sps:$4 sm:$0xff]  }
0x135a   :  { %5037 = vrsqrt.f32 %v1803_v4  ;;  %v4973_v4 = vld [vmem:[#allocation5 + $0x154] ss:$12 sps:$4 sm:$0xff]  }
0x1364   :  { %v5038_v7 = vpop.eup %5037 }
0x1365   :  { %v1807_v9 = vmul.f32 %v5038_v7, %v1793_v57  ;;  %v4975_v7 = vld [vmem:[#allocation5 + $0x168] ss:$12 sps:$4 sm:$0xff]  }
0x1367   :  { %v1815_v11 = vmul.f32 %v4125_v51, %v1807_v9  ;;  %v4977_v51 = vld [vmem:[#allocation5 + $0x16c] ss:$12 sps:$4 sm:$0xff]   ;;  %v4978_v9 = vld [vmem:[#allocation5 + $0x170] ss:$12 sps:$4 sm:$0xff]  }
0x1369   :  { %v1823_v15 = vadd.f32 %v4126_v10, %v1815_v11 }
0x136b   :  { %v1824_v16 = vpack.c.bf16 %v1823_v15, %v1822_v13 }
0x136d   :  { %4623 = vmatmul.mubr.bf16.vlgmr.msra.gmra.mrb[52].mxu0 %v1824_v16 }
0x136e   :  { %2306 = vmatprep.mubr.bf16.mxu0 %v5387_v0  ;;  %v4136_v0 = vld [vmem:[#allocation13] ss:$0 sm:$0xff]  ;;  %2275 = vmatpush1.bf16.msra.mxu0 %v4947_v41 }
0x136f   :  { %2276 = vmatprep.subr.bf16.mxu0 %v4953_v45 }
0x1372   :  { %2277 = vmatpush1.bf16.msra.mxu0 %v4951_v46 }
0x1373   :  { %2278 = vmatprep.subr.bf16.mxu0 %v4957_v58  ;;  %v6069_v58 = vld [vmem:[#allocation2] sm:$0xff] }
0x1376   :  { %2279 = vmatpush1.bf16.msra.mxu0 %v4955_v60 }
0x1377   :  { %2280 = vmatprep.subr.bf16.mxu0 %v4961_v12 }
0x137a   :  { %2281 = vmatpush1.bf16.msra.mxu0 %v4959_v33 }
0x137b   :  { %2282 = vmatprep.subr.bf16.mxu0 %v4965_v63 }
0x137e   :  { %2283 = vmatpush1.bf16.msra.mxu0 %v4963_v1 }
0x137f   :  { %2284 = vmatprep.subr.bf16.mxu0 %v4969_v61 }
0x1382   :  { %2285 = vmatpush1.bf16.msra.mxu0 %v4967_v2 }
0x1383   :  { %2286 = vmatprep.subr.bf16.mxu0 %v4973_v4 }
0x1386   :  { %2287 = vmatpush1.bf16.msra.mxu0 %v4971_v5 }
0x1387   :  { %2288 = vmatprep.subr.bf16.mxu0 %v4977_v51 }
0x138a   :  { %2289 = vmatpush1.bf16.msra.mxu0 %v4975_v7 }
0x138b   :  { %4666 = vmatprep.subr.bf16.mxu0 %v5388_v20 }
0x1440   :  { %v1930_v30 = vpop.f32.mrb[52].mxu0 }
0x1441   :  { %v1931_v14 = vadd.f32 %v4127_v29, %v1930_v30  ;;  %v4624_v52 = vpop.f32.mrb[53].mxu0 }
0x1442   :  { %v1933_v18 = vpop.f32.mrb[54].mxu0 }
0x1443   :  { %v1934_v21 = vadd.f32 %v4127_v29, %v1933_v18  ;;  %v4625_v24 = vpop.f32.mrb[55].mxu0  ;;  %v1937_v27 = vmax.f32 %v1931_v14, 0.0  ;;  %v4145_v29 = vld [vmem:[#allocation17] ss:$0 sm:$0xff]  ;;  %v4146_v18 = vld [vmem:[#allocation19] ss:$0 sm:$0xff] }
0x1445   :  { %v1938_v26 = vmax.f32 %v1934_v21, 0.0 }
0x1447   :  { %v1939_v28 = vpack.c.bf16 %v1938_v26, %v1937_v27 }
0x1449   :  { %4643 = vmatmul.mubr.bf16.vlgmr.msra.gmra.mrb[52].mxu1 %v1939_v28  ;;  %v2129_v28 = vld [vmem:[#allocation7 + $0x3] sm:$0x7] }
0x144a   :  { %4662 = vmatprep.mubr.msk.bf16.mxu1 %vm5389_vm0, %v5388_v20  ;;  %4647 = vmatpush3.bf16.msra.mxu1 %v4950_v44 }
0x144b   :  { %4648 = vmatprep.subr.bf16.mxu1 %v5388_v20 }
0x144e   :  { %4649 = vmatpush3.bf16.msra.mxu1 %v4954_v56 }
0x144f   :  { %4650 = vmatprep.subr.bf16.mxu1 %v5388_v20 }
0x1452   :  { %4651 = vmatpush3.bf16.msra.mxu1 %v4958_v37 }
0x1453   :  { %4652 = vmatprep.subr.bf16.mxu1 %v5388_v20 }
0x1456   :  { %4653 = vmatpush3.bf16.msra.mxu1 %v4962_v62 }
0x1457   :  { %4654 = vmatprep.subr.bf16.mxu1 %v5388_v20 }
0x145a   :  { %4655 = vmatpush3.bf16.msra.mxu1 %v4966_v59 }
0x145b   :  { %4656 = vmatprep.subr.bf16.mxu1 %v5388_v20 }
0x145e   :  { %4657 = vmatpush3.bf16.msra.mxu1 %v4970_v3 }
0x145f   :  { %4658 = vmatprep.subr.bf16.mxu1 %v5388_v20 }
0x1462   :  { %4659 = vmatpush3.bf16.msra.mxu1 %v4974_v6 }
0x1463   :  { %4660 = vmatprep.subr.bf16.mxu1 %v5388_v20 }
0x1466   :  { %4661 = vmatpush3.bf16.msra.mxu1 %v4978_v9 }
0x1467   :  { %4672 = vmatprep.subr.bf16.mxu1 %v5388_v20 }
0x151c   :  { %v2045_v36 = vpop.f32.mrb[52].mxu1 }
0x151d   :  { %v2046_v19 = vadd.f32 %v4136_v0, %v2045_v36  ;;  %v4644_v39 = vpop.f32.mrb[53].mxu1  ;;  %v2142_v36 = vrot.slane %v2129_v28, %v250_v8 }
0x151e   :  { %v2048_v32 = vpop.f32.mrb[54].mxu1 }
0x151f   :  { %v2049_v34 = vadd.f32 %v4136_v0, %v2048_v32  ;;  %v4645_v35 = vpop.f32.mrb[55].mxu1  ;;  %v2052_v31 = vadd.f32 %v2046_v19, %v1822_v13  ;;  %v2134_v0 = vrot.slane %v2129_v28, %v242_v23  ;;  %v2138_v19 = vrot.slane %v2129_v28, %v246_v25  ;;  %v6105_v28 = vld [vmem:[%s6379_s4 + $0x40] sm:$0xff]  }
0x1521   :  { %2056 = vadd.xlane.f32.xlu1 %v2052_v31  ;;  %v2053_v38 = vadd.f32 %v2049_v34, %v1823_v15 }
0x1525   :  { %2058 = vadd.xlane.f32.xlu1 %v2053_v38 }
0x15ae   :  { %v2057_v47 = vpop.xlane.xlu1 %2056 }
0x15af   :  { %v2060_v48 = vmul.f32 0.0078125, %v2057_v47 }
0x15b1   :  { %v6009_v57 = vsub.f32 %v2052_v31, %v2060_v48 }
0x15b2   :  { %v2059_v49 = vpop.xlane.xlu1 %2058 }
0x15b3   :  { %v2061_v50 = vmul.f32 0.0078125, %v2059_v49  ;;  %v2064_v53 = vmul.f32 %v6009_v57, %v6009_v57 }
0x15b5   :  { %v2063_v54 = vsub.f32 %v2053_v38, %v2061_v50  ;;  %2066 = vadd.xlane.f32.xlu1 %v2064_v53 }
0x15b7   :  { %v2065_v55 = vmul.f32 %v2063_v54, %v2063_v54 }
0x15b9   :  { %2068 = vadd.xlane.f32.xlu1 %v2065_v55 }
0x1642   :  { %v2067_v40 = vpop.xlane.xlu1 %2066 }
0x1643   :  { %v2070_v10 = vmul.f32 0.0078125, %v2067_v40 }
0x1645   :  { %v2072_v11 = vadd.f32 1e-05, %v2070_v10 }
0x1646   :  { %v2069_v13 = vpop.xlane.xlu1 %2068 }
0x1647   :  { %5039 = vrsqrt.f32 %v2072_v11  ;;  %v2071_v15 = vmul.f32 0.0078125, %v2069_v13 }
0x1649   :  { %v2073_v16 = vadd.f32 1e-05, %v2071_v15 }
0x164b   :  { %5041 = vrsqrt.f32 %v2073_v16 }
0x1651   :  { %v5040_v17 = vpop.eup %5039 }
0x1652   :  { %v2076_v42 = vmul.f32 %v5040_v17, %v6009_v57 }
0x1654   :  { %v2084_v52 = vmul.f32 %v4145_v29, %v2076_v42 }
0x1655   :  { %v5042_v30 = vpop.eup %5041 }
0x1656   :  { %v2077_v14 = vmul.f32 %v5042_v30, %v2063_v54  ;;  %v6022_v24 = vadd.f32 %v4146_v18, %v2084_v52  ;;  %v6095_v30 = vld [vmem:[%s6379_s4 + $0x58] sm:$0xff]  }
0x1658   :  { %v2085_v21 = vmul.f32 %v4145_v29, %v2077_v14  ;;  %v6089_v29 = vld [vmem:[%s6379_s4 + $0x50] sm:$0xff]  }
0x165a   :  { %v6024_v27 = vadd.f32 %v4146_v18, %v2085_v21 }
0x165c   :  { %v2094_v26 = vpack.c.bf16 %v6024_v27, %v6022_v24 }
0x165e   :  { %2307 = vmatmul.mubr.bf16.vlgmr.msra.gmra.mrb[56].mxu0 %v2094_v26  ;;  %4663 = vmatmul.mubr.bf16.vlgmr.msra.gmra.mrb[56].mxu1 %v2094_v26 }
0x165f   :  { %4668 = vmatprep.mubr.msk.bf16.mxu0 %vm5389_vm0, %v5388_v20  ;;  %4674 = vmatprep.mubr.msk.bf16.mxu1 %vm5389_vm0, %v5388_v20 }
0x1731   :  { %v2308_v39 = vpop.f32.mrb[56].mxu0  ;;  %v2351_v32 = vpop.f32.mrb[56].mxu1 }
0x1732   :  { %v2309_v34 = vadd.f32 %v2308_v39, %v2134_v0  ;;  %v2352_v35 = vadd.f32 %v2351_v32, %v2142_v36  ;;  %v2310_v31 = vpop.f32.mrb[57].mxu0  ;;  %v4664_v38 = vpop.f32.mrb[57].mxu1 }
0x1733   :  { %v2311_v41 = vadd.f32 %v2310_v31, %v2138_v19  ;;  %v2312_v43 = vpop.f32.mrb[58].mxu0  ;;  %v2354_v44 = vpop.f32.mrb[58].mxu1 }
0x1734   :  { %v2375_v45 = vmul.f32 0.17677669, %v2309_v34  ;;  %v6038_v46 = vpack.c.bf16 %v2352_v35, %v2352_v35  ;;  %v6040_v47 = vadd.f32 %v2312_v43, %v2134_v0  ;;  %v6042_v23 = vadd.f32 %v2354_v44, %v2142_v36  ;;  %v2314_v8 = vpop.f32.mrb[59].mxu0  ;;  %v4665_v48 = vpop.f32.mrb[59].mxu1  ;;  %v6112_v36 = vld [vmem:[%s6379_s4 + $0x48] sm:$0xff]  }
0x1735   :  { %v6044_v22 = vpack.c.bf16 %v2311_v41, %v2311_v41  ;;  %v6046_v25 = vadd.f32 %v2314_v8, %v2138_v19 }
0x1736   :  { %v6048_v57 = vpack.c.bf16 %v2375_v45, %v2375_v45  ;;  %v2441_v49 = vsel %vm550_vm3, %v6038_v46, 0 }
0x1737   :  { %4673 = vmatpush3.bf16.msra.mxu1 %v2441_v49  ;;  %2488 = vrot.lane.b32.xlu1 %v6044_v22, %s5390_s8  ;;  %v2382_v50 = vsel %vm486_vm1, %v6044_v22, 0 }
0x1738   :  { %4667 = vmatpush3.bf16.xpose.msra.mxu0 %v2382_v50  ;;  %2485 = vrot.lane.b32.xlu0 %v6048_v57, %s5390_s8 }
0x1739   :  { %4678 = vmatprep.subr.bf16.mxu0 %v5388_v20  ;;  %4684 = vmatprep.subr.bf16.mxu1 %v5388_v20 }
0x173f   :  { %4669 = vmatmul.mubr.msk.bf16.vlgmr.msra.gmra.mrb[60].mxu0 %vm486_vm1, %v6048_v57 }
0x1740   :  { %4680 = vmatprep.mubr.msk.bf16.mxu0 %vm5389_vm0, %v5388_v20 }
0x17a9   :  { %v2489_v53 = vpop.permute.xlu1 %2488 }
0x17aa   :  { %v2494_v54 = vsel %vm486_vm1, %v2489_v53, 0  ;;  %v2486_v55 = vpop.permute.xlu0 %2485 }
0x17ab   :  { %4679 = vmatpush3.bf16.xpose.msra.mxu0 %v2494_v54 }
0x17ac   :  { %4690 = vmatprep.subr.bf16.mxu0 %v5388_v20 }
0x17b2   :  { %4681 = vmatmul.mubr.msk.bf16.vlgmr.msra.gmra.mrb[64].mxu0 %vm486_vm1, %v2486_v55 }
0x17b3   :  { %4694 = vmatprep.mubr.msk.bf16.mxu0 %vm5389_vm0, %v5388_v20  ;;  %4691 = vmatpush3.bf16.msra.mxu0 %v6089_v29 }
0x17b4   :  { %4692 = vmatprep.subr.bf16.mxu0 %v5388_v20 }
0x17b7   :  { %4693 = vmatpush3.bf16.msra.mxu0 %v6095_v30 }
0x17b8   :  { %4706 = vmatprep.subr.bf16.mxu0 %v5388_v20 }
0x1812   :  { %v2418_v56 = vpop.f32.mrb[60].mxu0 }
0x1813   :  { %v2419_v60 = vadd.f32 %v6069_v58, %v2418_v56  ;;  %v4670_v37 = vpop.f32.mrb[61].mxu0 }
0x1814   :  { %v2421_v12 = vpop.f32.mrb[62].mxu0 }
0x1815   :  { %v4671_v33 = vpop.f32.mrb[63].mxu0  ;;  %v2424_v62 = vsel %vm533_vm2, %v2419_v60, -inf }
0x1816   :  { %2425 = vmax.xlane.f32.xlu1 %v2424_v62 }
0x1885   :  { %v2530_v63 = vpop.f32.mrb[64].mxu0 }
0x1886   :  { %v2531_v1 = vadd.f32 %v6069_v58, %v2530_v63  ;;  %v4682_v59 = vpop.f32.mrb[65].mxu0 }
0x1887   :  { %v2533_v61 = vpop.f32.mrb[66].mxu0 }
0x1888   :  { %v4683_v2 = vpop.f32.mrb[67].mxu0  ;;  %v2536_v3 = vsel %vm533_vm2, %v2531_v1, -inf }
0x1889   :  { %2537 = vmax.xlane.f32.xlu0 %v2536_v3 }
0x189f   :  { %2710 = vrot.lane.b32.xlu0 %v6044_v22, %s5375_s5 }
0x18a3   :  { %v2426_v4 = vpop.xlane.xlu1 %2425 }
0x18a4   :  { %v2427_v5 = vsub.f32 %v2419_v60, %v2426_v4 }
0x18a6   :  { %v2428_v6 = vmul.f32 1.442695, %v2427_v5 }
0x18a8   :  { %5043 = vpow2.f32 %v2428_v6 }
0x18b2   :  { %v5044_v51 = vpop.eup %5043 }
0x18b3   :  { %v2430_v7 = vsel %vm533_vm2, %v5044_v51, 0.0 }
0x18b4   :  { %2431 = vadd.xlane.f32.xlu1 %v2430_v7 }
0x1916   :  { %v2538_v9 = vpop.xlane.xlu0 %2537 }
0x1917   :  { %v2539_v40 = vsub.f32 %v2531_v1, %v2538_v9 }
0x1919   :  { %v2540_v10 = vmul.f32 1.442695, %v2539_v40 }
0x191a   :  { %v2711_v31 = vpop.permute.xlu0 %2710 }
0x191b   :  { %5045 = vpow2.f32 %v2540_v10  ;;  %v2716_v45 = vsel %vm486_vm1, %v2711_v31, 0 }
0x1925   :  { %v5046_v11 = vpop.eup %5045 }
0x1926   :  { %v2542_v13 = vsel %vm533_vm2, %v5046_v11, 0.0 }
0x1927   :  { %2543 = vadd.xlane.f32.xlu1 %v2542_v13 }
0x1938   :  { %2549 = vrot.lane.b32.xlu1 %v6038_v46, %s5390_s8 }
0x193c   :  { %2708 = vrot.lane.b32.xlu1 %v6048_v57, %s5375_s5 }
0x1941   :  { %v2432_v15 = vpop.xlane.xlu1 %2431 }
0x1942   :  { %5047 = vrcp.f32 %v2432_v15 }
0x194c   :  { %v5048_v16 = vpop.eup %5047 }
0x194d   :  { %v2434_v17 = vmul.f32 %v5048_v16, %v5044_v51  ;;  %v6144_v51 = vld [vmem:[%s6379_s4 + $0x60] sm:$0xff]   ;;  %v6161_v16 = vld [vmem:[%s6379_s4 + $0x68] sm:$0xff]  }
0x194f   :  { %v2435_v42 = vpack.c.bf16 %v2434_v17, %v2434_v17 }
0x1951   :  { %4675 = vmatmul.mubr.msk.bf16.vlgmr.msra.gmra.mrb[60].mxu1 %vm533_vm2, %v2435_v42 }
0x1952   :  { %4686 = vmatprep.mubr.msk.bf16.mxu1 %vm5389_vm0, %v5388_v20 }
0x19b4   :  { %v2544_v14 = vpop.xlane.xlu1 %2543 }
0x19b5   :  { %5049 = vrcp.f32 %v2544_v14 }
0x19b8   :  { %v2550_v52 = vpop.permute.xlu1 %2549 }
0x19b9   :  { %v2555_v18 = vsel %vm550_vm3, %v2550_v52, 0 }
0x19ba   :  { %4685 = vmatpush3.bf16.msra.mxu1 %v2555_v18 }
0x19bb   :  { %4698 = vmatprep.subr.bf16.mxu1 %v5388_v20 }
0x19bc   :  { %v2709_v48 = vpop.permute.xlu1 %2708 }
0x19bf   :  { %v5050_v21 = vpop.eup %5049 }
0x19c0   :  { %v2546_v26 = vmul.f32 %v5050_v21, %v5046_v11 }
0x19c2   :  { %v2547_v0 = vpack.c.bf16 %v2546_v26, %v2546_v26 }
0x19c4   :  { %4687 = vmatmul.mubr.msk.bf16.vlgmr.msra.gmra.mrb[64].mxu1 %vm533_vm2, %v2547_v0 }
0x19c5   :  { %4699 = vmatpush3.bf16.msra.mxu1 %v6105_v28  ;;  %4702 = vmatprep.mubr.msk.bf16.mxu1 %vm5389_vm0, %v5388_v20 }
0x19c6   :  { %4700 = vmatprep.subr.bf16.mxu1 %v5388_v20 }
0x19c9   :  { %4701 = vmatpush3.bf16.msra.mxu1 %v6112_v36 }
0x19ca   :  { %4712 = vmatprep.subr.bf16.mxu1 %v5388_v20 }
0x1a24   :  { %v2477_v19 = vpop.f32.mrb[60].mxu1 }
0x1a25   :  { %v2483_v39 = vpack.c.bf16 %v2477_v19, %v2477_v19  ;;  %v4676_v32 = vpop.f32.mrb[61].mxu1 }
0x1a26   :  { %v2480_v34 = vpop.f32.mrb[62].mxu1 }
0x1a27   :  { %v4677_v35 = vpop.f32.mrb[63].mxu1  ;;  %4703 = vmatmul.mubr.msk.bf16.vlgmr.msra.gmra.mrb[68].mxu1 %vm486_vm1, %v2483_v39  ;;  %v3042_v34 = vmul.f32 0.17677669, %v6040_v47 }
0x1a28   :  { %4714 = vmatprep.mubr.msk.bf16.mxu1 %vm5389_vm0, %v5388_v20 }
0x1a29   :  { %v6173_v35 = vpack.c.bf16 %v3042_v34, %v3042_v34 }
0x1a97   :  { %v2591_v38 = vpop.f32.mrb[64].mxu1 }
0x1a98   :  { %v2597_v41 = vpack.c.bf16 %v2591_v38, %v2591_v38  ;;  %v4688_v43 = vpop.f32.mrb[65].mxu1 }
0x1a99   :  { %v2594_v44 = vpop.f32.mrb[66].mxu1 }
0x1a9a   :  { %v4689_v8 = vpop.f32.mrb[67].mxu1  ;;  %4695 = vmatmul.mubr.msk.bf16.vlgmr.msra.gmra.mrb[68].mxu0 %vm486_vm1, %v2597_v41 }
0x1a9b   :  { %4707 = vmatpush3.bf16.xpose.msra.mxu0 %v2716_v45  ;;  %4708 = vmatprep.mubr.msk.bf16.mxu0 %vm5389_vm0, %v5388_v20 }
0x1a9c   :  { %4718 = vmatprep.subr.bf16.mxu0 %v5388_v20 }
0x1aa2   :  { %4709 = vmatmul.mubr.msk.bf16.vlgmr.msra.gmra.mrb[72].mxu0 %vm486_vm1, %v2709_v48 }
0x1aa3   :  { %4722 = vmatprep.mubr.msk.bf16.mxu0 %vm5389_vm0, %v5388_v20  ;;  %4719 = vmatpush3.bf16.msra.mxu0 %v6144_v51 }
0x1aa4   :  { %4720 = vmatprep.subr.bf16.mxu0 %v5388_v20 }
0x1aa7   :  { %4721 = vmatpush3.bf16.msra.mxu0 %v6161_v16 }
0x1aa8   :  { %4732 = vmatprep.subr.bf16.mxu0 %v5388_v20 }
0x1afa   :  { %v2702_v49 = vpop.f32.mrb[68].mxu1 }
0x1afb   :  { %v4704_v50 = vpop.f32.mrb[69].mxu1 }
0x1afc   :  { %v2705_v53 = vpop.f32.mrb[70].mxu1  ;;  %v6192_v50 = vld [vmem:[%s6379_s4 + $0x70] sm:$0xff]  }
0x1afd   :  { %v4705_v54 = vpop.f32.mrb[71].mxu1 }
0x1b6d   :  { %v2647_v55 = vpop.f32.mrb[68].mxu0 }
0x1b6e   :  { %v6130_v56 = vadd.f32 %v2702_v49, %v2647_v55  ;;  %v4696_v60 = vpop.f32.mrb[69].mxu0 }
0x1b6f   :  { %v2650_v37 = vpop.f32.mrb[70].mxu0 }
0x1b70   :  { %v4697_v12 = vpop.f32.mrb[71].mxu0 }
0x1b75   :  { %v2752_v33 = vpop.f32.mrb[72].mxu0 }
0x1b76   :  { %v2753_v62 = vadd.f32 %v6069_v58, %v2752_v33  ;;  %v4710_v63 = vpop.f32.mrb[73].mxu0 }
0x1b77   :  { %v2755_v1 = vpop.f32.mrb[74].mxu0 }
0x1b78   :  { %v4711_v59 = vpop.f32.mrb[75].mxu0  ;;  %v2758_v61 = vsel %vm533_vm2, %v2753_v62, -inf  ;;  %v6224_v1 = vpack.c.bf16 %v6042_v23, %v6042_v23 }
0x1b79   :  { %2759 = vmax.xlane.f32.xlu1 %v2758_v61 }
0x1b8a   :  { %2877 = vrot.lane.b32.xlu1 %v6044_v22, %s5391_s29 }
0x1b8e   :  { %2875 = vrot.lane.b32.xlu1 %v6048_v57, %s5391_s29 }
0x1c06   :  { %v2760_v2 = vpop.xlane.xlu1 %2759 }
0x1c07   :  { %v2761_v3 = vsub.f32 %v2753_v62, %v2760_v2 }
0x1c09   :  { %v2762_v4 = vmul.f32 1.442695, %v2761_v3 }
0x1c0a   :  { %v2878_v10 = vpop.permute.xlu1 %2877 }
0x1c0b   :  { %5051 = vpow2.f32 %v2762_v4  ;;  %v2883_v13 = vsel %vm486_vm1, %v2878_v10, 0 }
0x1c0e   :  { %v2876_v15 = vpop.permute.xlu1 %2875 }
0x1c15   :  { %v5052_v5 = vpop.eup %5051 }
0x1c16   :  { %v2764_v6 = vsel %vm533_vm2, %v5052_v5, 0.0 }
0x1c17   :  { %2765 = vadd.xlane.f32.xlu0 %v2764_v6 }
0x1c2d   :  { %2770 = vrot.lane.b32.xlu0 %v6038_v46, %s5375_s5 }
0x1ca4   :  { %v2766_v22 = vpop.xlane.xlu0 %2765 }
0x1ca5   :  { %5053 = vrcp.f32 %v2766_v22 }
0x1ca8   :  { %v2771_v57 = vpop.permute.xlu0 %2770 }
0x1ca9   :  { %v2776_v7 = vsel %vm550_vm3, %v2771_v57, 0 }
0x1caa   :  { %4713 = vmatpush3.bf16.msra.mxu1 %v2776_v7 }
0x1cab   :  { %4726 = vmatprep.subr.bf16.mxu1 %v5388_v20 }
0x1caf   :  { %v5054_v9 = vpop.eup %5053 }
0x1cb0   :  { %v2768_v40 = vmul.f32 %v5054_v9, %v5052_v5 }
0x1cb2   :  { %v2769_v11 = vpack.c.bf16 %v2768_v40, %v2768_v40 }
0x1cb4   :  { %4715 = vmatmul.mubr.msk.bf16.vlgmr.msra.gmra.mrb[72].mxu1 %vm533_vm2, %v2769_v11 }
0x1cb5   :  { %4727 = vmatpush3.bf16.xpose.msra.mxu1 %v2883_v13  ;;  %4728 = vmatprep.mubr.msk.bf16.mxu1 %vm5389_vm0, %v5388_v20 }
0x1cb6   :  { %4738 = vmatprep.subr.bf16.mxu1 %v5388_v20 }
0x1cbc   :  { %4729 = vmatmul.mubr.msk.bf16.vlgmr.msra.gmra.mrb[76].mxu1 %vm486_vm1, %v2876_v15 }
0x1cbd   :  { %4742 = vmatprep.mubr.msk.bf16.mxu1 %vm5389_vm0, %v5388_v20  ;;  %4739 = vmatpush3.bf16.msra.mxu1 %v6192_v50 }
0x1cbe   :  { %4740 = vmatprep.subr.bf16.mxu1 %v5388_v20 }
0x1d87   :  { %v2812_v17 = vpop.f32.mrb[72].mxu1 }
0x1d88   :  { %v2818_v42 = vpack.c.bf16 %v2812_v17, %v2812_v17  ;;  %v4716_v14 = vpop.f32.mrb[73].mxu1 }
0x1d89   :  { %v2815_v52 = vpop.f32.mrb[74].mxu1 }
0x1d8a   :  { %v4717_v18 = vpop.f32.mrb[75].mxu1  ;;  %4723 = vmatmul.mubr.msk.bf16.vlgmr.msra.gmra.mrb[76].mxu0 %vm486_vm1, %v2818_v42 }
0x1d8b   :  { %4734 = vmatprep.mubr.msk.bf16.mxu0 %vm5389_vm0, %v5388_v20 }
0x1d8f   :  { %v2919_v21 = vpop.f32.mrb[76].mxu1 }
0x1d90   :  { %v2920_v26 = vadd.f32 %v6069_v58, %v2919_v21  ;;  %v4730_v0 = vpop.f32.mrb[77].mxu1 }
0x1d91   :  { %v2922_v19 = vpop.f32.mrb[78].mxu1 }
0x1d92   :  { %v4731_v39 = vpop.f32.mrb[79].mxu1  ;;  %v2925_v32 = vsel %vm533_vm2, %v2920_v26, -inf }
0x1d93   :  { %2926 = vmax.xlane.f32.xlu0 %v2925_v32 }
0x1da9   :  { %2937 = vrot.lane.b32.xlu0 %v6038_v46, %s5391_s29  ;;  %v6182_v46 = vpack.c.bf16 %v6046_v25, %v6046_v25  ;;  %v6198_v25 = vld [vmem:[%s6379_s4 + $0x78] sm:$0xff]  }
0x1daa   :  { %4741 = vmatpush3.bf16.msra.mxu1 %v6198_v25 }
0x1dab   :  { %4752 = vmatprep.subr.bf16.mxu1 %v5388_v20  ;;  %v3049_v12 = vsel %vm486_vm1, %v6182_v46, 0 }
0x1dad   :  { %3152 = vrot.lane.b32.xlu0 %v6173_v35, %s5390_s8 }
0x1e20   :  { %v2927_v31 = vpop.xlane.xlu0 %2926 }
0x1e21   :  { %v2928_v38 = vsub.f32 %v2920_v26, %v2927_v31 }
0x1e23   :  { %v2929_v41 = vmul.f32 1.442695, %v2928_v38 }
0x1e24   :  { %v2938_v43 = vpop.permute.xlu0 %2937 }
0x1e25   :  { %5055 = vpow2.f32 %v2929_v41  ;;  %v2943_v44 = vsel %vm550_vm3, %v2938_v43, 0 }
0x1e26   :  { %4733 = vmatpush3.bf16.msra.mxu0 %v2943_v44 }
0x1e27   :  { %4746 = vmatprep.subr.bf16.mxu0 %v5388_v20 }
0x1e28   :  { %v3153_v63 = vpop.permute.xlu0 %3152 }
0x1e2f   :  { %v5056_v45 = vpop.eup %5055 }
0x1e30   :  { %v2931_v47 = vsel %vm533_vm2, %v5056_v45, 0.0 }
0x1e31   :  { %2932 = vadd.xlane.f32.xlu1 %v2931_v47 }
0x1e42   :  { %3155 = vrot.lane.b32.xlu1 %v6182_v46, %s5390_s8 }
0x1e5d   :  { %v2868_v8 = vpop.f32.mrb[76].mxu0 }
0x1e5e   :  { %v6187_v48 = vadd.f32 %v2868_v8, %v6130_v56  ;;  %v4724_v49 = vpop.f32.mrb[77].mxu0 }
0x1e5f   :  { %v2871_v53 = vpop.f32.mrb[78].mxu0 }
0x1e60   :  { %v4725_v54 = vpop.f32.mrb[79].mxu0 }
0x1ebe   :  { %v2933_v55 = vpop.xlane.xlu1 %2932 }
0x1ebf   :  { %5057 = vrcp.f32 %v2933_v55 }
0x1ec2   :  { %v3156_v33 = vpop.permute.xlu1 %3155 }
0x1ec3   :  { %v3161_v62 = vsel %vm486_vm1, %v3156_v33, 0 }
0x1ec9   :  { %v5058_v56 = vpop.eup %5057 }
0x1eca   :  { %v2935_v60 = vmul.f32 %v5058_v56, %v5056_v45 }
0x1ecc   :  { %v2936_v37 = vpack.c.bf16 %v2935_v60, %v2935_v60 }
0x1ece   :  { %4735 = vmatmul.mubr.msk.bf16.vlgmr.msra.gmra.mrb[80].mxu0 %vm533_vm2, %v2936_v37 }
0x1ecf   :  { %4747 = vmatpush3.bf16.xpose.msra.mxu0 %v3049_v12  ;;  %4748 = vmatprep.mubr.msk.bf16.mxu0 %vm5389_vm0, %v5388_v20 }
0x1ed0   :  { %4758 = vmatprep.subr.bf16.mxu0 %v5388_v20 }
0x1ed6   :  { %4749 = vmatmul.mubr.msk.bf16.vlgmr.msra.gmra.mrb[84].mxu0 %vm486_vm1, %v6173_v35 }
0x1ed7   :  { %4759 = vmatpush3.bf16.xpose.msra.mxu0 %v3161_v62  ;;  %4760 = vmatprep.mubr.msk.bf16.mxu0 %vm5389_vm0, %v5388_v20 }
0x1ed8   :  { %4770 = vmatprep.subr.bf16.mxu0 %v5388_v20 }
0x1ede   :  { %4761 = vmatmul.mubr.msk.bf16.vlgmr.msra.gmra.mrb[88].mxu0 %vm486_vm1, %v3153_v63 }
0x1edf   :  { %4771 = vmatpush3.bf16.msra.mxu0 %v6089_v29  ;;  %4774 = vmatprep.mubr.msk.bf16.mxu0 %vm5389_vm0, %v5388_v20  ;;  %v3108_v29 = vsel %vm550_vm3, %v6224_v1, 0 }
0x1ee0   :  { %4772 = vmatprep.subr.bf16.mxu0 %v5388_v20 }
0x1ee3   :  { %4773 = vmatpush3.bf16.msra.mxu0 %v6095_v30 }
0x1ee4   :  { %4786 = vmatprep.subr.bf16.mxu0 %v5388_v20 }
0x1fa1   :  { %v2979_v59 = vpop.f32.mrb[80].mxu0 }
0x1fa2   :  { %v2985_v61 = vpack.c.bf16 %v2979_v59, %v2979_v59  ;;  %v4736_v2 = vpop.f32.mrb[81].mxu0 }
0x1fa3   :  { %v2982_v3 = vpop.f32.mrb[82].mxu0 }
0x1fa4   :  { %v4737_v4 = vpop.f32.mrb[83].mxu0  ;;  %4743 = vmatmul.mubr.msk.bf16.vlgmr.msra.gmra.mrb[80].mxu1 %vm486_vm1, %v2985_v61 }
0x1fa5   :  { %4753 = vmatpush3.bf16.msra.mxu1 %v3108_v29  ;;  %4754 = vmatprep.mubr.msk.bf16.mxu1 %vm5389_vm0, %v5388_v20 }
0x1fa6   :  { %4764 = vmatprep.subr.bf16.mxu1 %v5388_v20 }
0x1fa9   :  { %v3085_v30 = vpop.f32.mrb[84].mxu0 }
0x1faa   :  { %v3086_v23 = vadd.f32 %v6069_v58, %v3085_v30  ;;  %v4750_v5 = vpop.f32.mrb[85].mxu0 }
0x1fab   :  { %v3088_v6 = vpop.f32.mrb[86].mxu0 }
0x1fac   :  { %v4751_v22 = vpop.f32.mrb[87].mxu0  ;;  %v3091_v57 = vsel %vm533_vm2, %v3086_v23, -inf }
0x1fad   :  { %3092 = vmax.xlane.f32.xlu1 %v3091_v57 }
0x1fb1   :  { %v3197_v7 = vpop.f32.mrb[88].mxu0 }
0x1fb2   :  { %v3198_v9 = vadd.f32 %v6069_v58, %v3197_v7  ;;  %v4762_v40 = vpop.f32.mrb[89].mxu0 }
0x1fb3   :  { %v3200_v10 = vpop.f32.mrb[90].mxu0 }
0x1fb4   :  { %v4763_v11 = vpop.f32.mrb[91].mxu0  ;;  %v3203_v13 = vsel %vm533_vm2, %v3198_v9, -inf }
0x1fb5   :  { %3204 = vmax.xlane.f32.xlu0 %v3203_v13 }
0x203a   :  { %v3093_v15 = vpop.xlane.xlu1 %3092 }
0x203b   :  { %v3094_v17 = vsub.f32 %v3086_v23, %v3093_v15 }
0x203d   :  { %v3095_v42 = vmul.f32 1.442695, %v3094_v17 }
0x203f   :  { %5059 = vpow2.f32 %v3095_v42 }
0x2042   :  { %v3205_v14 = vpop.xlane.xlu0 %3204 }
0x2043   :  { %v3206_v52 = vsub.f32 %v3198_v9, %v3205_v14 }
0x2045   :  { %v3207_v18 = vmul.f32 1.442695, %v3206_v52 }
0x2047   :  { %5061 = vpow2.f32 %v3207_v18 }
0x2049   :  { %v5060_v21 = vpop.eup %5059 }
0x204a   :  { %v3097_v26 = vsel %vm533_vm2, %v5060_v21, 0.0 }
0x204b   :  { %3098 = vadd.xlane.f32.xlu0 %v3097_v26 }
0x2051   :  { %v5062_v0 = vpop.eup %5061 }
0x2052   :  { %v3209_v19 = vsel %vm533_vm2, %v5062_v0, 0.0 }
0x2053   :  { %3210 = vadd.xlane.f32.xlu1 %v3209_v19 }
0x2061   :  { %3216 = vrot.lane.b32.xlu0 %v6224_v1, %s5390_s8 }
0x2064   :  { %3353 = vrot.lane.b32.xlu1 %v6182_v46, %s5375_s5 }
0x2068   :  { %3351 = vrot.lane.b32.xlu1 %v6173_v35, %s5375_s5 }
0x2077   :  { %v3035_v39 = vpop.f32.mrb[80].mxu1 }
0x2078   :  { %v6245_v32 = vadd.f32 %v3035_v39, %v6187_v48  ;;  %v4744_v34 = vpop.f32.mrb[81].mxu1 }
0x2079   :  { %v3038_v31 = vpop.f32.mrb[82].mxu1 }
0x207a   :  { %v4745_v38 = vpop.f32.mrb[83].mxu1 }
0x20d8   :  { %v3099_v41 = vpop.xlane.xlu0 %3098 }
0x20d9   :  { %5063 = vrcp.f32 %v3099_v41 }
0x20dc   :  { %v3217_v47 = vpop.permute.xlu0 %3216 }
0x20dd   :  { %v3222_v49 = vsel %vm550_vm3, %v3217_v47, 0 }
0x20e0   :  { %v3211_v43 = vpop.xlane.xlu1 %3210 }
0x20e1   :  { %5065 = vrcp.f32 %v3211_v43 }
0x20e3   :  { %v5064_v44 = vpop.eup %5063 }
0x20e4   :  { %v3101_v45 = vmul.f32 %v5064_v44, %v5060_v21 }
0x20e6   :  { %v3102_v8 = vpack.c.bf16 %v3101_v45, %v3101_v45 }
0x20e8   :  { %4755 = vmatmul.mubr.msk.bf16.vlgmr.msra.gmra.mrb[84].mxu1 %vm533_vm2, %v3102_v8 }
0x20e9   :  { %4765 = vmatpush3.bf16.msra.mxu1 %v3222_v49  ;;  %4766 = vmatprep.mubr.msk.bf16.mxu1 %vm5389_vm0, %v5388_v20 }
0x20ea   :  { %4778 = vmatprep.subr.bf16.mxu1 %v5388_v20 }
0x20eb   :  { %v5066_v48 = vpop.eup %5065 }
0x20ec   :  { %v3213_v53 = vmul.f32 %v5066_v48, %v5062_v0 }
0x20ee   :  { %v3214_v54 = vpack.c.bf16 %v3213_v53, %v3213_v53 }
0x20f0   :  { %4767 = vmatmul.mubr.msk.bf16.vlgmr.msra.gmra.mrb[88].mxu1 %vm533_vm2, %v3214_v54 }
0x20f1   :  { %4779 = vmatpush3.bf16.msra.mxu1 %v6105_v28  ;;  %4782 = vmatprep.mubr.msk.bf16.mxu1 %vm5389_vm0, %v5388_v20  ;;  %v3354_v28 = vpop.permute.xlu1 %3353 }
0x20f2   :  { %4780 = vmatprep.subr.bf16.mxu1 %v5388_v20  ;;  %v3359_v61 = vsel %vm486_vm1, %v3354_v28, 0 }
0x20f5   :  { %4781 = vmatpush3.bf16.msra.mxu1 %v6112_v36  ;;  %v3352_v2 = vpop.permute.xlu1 %3351 }
0x20f6   :  { %4792 = vmatprep.subr.bf16.mxu1 %v5388_v20 }
0x21bb   :  { %v3144_v55 = vpop.f32.mrb[84].mxu1 }
0x21bc   :  { %v3150_v56 = vpack.c.bf16 %v3144_v55, %v3144_v55  ;;  %v4756_v60 = vpop.f32.mrb[85].mxu1 }
0x21bd   :  { %v3147_v37 = vpop.f32.mrb[86].mxu1 }
0x21be   :  { %v4757_v12 = vpop.f32.mrb[87].mxu1  ;;  %4783 = vmatmul.mubr.msk.bf16.vlgmr.msra.gmra.mrb[92].mxu1 %vm486_vm1, %v3150_v56 }
0x21bf   :  { %4794 = vmatprep.mubr.msk.bf16.mxu1 %vm5389_vm0, %v5388_v20 }
0x21c3   :  { %v3258_v33 = vpop.f32.mrb[88].mxu1 }
0x21c4   :  { %v3264_v62 = vpack.c.bf16 %v3258_v33, %v3258_v33  ;;  %v4768_v63 = vpop.f32.mrb[89].mxu1 }
0x21c5   :  { %v3261_v59 = vpop.f32.mrb[90].mxu1 }
0x21c6   :  { %v4769_v36 = vpop.f32.mrb[91].mxu1  ;;  %4775 = vmatmul.mubr.msk.bf16.vlgmr.msra.gmra.mrb[92].mxu0 %vm486_vm1, %v3264_v62 }
0x21c7   :  { %4787 = vmatpush3.bf16.xpose.msra.mxu0 %v3359_v61  ;;  %4788 = vmatprep.mubr.msk.bf16.mxu0 %vm5389_vm0, %v5388_v20 }
0x21c8   :  { %4798 = vmatprep.subr.bf16.mxu0 %v5388_v20 }
0x21ce   :  { %4789 = vmatmul.mubr.msk.bf16.vlgmr.msra.gmra.mrb[96].mxu0 %vm486_vm1, %v3352_v2 }
0x21cf   :  { %4799 = vmatpush3.bf16.msra.mxu0 %v6144_v51  ;;  %4802 = vmatprep.mubr.msk.bf16.mxu0 %vm5389_vm0, %v5388_v20 }
0x21d0   :  { %4800 = vmatprep.subr.bf16.mxu0 %v5388_v20 }
0x21d3   :  { %4801 = vmatpush3.bf16.msra.mxu0 %v6161_v16 }
0x21d4   :  { %4812 = vmatprep.subr.bf16.mxu0 %v5388_v20 }
0x2291   :  { %v3345_v3 = vpop.f32.mrb[92].mxu1 }
0x2292   :  { %v4784_v4 = vpop.f32.mrb[93].mxu1 }
0x2293   :  { %v3348_v29 = vpop.f32.mrb[94].mxu1 }
0x2294   :  { %v4785_v30 = vpop.f32.mrb[95].mxu1 }
0x2299   :  { %v3302_v23 = vpop.f32.mrb[92].mxu0 }
0x229a   :  { %v6274_v5 = vadd.f32 %v3345_v3, %v3302_v23  ;;  %v4776_v6 = vpop.f32.mrb[93].mxu0 }
0x229b   :  { %v3305_v22 = vpop.f32.mrb[94].mxu0 }
0x229c   :  { %v4777_v57 = vpop.f32.mrb[95].mxu0 }
0x22a1   :  { %v3395_v51 = vpop.f32.mrb[96].mxu0 }
0x22a2   :  { %v3396_v7 = vadd.f32 %v6069_v58, %v3395_v51  ;;  %v4790_v9 = vpop.f32.mrb[97].mxu0 }
0x22a3   :  { %v3398_v40 = vpop.f32.mrb[98].mxu0 }
0x22a4   :  { %v4791_v10 = vpop.f32.mrb[99].mxu0  ;;  %v3401_v16 = vsel %vm533_vm2, %v3396_v7, -inf }
0x22a5   :  { %3402 = vmax.xlane.f32.xlu0 %v3401_v16  ;;  %v4987_v10 = vld [vmem:[%s6381_s6 + $0x40] sm:$0xff]   ;;  %v4988_v16 = vld [vmem:[%s6381_s6 + $0x48] sm:$0xff]  }
0x22bb   :  { %3413 = vrot.lane.b32.xlu0 %v6224_v1, %s5375_s5 }
0x22bf   :  { %3506 = vrot.lane.b32.xlu0 %v6173_v35, %s5391_s29 }
0x2332   :  { %v3403_v11 = vpop.xlane.xlu0 %3402 }
0x2333   :  { %v3404_v13 = vsub.f32 %v3396_v7, %v3403_v11 }
0x2335   :  { %v3405_v15 = vmul.f32 1.442695, %v3404_v13 }
0x2336   :  { %v3414_v17 = vpop.permute.xlu0 %3413 }
0x2337   :  { %5067 = vpow2.f32 %v3405_v15  ;;  %v3419_v42 = vsel %vm550_vm3, %v3414_v17, 0  ;;  %v4989_v17 = vld [vmem:[%s6381_s6 + $0x50] sm:$0xff]  }
0x2338   :  { %4793 = vmatpush3.bf16.msra.mxu1 %v3419_v42  ;;  %v4990_v42 = vld [vmem:[%s6381_s6 + $0x58] sm:$0xff]  }
0x2339   :  { %4806 = vmatprep.subr.bf16.mxu1 %v5388_v20 }
0x233a   :  { %v3507_v39 = vpop.permute.xlu0 %3506 }
0x2341   :  { %v5068_v14 = vpop.eup %5067 }
0x2342   :  { %v3407_v52 = vsel %vm533_vm2, %v5068_v14, 0.0 }
0x2343   :  { %3408 = vadd.xlane.f32.xlu1 %v3407_v52  ;;  %v4992_v52 = vld [vmem:[%s6381_s6 + $0x68] sm:$0xff]  }
0x2354   :  { %3508 = vrot.lane.b32.xlu1 %v6182_v46, %s5391_s29 }
0x23d0   :  { %v3409_v18 = vpop.xlane.xlu1 %3408 }
0x23d1   :  { %5069 = vrcp.f32 %v3409_v18  ;;  %v4993_v18 = vld [vmem:[%s6381_s6 + $0x70] sm:$0xff]  }
0x23d4   :  { %v3509_v26 = vpop.permute.xlu1 %3508 }
0x23d5   :  { %v3514_v19 = vsel %vm486_vm1, %v3509_v26, 0  ;;  %v4996_v26 = vld [vmem:[#allocation11 + $0x48] sm:$0xff]  }
0x23db   :  { %v5070_v35 = vpop.eup %5069 }
0x23dc   :  { %v3411_v21 = vmul.f32 %v5070_v35, %v5068_v14  ;;  %v4991_v14 = vld [vmem:[%s6381_s6 + $0x60] sm:$0xff]   ;;  %v4994_v35 = vld [vmem:[%s6381_s6 + $0x78] sm:$0xff]  }
0x23de   :  { %v3412_v0 = vpack.c.bf16 %v3411_v21, %v3411_v21  ;;  %v4995_v21 = vld [vmem:[#allocation11 + $0x40] sm:$0xff]  }
0x23e0   :  { %4795 = vmatmul.mubr.msk.bf16.vlgmr.msra.gmra.mrb[96].mxu1 %vm533_vm2, %v3412_v0  ;;  %v4997_v0 = vld [vmem:[#allocation11 + $0x50] sm:$0xff]  }
0x23e1   :  { %4807 = vmatpush3.bf16.xpose.msra.mxu1 %v3514_v19  ;;  %4808 = vmatprep.mubr.msk.bf16.mxu1 %vm5389_vm0, %v5388_v20  ;;  %v4998_v19 = vld [vmem:[#allocation11 + $0x58] sm:$0xff]  }
0x23e2   :  { %4818 = vmatprep.subr.bf16.mxu1 %v5388_v20 }
0x23e8   :  { %4809 = vmatmul.mubr.msk.bf16.vlgmr.msra.gmra.mrb[100].mxu1 %vm486_vm1, %v3507_v39  ;;  %v4999_v39 = vld [vmem:[#allocation11 + $0x60] sm:$0xff]  }
0x23e9   :  { %4819 = vmatpush3.bf16.msra.mxu1 %v6192_v50  ;;  %4822 = vmatprep.mubr.msk.bf16.mxu1 %vm5389_vm0, %v5388_v20  ;;  %v4219_v50 = vld [vmem:[#allocation8 + $0x1] ss:$0 sm:$0xff] }
0x23ea   :  { %4820 = vmatprep.subr.bf16.mxu1 %v5388_v20  ;;  %v3669_v47 = vadd.f32 %v4219_v50, %v6245_v32 }
0x23ec   :  { %v3671_v48 = vadd.f32 %v3669_v47, %v6022_v24  ;;  %v4220_v47 = vld [vmem:[#allocation14 + $0x1] ss:$0 sm:$0xff] }
0x23ed   :  { %4821 = vmatpush3.bf16.msra.mxu1 %v6198_v25 }
0x23ee   :  { %4846 = vmatprep.subr.bf16.mxu1 %v5388_v20 }
0x24b3   :  { %v3455_v46 = vpop.f32.mrb[96].mxu1 }
0x24b4   :  { %v3461_v34 = vpack.c.bf16 %v3455_v46, %v3455_v46  ;;  %v4796_v31 = vpop.f32.mrb[97].mxu1  ;;  %v5000_v46 = vld [vmem:[#allocation11 + $0x68] sm:$0xff]  }
0x24b5   :  { %v3458_v38 = vpop.f32.mrb[98].mxu1 }
0x24b6   :  { %v4797_v41 = vpop.f32.mrb[99].mxu1  ;;  %4803 = vmatmul.mubr.msk.bf16.vlgmr.msra.gmra.mrb[100].mxu0 %vm486_vm1, %v3461_v34 }
0x24b7   :  { %4814 = vmatprep.mubr.msk.bf16.mxu0 %vm5389_vm0, %v5388_v20 }
0x24bb   :  { %v3550_v43 = vpop.f32.mrb[100].mxu1 }
0x24bc   :  { %v3551_v44 = vadd.f32 %v6069_v58, %v3550_v43  ;;  %v4810_v45 = vpop.f32.mrb[101].mxu1 }
0x24bd   :  { %v3553_v25 = vpop.f32.mrb[102].mxu1 }
0x24be   :  { %v4811_v8 = vpop.f32.mrb[103].mxu1  ;;  %v3556_v49 = vsel %vm533_vm2, %v3551_v44, -inf }
0x24bf   :  { %3557 = vmax.xlane.f32.xlu1 %v3556_v49 }
0x24c3   :  { %3677 = vadd.xlane.f32.xlu1 %v3671_v48 }
0x254c   :  { %v3558_v53 = vpop.xlane.xlu1 %3557 }
0x254d   :  { %v3559_v54 = vsub.f32 %v3551_v44, %v3558_v53 }
0x254f   :  { %v3560_v55 = vmul.f32 1.442695, %v3559_v54 }
0x2550   :  { %v3678_v29 = vpop.xlane.xlu1 %3677 }
0x2551   :  { %5071 = vpow2.f32 %v3560_v55  ;;  %v3681_v23 = vmul.f32 0.0078125, %v3678_v29 }
0x2553   :  { %v3683_v7 = vsub.f32 %v3671_v48, %v3681_v23  ;;  %v4221_v48 = vld [vmem:[#allocation16 + $0x1] ss:$0 sm:$0xff] }
0x2555   :  { %v3685_v40 = vmul.f32 %v3683_v7, %v3683_v7 }
0x255b   :  { %v5072_v56 = vpop.eup %5071 }
0x255c   :  { %v3562_v60 = vsel %vm533_vm2, %v5072_v56, 0.0 }
0x255d   :  { %3563 = vadd.xlane.f32.xlu0 %v3562_v60  ;;  %v5001_v60 = vld [vmem:[#allocation11 + $0x70] sm:$0xff]  }
0x2573   :  { %3568 = vrot.lane.b32.xlu0 %v6224_v1, %s5391_s29 }
0x2589   :  { %v3499_v58 = vpop.f32.mrb[100].mxu0 }
0x258a   :  { %v3505_v32 = vadd.f32 %v3499_v58, %v6274_v5  ;;  %v4804_v37 = vpop.f32.mrb[101].mxu0  ;;  %v5002_v58 = vld [vmem:[#allocation11 + $0x78] sm:$0xff]  }
0x258b   :  { %v3502_v12 = vpop.f32.mrb[102].mxu0 }
0x258c   :  { %v4805_v28 = vpop.f32.mrb[103].mxu0 }
0x25ea   :  { %v3564_v33 = vpop.xlane.xlu0 %3563 }
0x25eb   :  { %5073 = vrcp.f32 %v3564_v33 }
0x25ee   :  { %v3569_v24 = vpop.permute.xlu0 %3568 }
0x25ef   :  { %v3574_v62 = vsel %vm550_vm3, %v3569_v24, 0 }
0x25f0   :  { %4813 = vmatpush3.bf16.msra.mxu0 %v3574_v62 }
0x25f1   :  { %4826 = vmatprep.subr.bf16.mxu0 %v5388_v20 }
0x25f5   :  { %v5074_v63 = vpop.eup %5073 }
0x25f6   :  { %v3566_v59 = vmul.f32 %v5074_v63, %v5072_v56 }
0x25f8   :  { %v3567_v61 = vpack.c.bf16 %v3566_v59, %v3566_v59 }
0x25fa   :  { %4815 = vmatmul.mubr.msk.bf16.vlgmr.msra.gmra.mrb[104].mxu0 %vm533_vm2, %v3567_v61 }
0x25fb   :  { %4842 = vmatprep.mubr.msk.bf16.mxu0 %vm5389_vm0, %v5388_v20  ;;  %4827 = vmatpush3.bf16.msra.mxu0 %v4987_v10 }
0x25fc   :  { %4828 = vmatprep.subr.bf16.mxu0 %v5388_v20 }
0x25ff   :  { %4829 = vmatpush3.bf16.msra.mxu0 %v4988_v16 }
0x2600   :  { %4830 = vmatprep.subr.bf16.mxu0 %v5388_v20 }
0x2603   :  { %4831 = vmatpush3.bf16.msra.mxu0 %v4989_v17 }
0x2604   :  { %4832 = vmatprep.subr.bf16.mxu0 %v5388_v20 }
0x2607   :  { %4833 = vmatpush3.bf16.msra.mxu0 %v4990_v42  ;;  %v4256_v42 = vld [vmem:[#allocation17 + $0x1] ss:$0 sm:$0xff] }
0x2608   :  { %4834 = vmatprep.subr.bf16.mxu0 %v5388_v20 }
0x260b   :  { %4835 = vmatpush3.bf16.msra.mxu0 %v4991_v14 }
0x260c   :  { %4836 = vmatprep.subr.bf16.mxu0 %v5388_v20 }
0x260f   :  { %4837 = vmatpush3.bf16.msra.mxu0 %v4992_v52  ;;  %v4257_v52 = vld [vmem:[#allocation19 + $0x1] ss:$0 sm:$0xff] }
0x2610   :  { %4838 = vmatprep.subr.bf16.mxu0 %v5388_v20 }
0x2613   :  { %4839 = vmatpush3.bf16.msra.mxu0 %v4993_v18 }
0x2614   :  { %4840 = vmatprep.subr.bf16.mxu0 %v5388_v20 }
0x2617   :  { %4841 = vmatpush3.bf16.msra.mxu0 %v4994_v35 }
0x26cd   :  { %v3610_v1 = vpop.f32.mrb[104].mxu0 }
0x26ce   :  { %v3616_v36 = vpack.c.bf16 %v3610_v1, %v3610_v1  ;;  %v4816_v2 = vpop.f32.mrb[105].mxu0  ;;  %v4247_v1 = vld [vmem:[#allocation13 + $0x1] ss:$0 sm:$0xff] }
0x26cf   :  { %v3613_v3 = vpop.f32.mrb[106].mxu0 }
0x26d0   :  { %v4817_v4 = vpop.f32.mrb[107].mxu0  ;;  %4823 = vmatmul.mubr.msk.bf16.vlgmr.msra.gmra.mrb[104].mxu1 %vm486_vm1, %v3616_v36 }
0x26d1   :  { %4862 = vmatprep.mubr.msk.bf16.mxu1 %vm5389_vm0, %v5388_v20  ;;  %4847 = vmatpush3.bf16.msra.mxu1 %v4995_v21 }
0x26d2   :  { %4848 = vmatprep.subr.bf16.mxu1 %v5388_v20 }
0x26d5   :  { %4849 = vmatpush3.bf16.msra.mxu1 %v4996_v26 }
0x26d6   :  { %4850 = vmatprep.subr.bf16.mxu1 %v5388_v20 }
0x26d9   :  { %4851 = vmatpush3.bf16.msra.mxu1 %v4997_v0 }
0x26da   :  { %4852 = vmatprep.subr.bf16.mxu1 %v5388_v20 }
0x26dd   :  { %4853 = vmatpush3.bf16.msra.mxu1 %v4998_v19 }
0x26de   :  { %4854 = vmatprep.subr.bf16.mxu1 %v5388_v20 }
0x26e1   :  { %4855 = vmatpush3.bf16.msra.mxu1 %v4999_v39 }
0x26e2   :  { %4856 = vmatprep.subr.bf16.mxu1 %v5388_v20 }
0x26e5   :  { %4857 = vmatpush3.bf16.msra.mxu1 %v5000_v46 }
0x26e6   :  { %4858 = vmatprep.subr.bf16.mxu1 %v5388_v20 }
0x26e9   :  { %4859 = vmatpush3.bf16.msra.mxu1 %v5001_v60 }
0x26ea   :  { %4860 = vmatprep.subr.bf16.mxu1 %v5388_v20 }
0x26ed   :  { %4861 = vmatpush3.bf16.msra.mxu1 %v5002_v58 }
0x27a3   :  { %v3654_v30 = vpop.f32.mrb[104].mxu1 }
0x27a4   :  { %v3660_v5 = vadd.f32 %v3654_v30, %v3505_v32  ;;  %v4824_v6 = vpop.f32.mrb[105].mxu1  ;;  %v4238_v32 = vld [vmem:[#allocation10 + $0x1] ss:$0 sm:$0xff] }
0x27a5   :  { %v3657_v22 = vpop.f32.mrb[106].mxu1 }
0x27a6   :  { %v3670_v57 = vadd.f32 %v4219_v50, %v3660_v5  ;;  %v4825_v51 = vpop.f32.mrb[107].mxu1 }
0x27a8   :  { %v3672_v9 = vadd.f32 %v3670_v57, %v6024_v27 }
0x27aa   :  { %3679 = vadd.xlane.f32.xlu1 %v3672_v9 }
0x27ae   :  { %3687 = vadd.xlane.f32.xlu1 %v3685_v40 }
0x2837   :  { %v3680_v11 = vpop.xlane.xlu1 %3679 }
0x2838   :  { %v3682_v13 = vmul.f32 0.0078125, %v3680_v11 }
0x283a   :  { %v3684_v27 = vsub.f32 %v3672_v9, %v3682_v13 }
0x283b   :  { %v3688_v34 = vpop.xlane.xlu1 %3687 }
0x283c   :  { %v3686_v15 = vmul.f32 %v3684_v27, %v3684_v27  ;;  %v3691_v31 = vmul.f32 0.0078125, %v3688_v34 }
0x283e   :  { %3689 = vadd.xlane.f32.xlu1 %v3686_v15  ;;  %v3693_v38 = vadd.f32 1e-05, %v3691_v31 }
0x2840   :  { %5075 = vrsqrt.f32 %v3693_v38 }
0x284a   :  { %v5076_v44 = vpop.eup %5075 }
0x284b   :  { %v3697_v45 = vmul.f32 %v5076_v44, %v3683_v7 }
0x284d   :  { %v3705_v49 = vmul.f32 %v4220_v47, %v3697_v45 }
0x284f   :  { %v3713_v54 = vadd.f32 %v4221_v48, %v3705_v49 }
0x28cb   :  { %v3690_v41 = vpop.xlane.xlu1 %3689 }
0x28cc   :  { %v3692_v50 = vmul.f32 0.0078125, %v3690_v41 }
0x28ce   :  { %v3694_v43 = vadd.f32 1e-05, %v3692_v50 }
0x28d0   :  { %5077 = vrsqrt.f32 %v3694_v43 }
0x28da   :  { %v5078_v25 = vpop.eup %5077 }
0x28db   :  { %v3698_v8 = vmul.f32 %v5078_v25, %v3684_v27 }
0x28dd   :  { %v3706_v53 = vmul.f32 %v4220_v47, %v3698_v8 }
0x28df   :  { %v3714_v55 = vadd.f32 %v4221_v48, %v3706_v53  ;;  %v4258_v53 = vld [vmem:[%s6389_s14] ss:$0 sm:$0xff]  ;;  %s5392_s14 = smov [#allocation20]  }
0x28e1   :  { %v3715_v56 = vpack.c.bf16 %v3714_v55, %v3713_v54 }
0x28e3   :  { %4843 = vmatmul.mubr.bf16.vlgmr.msra.gmra.mrb[108].mxu0 %v3715_v56 }
0x29b6   :  { %v3823_v37 = vpop.f32.mrb[108].mxu0 }
0x29b7   :  { %v3824_v12 = vadd.f32 %v4238_v32, %v3823_v37  ;;  %v4844_v28 = vpop.f32.mrb[109].mxu0 }
0x29b8   :  { %v3826_v33 = vpop.f32.mrb[110].mxu0 }
0x29b9   :  { %v3827_v24 = vadd.f32 %v4238_v32, %v3826_v33  ;;  %v4845_v62 = vpop.f32.mrb[111].mxu0  ;;  %v3830_v63 = vmax.f32 %v3824_v12, 0.0 }
0x29bb   :  { %v3831_v59 = vmax.f32 %v3827_v24, 0.0 }
0x29bd   :  { %v3832_v61 = vpack.c.bf16 %v3831_v59, %v3830_v63 }
0x29bf   :  { %4863 = vmatmul.mubr.bf16.vlgmr.msra.gmra.mrb[108].mxu1 %v3832_v61 }
0x2a92   :  { %v3940_v36 = vpop.f32.mrb[108].mxu1 }
0x2a93   :  { %v3941_v2 = vadd.f32 %v4247_v1, %v3940_v36  ;;  %v4864_v3 = vpop.f32.mrb[109].mxu1 }
0x2a94   :  { %v3943_v4 = vpop.f32.mrb[110].mxu1 }
0x2a95   :  { %v3944_v29 = vadd.f32 %v4247_v1, %v3943_v4  ;;  %v4865_v20 = vpop.f32.mrb[111].mxu1  ;;  %v3947_v30 = vadd.f32 %v3941_v2, %v3713_v54 }
0x2a97   :  { %3953 = vadd.xlane.f32.xlu1 %v3947_v30  ;;  %v3948_v23 = vadd.f32 %v3944_v29, %v3714_v55  ;;  %v4259_v55 = vld [vmem:[%s6390_s15] ss:$0 sm:$0xff]  ;;  %s4054_s15 = sshll.u32 %s5392_s14, 4  ;;  %s4055_s15 = int_to_ptr.vmem [resolvable:$true] %s4054_s15 }
0x2a98   :  { %s5332_s28 = scalar_lea.vmem %s4055_s15, 32  ;;  %p5337_p5 = scmp.lt.s32.totalorder %s4055_s15, %s4055_s15 }
0x2a99   :  { %p5333_p4 = scmp.ne.s32.totalorder %s4055_s15, %s5332_s28  ;;  %p5338_p6 = scmp.lt.s32.totalorder %s5332_s28, %s5332_s28 }
0x2a9b   :  { %3955 = vadd.xlane.f32.xlu1 %v3948_v23  ;;  %p5339_p7 = por %p5338_p6, %p5337_p5 }
0x2a9d   :  { %p5340_p8 = pnand %p5339_p7, %p5333_p4 }
0x2b24   :  { %v3954_v5 = vpop.xlane.xlu1 %3953 }
0x2b25   :  { %v3957_v6 = vmul.f32 0.0078125, %v3954_v5 }
0x2b27   :  { %v3959_v22 = vsub.f32 %v3947_v30, %v3957_v6 }
0x2b28   :  { %v3956_v57 = vpop.xlane.xlu1 %3955 }
0x2b29   :  { %v3958_v51 = vmul.f32 0.0078125, %v3956_v57  ;;  %v3961_v7 = vmul.f32 %v3959_v22, %v3959_v22 }
0x2b2b   :  { %v3960_v9 = vsub.f32 %v3948_v23, %v3958_v51  ;;  %3963 = vadd.xlane.f32.xlu0 %v3961_v7 }
0x2b2d   :  { %v3962_v40 = vmul.f32 %v3960_v9, %v3960_v9 }
0x2b2f   :  { %3965 = vadd.xlane.f32.xlu1 %v3962_v40 }
0x2bb8   :  { %v3964_v10 = vpop.xlane.xlu0 %3963 }
0x2bb9   :  { %v3967_v16 = vmul.f32 0.0078125, %v3964_v10 }
0x2bbb   :  { %v3969_v11 = vadd.f32 1e-05, %v3967_v16 }
0x2bbc   :  { %v3966_v13 = vpop.xlane.xlu1 %3965 }
0x2bbd   :  { %5079 = vrsqrt.f32 %v3969_v11  ;;  %v3968_v27 = vmul.f32 0.0078125, %v3966_v13 }
0x2bbf   :  { %v3970_v15 = vadd.f32 1e-05, %v3968_v27 }
0x2bc1   :  { %5081 = vrsqrt.f32 %v3970_v15 }
0x2bc7   :  { %v5080_v17 = vpop.eup %5079 }
0x2bc8   :  { %v3973_v14 = vmul.f32 %v5080_v17, %v3959_v22 }
0x2bca   :  { %v3981_v18 = vmul.f32 %v4256_v42, %v3973_v14 }
0x2bcb   :  { %v5082_v35 = vpop.eup %5081 }
0x2bcc   :  { %v3989_v21 = vadd.f32 %v4257_v52, %v3981_v18  ;;  %v3974_v26 = vmul.f32 %v5082_v35, %v3960_v9 }
0x2bce   :  { %3993 = vadd.xlane.f32.xlu1 %v3989_v21  ;;  %v3982_v0 = vmul.f32 %v4256_v42, %v3974_v26 }
0x2bd0   :  { %v3990_v19 = vadd.f32 %v4257_v52, %v3982_v0 }
0x2bd2   :  { %3995 = vadd.xlane.f32.xlu1 %v3990_v19 }
0x2c5b   :  { %v3994_v39 = vpop.xlane.xlu1 %3993 }
0x2c5c   :  { %v3997_v46 = vmul.f32 0.0078125, %v3994_v39 }
0x2c5e   :  { %v3999_v34 = vsub.f32 %v3989_v21, %v3997_v46 }
0x2c5f   :  { %v3996_v31 = vpop.xlane.xlu1 %3995 }
0x2c60   :  { %v3998_v38 = vmul.f32 0.0078125, %v3996_v31  ;;  %v4001_v41 = vmul.f32 %v3999_v34, %v3999_v34 }
0x2c62   :  { %v4000_v50 = vsub.f32 %v3990_v19, %v3998_v38  ;;  %4003 = vadd.xlane.f32.xlu1 %v4001_v41 }
0x2c64   :  { %v4002_v43 = vmul.f32 %v4000_v50, %v4000_v50 }
0x2c66   :  { %4005 = vadd.xlane.f32.xlu1 %v4002_v43 }
0x2cef   :  { %v4004_v44 = vpop.xlane.xlu1 %4003 }
0x2cf0   :  { %v4007_v45 = vmul.f32 0.0078125, %v4004_v44 }
0x2cf2   :  { %v4009_v47 = vadd.f32 1e-05, %v4007_v45 }
0x2cf3   :  { %v4006_v25 = vpop.xlane.xlu1 %4005 }
0x2cf4   :  { %5083 = vrsqrt.f32 %v4009_v47  ;;  %v4008_v8 = vmul.f32 0.0078125, %v4006_v25 }
0x2cf6   :  { %v4010_v49 = vadd.f32 1e-05, %v4008_v8 }
0x2cf8   :  { %5085 = vrsqrt.f32 %v4010_v49 }
0x2cfe   :  { %v5084_v48 = vpop.eup %5083 }
0x2cff   :  { %v4013_v54 = vmul.f32 %v5084_v48, %v3999_v34 }
0x2d01   :  { %v4021_v56 = vmul.f32 %v4258_v53, %v4013_v54 }
0x2d02   :  { %v5086_v60 = vpop.eup %5085 }
0x2d03   :  { %v4014_v58 = vmul.f32 %v5086_v60, %v4000_v50  ;;  %v4029_v32 = vadd.f32 %v4259_v55, %v4021_v56 }
0x2d05   :  { %v4022_v37 = vmul.f32 %v4258_v53, %v4014_v58  ;;  %v4031_v12 = vrot.slane %v4029_v32, 4 }
0x2d07   :  { %v4030_v28 = vadd.f32 %v4259_v55, %v4022_v37  ;;  %v4032_v33 = vadd.f32 %v4031_v12, %v4029_v32 }
0x2d09   :  { %v4033_v24 = vrot.slane %v4032_v33, 2  ;;  %v4040_v62 = vrot.slane %v4030_v28, 4 }
0x2d0b   :  { %v4034_v63 = vadd.f32 %v4033_v24, %v4032_v33  ;;  %v4041_v59 = vadd.f32 %v4040_v62, %v4030_v28 }
0x2d0d   :  { %v4035_v61 = vrot.slane %v4034_v63, 1  ;;  %v4042_v1 = vrot.slane %v4041_v59, 2 }
0x2d0f   :  { %v4036_v36 = vadd.f32 %v4035_v61, %v4034_v63  ;;  %v4043_v2 = vadd.f32 %v4042_v1, %v4041_v59 }
0x2d11   :  { %v4038_v3 = vmul.f32 0.125, %v4036_v36  ;;  %v4044_v4 = vrot.slane %v4043_v2, 1 }
0x2d13   :  { %4039 = vst [vmem:[#allocation20] sm:$0x1] %v4038_v3  ;;  %v4045_v29 = vadd.f32 %v4044_v4, %v4043_v2 }
0x2d15   :  { %v4046_v20 = vmul.f32 0.125, %v4045_v29 }
0x2d17   :  { %4047 = vst [vmem:[#allocation20 + $0x1] sm:$0x1] %v4046_v20 }
0x2d18   :  { %5343 = shalt.err (!%p5340_p8)
}
0x2d19   :  { %s5344_s19 = scalar_lea.hbm %s6391_s16, 32 }
0x2d1a   :  { %p5345_p9 = scmp.ne.s32.totalorder %s6391_s16, %s5344_s19  ;;  %p5348_p10 = scmp.lt.u32.totalorder %s5344_s19, %s6391_s16 }
0x2d1c   :  { %p5350_p11 = pnand %p5348_p10, %p5345_p9 }
0x2d1e   :  { %5353 = shalt.err (!%p5350_p11)
}
0x2d1f   :  { %4057 = dma.vmem_to_hbm [thread:$0]  %s4055_s15, 32, %s6391_s16, [#allocation4]  }
0x2d20   :  { %5366 = dma.done.wait [#allocation4], 32  }
0x2d21   :  { %5367 = vsyncadd [#allocation4], 4294967264 }
0x2d22   :  { %4061 = vsyncpa [#allocation3], 1 }
0x2d23   :  { %4062 = vsyncpa [#allocation6], 1 }
0x2d24   :  { %4063 = vsyncpa [#allocation9], 1 }
0x2d25   :  { %4064 = vsyncpa [#allocation12], 1 }
0x2d26   :  { %4065 = vsyncpa [#allocation15], 1 }
0x2d27   :  { %4066 = vsyncpa [#allocation18], 1 }
0x2d28   :  { %4067 = vsyncpa [#allocation4], 1 }

</bundles_post_ra>
